<compile_context>
chip_gen: v7x
topology: tpu7x:2x2x1
jax: 0.10.0
libtpu: 0.0.40
codegen_flags: <defaults>
</compile_context>

<pallas_src>
import functools
import math

import jax
import jax.numpy as jnp
from jax import lax
from jax.experimental import pallas as pl
from jax.experimental.pallas import tpu as pltpu


# ------------------------------------------------------------------ kernel

def _fused_lstm_model_kernel(x_ref, *refs, seq_len, batch, hidden, n_layers,
                             weight_decay):
    """Whole LSTM_model forward in one kernel invocation (no grid).

    Inputs (all VMEM-resident, no pipelining):
      x_ref : (S, B, D0)  time-major input sequence
      per layer l (n_layers layers, 4 refs each):
        wih_ref : (D_l, 4H)  W_ih^T, gate columns reordered to [i, f, o, g]
        whh_ref : (H,   4H)  W_hh^T, same reorder
        bih_ref : (1,  4H)   b_ih (reordered)
        bhh_ref : (1,  4H)   b_hh (reordered)
      fcw_ref : (H, C)  fc.weight^T
      fcb_ref : (1, C)  fc.bias
    Outputs:
      logits_ref : (B, C)
      l2_ref     : (1, 1)  weight_decay * sum_p ||p||_F
    Scratch:
      seq_scr   : (S, B, H)   current layer's hidden-state sequence
      xproj_scr : (S, B, 4H)  hoisted input projections (off the serial chain)
    """
    S, H = seq_len, hidden
    lstm_refs = refs[:4 * n_layers]
    fcw_ref = refs[4 * n_layers]
    fcb_ref = refs[4 * n_layers + 1]
    logits_ref = refs[4 * n_layers + 2]
    l2_ref = refs[4 * n_layers + 3]
    seq_scr = refs[4 * n_layers + 4]
    xproj_scr = refs[4 * n_layers + 5]

    def run_layer(read_in, wih_ref, whh_ref, bih_ref, bhh_ref, store_seq):
        bias = bih_ref[...] + bhh_ref[...]        # (1, 4H), added once per layer
        wih = wih_ref[...]
        whh = whh_ref[...]

        # Hoisted input projection: independent of the recurrence, so it stays
        # off the serial critical path (only h @ W_hh remains there).
        def proj_body(t, carry):
            xproj_scr[t] = (jnp.dot(read_in(t), wih,
                                    preferred_element_type=jnp.float32) + bias)
            return carry

        lax.fori_loop(0, S, proj_body, 0, unroll=True)

        # Sequential recurrence; h/c carried in vregs (never round-trip VMEM).
        def rec_body(t, carry):
            h, c = carry
            g = xproj_scr[t] + jnp.dot(h, whh,
                                       preferred_element_type=jnp.float32)
            ifo = jax.nn.sigmoid(g[:, :3 * H])    # [i | f | o] in one EUP pass
            gg = jnp.tanh(g[:, 3 * H:])           # cell gate
            i = ifo[:, 0 * H:1 * H]
            f = ifo[:, 1 * H:2 * H]
            o = ifo[:, 2 * H:3 * H]
            c_new = f * c + i * gg
            h_new = o * jnp.tanh(c_new)
            if store_seq:                          # VMEM only, never HBM
                seq_scr[t] = h_new
            return (h_new, c_new)

        zeros = jnp.zeros((batch, H), jnp.float32)
        h_last, _ = lax.fori_loop(0, S, rec_body, (zeros, zeros), unroll=True)
        return h_last

    # Layer 0 reads the raw input sequence; deeper layers read the previous
    # layer's hidden sequence already sitting in seq_scr.
    # TODO(synk): nn.Dropout(p=0.5) between the two LSTM stacks is identity
    # (eval-mode semantics); training-mode stochastic dropout not implemented.
    h_last = run_layer(lambda t: x_ref[t], *lstm_refs[0:4],
                       store_seq=(n_layers > 1))
    for l in range(1, n_layers):
        h_last = run_layer(lambda t: seq_scr[t], *lstm_refs[4 * l:4 * l + 4],
                           store_seq=(l < n_layers - 1))

    # FC head on the final hidden state (single lane-masked store, done once).
    logits_ref[...] = (jnp.dot(h_last, fcw_ref[...],
                               preferred_element_type=jnp.float32)
                       + fcb_ref[...])

    # L2 regularizer epilogue: sum of Frobenius norms of every parameter.
    # Transpose / gate reordering / reshape preserve each parameter's norm.
    l2 = jnp.zeros((1, 1), jnp.float32)
    for p_ref in (*lstm_refs, fcw_ref, fcb_ref):
        p = p_ref[...]
        l2 = l2 + jnp.sqrt(jnp.sum(p * p, keepdims=True))
    l2_ref[...] = l2 * jnp.float32(weight_decay)


# ------------------------------------------------------------------ wrappers

def _reorder_gates(w, H):
    """PyTorch gate order along dim 0 is [i, f, g, o]; reorder to [i, f, o, g]."""
    i, f, g, o = jnp.split(w, 4, axis=0)
    return jnp.concatenate([i, f, o, g], axis=0)


def lstm_model_forward(x, params, weight_decay=0.01):
    """x: (batch, seq, num_landmarks, 2) float32.

    Returns (logits (batch, output_classes), l2_reg scalar), matching
    LSTM_model.forward (dropout in eval mode).
    """
    B, S, L, _ = x.shape
    x_sbd = jnp.transpose(x.reshape(B, S, L * 2), (1, 0, 2))  # (S, B, D0)

    layer_params = list(params["lstm1"]) + list(params["lstm2"])
    n_layers = len(layer_params)
    H = layer_params[0][1].shape[1]           # w_hh: (4H, H)
    C = params["fc_w"].shape[0]

    kernel_inputs = [x_sbd]
    for (w_ih, w_hh, b_ih, b_hh) in layer_params:
        kernel_inputs.append(jnp.transpose(_reorder_gates(w_ih, H)))  # (D, 4H)
        kernel_inputs.append(jnp.transpose(_reorder_gates(w_hh, H)))  # (H, 4H)
        kernel_inputs.append(_reorder_gates(b_ih, H).reshape(1, 4 * H))
        kernel_inputs.append(_reorder_gates(b_hh, H).reshape(1, 4 * H))
    kernel_inputs.append(jnp.transpose(params["fc_w"]))               # (H, C)
    kernel_inputs.append(params["fc_b"].reshape(1, C))                # (1, C)

    kernel = functools.partial(
        _fused_lstm_model_kernel,
        seq_len=S, batch=B, hidden=H, n_layers=n_layers,
        weight_decay=weight_decay)

    vmem_spec = pl.BlockSpec(memory_space=pltpu.MemorySpace.VMEM)
    logits, l2 = pl.pallas_call(
        kernel,
        out_shape=(jax.ShapeDtypeStruct((B, C), jnp.float32),
                   jax.ShapeDtypeStruct((1, 1), jnp.float32)),
        in_specs=[vmem_spec] * len(kernel_inputs),
        out_specs=(vmem_spec, vmem_spec),
        scratch_shapes=[
            pltpu.VMEM((S, B, H), jnp.float32),       # hidden-state sequence
            pltpu.VMEM((S, B, 4 * H), jnp.float32),   # hoisted input projections
        ],
    )(*kernel_inputs)
    return logits, l2[0, 0]


# ------------------------------------------------------------------ reference

def _reference_forward(x, params, weight_decay=0.01):
    """Pure-JAX reference mirroring the PyTorch module (eval-mode dropout)."""
    hp = jax.lax.Precision.HIGHEST
    B, S, L, _ = x.shape
    out = x.reshape(B, S, L * 2)

    def run_stack(seq, layers):
        cur = seq
        for (w_ih, w_hh, b_ih, b_hh) in layers:
            H = w_hh.shape[1]

            def step(carry, x_t):
                h, c = carry
                gates = (jnp.dot(x_t, w_ih.T, precision=hp) + b_ih
                         + jnp.dot(h, w_hh.T, precision=hp) + b_hh)
                i = jax.nn.sigmoid(gates[:, 0 * H:1 * H])
                f = jax.nn.sigmoid(gates[:, 1 * H:2 * H])
                g = jnp.tanh(gates[:, 2 * H:3 * H])
                o = jax.nn.sigmoid(gates[:, 3 * H:4 * H])
                c = f * c + i * g
                h = o * jnp.tanh(c)
                return (h, c), h

            init = (jnp.zeros((B, H), jnp.float32),
                    jnp.zeros((B, H), jnp.float32))
            _, hs = lax.scan(step, init, jnp.transpose(cur, (1, 0, 2)))
            cur = jnp.transpose(hs, (1, 0, 2))
        return cur

    out = run_stack(out, params["lstm1"])
    out = run_stack(out, params["lstm2"])
    logits = jnp.dot(out[:, -1, :], params["fc_w"].T, precision=hp) + params["fc_b"]

    l2 = jnp.float32(0.0)
    for layers in (params["lstm1"], params["lstm2"]):
        for p_tuple in layers:
            for p in p_tuple:
                l2 = l2 + jnp.sqrt(jnp.sum(p * p))
    l2 = l2 + jnp.sqrt(jnp.sum(params["fc_w"] ** 2))
    l2 = l2 + jnp.sqrt(jnp.sum(params["fc_b"] ** 2))
    return logits, l2 * weight_decay


# ------------------------------------------------------------------ params

def init_params(key, num_landmarks, hidden_size, num_layers, output_classes):
    """Deterministic init mirroring PyTorch's U(-1/sqrt(H), 1/sqrt(H))."""
    bound = 1.0 / math.sqrt(hidden_size)
    keys = iter(jax.random.split(key, 8 * num_layers * 2 + 4))

    def u(shape):
        return jax.random.uniform(next(keys), shape, jnp.float32, -bound, bound)

    def lstm_params(input_size):
        layers = []
        for l in range(num_layers):
            d = input_size if l == 0 else hidden_size
            layers.append((u((4 * hidden_size, d)),            # weight_ih_l{l}
                           u((4 * hidden_size, hidden_size)),  # weight_hh_l{l}
                           u((4 * hidden_size,)),              # bias_ih_l{l}
                           u((4 * hidden_size,))))             # bias_hh_l{l}
        return layers

    return {
        "lstm1": lstm_params(num_landmarks * 2),
        "lstm2": lstm_params(hidden_size),
        "fc_w": jax.random.uniform(next(keys), (output_classes, hidden_size),
                                   jnp.float32, -bound, bound),
        "fc_b": jax.random.uniform(next(keys), (output_classes,),
                                   jnp.float32, -bound, bound),
    }


# ------------------------------------------------------------------ main

if __name__ == "__main__":
    num_landmarks = 8
    hidden_size = 32
    num_layers = 2
    output_classes = 10
    batch, seq = 2, 8

    key = jax.random.PRNGKey(0)
    k_param, k_x = jax.random.split(key)
    params = init_params(k_param, num_landmarks, hidden_size, num_layers,
                         output_classes)
    x = jax.random.normal(k_x, (batch, seq, num_landmarks, 2), jnp.float32)

    fwd = jax.jit(functools.partial(lstm_model_forward, weight_decay=0.01))
    logits, l2_reg = fwd(x, params)
    jax.block_until_ready((logits, l2_reg))

    assert logits.shape == (batch, output_classes)
    assert l2_reg.shape == ()

    # Correctness check against a pure-JAX reference of the PyTorch module.
    ref_logits, ref_l2 = jax.jit(
        functools.partial(_reference_forward, weight_decay=0.01))(x, params)
    jax.block_until_ready((ref_logits, ref_l2))
    assert jnp.allclose(logits, ref_logits, atol=2e-3, rtol=2e-3)
    assert jnp.allclose(l2_reg, ref_l2, atol=2e-3, rtol=2e-3)

    print("KERNEL_OK")
</pallas_src>

<mosaic_0001>
module attributes {stable_mosaic.version = 11 : i64} {
  func.func @_fused_lstm_model_kernel(%arg0: memref<8x2x16xf32, #tpu.memory_space<vmem>>, %arg1: memref<16x128xf32, #tpu.memory_space<vmem>>, %arg2: memref<32x128xf32, #tpu.memory_space<vmem>>, %arg3: memref<1x128xf32, #tpu.memory_space<vmem>>, %arg4: memref<1x128xf32, #tpu.memory_space<vmem>>, %arg5: memref<32x128xf32, #tpu.memory_space<vmem>>, %arg6: memref<32x128xf32, #tpu.memory_space<vmem>>, %arg7: memref<1x128xf32, #tpu.memory_space<vmem>>, %arg8: memref<1x128xf32, #tpu.memory_space<vmem>>, %arg9: memref<32x128xf32, #tpu.memory_space<vmem>>, %arg10: memref<32x128xf32, #tpu.memory_space<vmem>>, %arg11: memref<1x128xf32, #tpu.memory_space<vmem>>, %arg12: memref<1x128xf32, #tpu.memory_space<vmem>>, %arg13: memref<32x128xf32, #tpu.memory_space<vmem>>, %arg14: memref<32x128xf32, #tpu.memory_space<vmem>>, %arg15: memref<1x128xf32, #tpu.memory_space<vmem>>, %arg16: memref<1x128xf32, #tpu.memory_space<vmem>>, %arg17: memref<32x10xf32, #tpu.memory_space<vmem>>, %arg18: memref<1x10xf32, #tpu.memory_space<vmem>>, %arg19: memref<2x10xf32, #tpu.memory_space<vmem>>, %arg20: memref<1x1xf32, #tpu.memory_space<vmem>>, %arg21: memref<8x2x32xf32, #tpu.memory_space<vmem>>, %arg22: memref<8x2x128xf32, #tpu.memory_space<vmem>>) attributes {dimension_semantics = [], scalar_prefetch = 0 : i64, scratch_operands = 2 : i64, tpu.core_type = #tpu.core_type<tc>} {
    %c0 = arith.constant 0 : index
    %c0_0 = arith.constant 0 : index
    %0 = vector.load %arg3[%c0, %c0_0] : memref<1x128xf32, #tpu.memory_space<vmem>>, vector<1x128xf32>
    %c0_1 = arith.constant 0 : index
    %c0_2 = arith.constant 0 : index
    %1 = vector.load %arg4[%c0_1, %c0_2] : memref<1x128xf32, #tpu.memory_space<vmem>>, vector<1x128xf32>
    %2 = arith.addf %0, %1 : vector<1x128xf32>
    %c0_3 = arith.constant 0 : index
    %c0_4 = arith.constant 0 : index
    %3 = vector.load %arg1[%c0_3, %c0_4] : memref<16x128xf32, #tpu.memory_space<vmem>>, vector<16x128xf32>
    %c0_5 = arith.constant 0 : index
    %c0_6 = arith.constant 0 : index
    %4 = vector.load %arg2[%c0_5, %c0_6] : memref<32x128xf32, #tpu.memory_space<vmem>>, vector<32x128xf32>
    %c0_i32 = arith.constant 0 : i32
    %5 = arith.index_cast %c0_i32 : i32 to index
    %c0_7 = arith.constant 0 : index
    %c0_8 = arith.constant 0 : index
    %6 = vector.load %arg0[%5, %c0_7, %c0_8] : memref<8x2x16xf32, #tpu.memory_space<vmem>>, vector<1x2x16xf32>
    %7 = vector.shape_cast %6 : vector<1x2x16xf32> to vector<2x16xf32>
    %cst = arith.constant dense<0.000000e+00> : vector<2x128xf32>
    %8 = tpu.matmul %7, %3, %cst {dimension_numbers = #tpu.dot_dimension_numbers<[1], [0], [0], [1], [0, 0, 1, 1], [], []>} : vector<2x16xf32>, vector<16x128xf32>, vector<2x128xf32> -> vector<2x128xf32>
    %9 = vector.broadcast %2 : vector<1x128xf32> to vector<2x128xf32>
    %10 = arith.addf %8, %9 : vector<2x128xf32>
    %11 = arith.index_cast %c0_i32 : i32 to index
    %c0_9 = arith.constant 0 : index
    %c0_10 = arith.constant 0 : index
    %12 = vector.load %arg22[%11, %c0_9, %c0_10] : memref<8x2x128xf32, #tpu.memory_space<vmem>>, vector<1x2x128xf32>
    %13 = vector.shape_cast %12 : vector<1x2x128xf32> to vector<2x128xf32>
    %14 = vector.shape_cast %10 : vector<2x128xf32> to vector<1x2x128xf32>
    tpu.vector_store %arg22[%11, %c0_9, %c0_10], %14 {strides = array<i32>} : memref<8x2x128xf32, #tpu.memory_space<vmem>>, vector<1x2x128xf32>,
    %c1_i32 = arith.constant 1 : i32
    %15 = arith.index_cast %c1_i32 : i32 to index
    %c0_11 = arith.constant 0 : index
    %c0_12 = arith.constant 0 : index
    %16 = vector.load %arg0[%15, %c0_11, %c0_12] : memref<8x2x16xf32, #tpu.memory_space<vmem>>, vector<1x2x16xf32>
    %17 = vector.shape_cast %16 : vector<1x2x16xf32> to vector<2x16xf32>
    %cst_13 = arith.constant dense<0.000000e+00> : vector<2x128xf32>
    %18 = tpu.matmul %17, %3, %cst_13 {dimension_numbers = #tpu.dot_dimension_numbers<[1], [0], [0], [1], [0, 0, 1, 1], [], []>} : vector<2x16xf32>, vector<16x128xf32>, vector<2x128xf32> -> vector<2x128xf32>
    %19 = vector.broadcast %2 : vector<1x128xf32> to vector<2x128xf32>
    %20 = arith.addf %18, %19 : vector<2x128xf32>
    %21 = arith.index_cast %c1_i32 : i32 to index
    %c0_14 = arith.constant 0 : index
    %c0_15 = arith.constant 0 : index
    %22 = vector.load %arg22[%21, %c0_14, %c0_15] : memref<8x2x128xf32, #tpu.memory_space<vmem>>, vector<1x2x128xf32>
    %23 = vector.shape_cast %22 : vector<1x2x128xf32> to vector<2x128xf32>
    %24 = vector.shape_cast %20 : vector<2x128xf32> to vector<1x2x128xf32>
    tpu.vector_store %arg22[%21, %c0_14, %c0_15], %24 {strides = array<i32>} : memref<8x2x128xf32, #tpu.memory_space<vmem>>, vector<1x2x128xf32>,
    %c2_i32 = arith.constant 2 : i32
    %25 = arith.index_cast %c2_i32 : i32 to index
    %c0_16 = arith.constant 0 : index
    %c0_17 = arith.constant 0 : index
    %26 = vector.load %arg0[%25, %c0_16, %c0_17] : memref<8x2x16xf32, #tpu.memory_space<vmem>>, vector<1x2x16xf32>
    %27 = vector.shape_cast %26 : vector<1x2x16xf32> to vector<2x16xf32>
    %cst_18 = arith.constant dense<0.000000e+00> : vector<2x128xf32>
    %28 = tpu.matmul %27, %3, %cst_18 {dimension_numbers = #tpu.dot_dimension_numbers<[1], [0], [0], [1], [0, 0, 1, 1], [], []>} : vector<2x16xf32>, vector<16x128xf32>, vector<2x128xf32> -> vector<2x128xf32>
    %29 = vector.broadcast %2 : vector<1x128xf32> to vector<2x128xf32>
    %30 = arith.addf %28, %29 : vector<2x128xf32>
    %31 = arith.index_cast %c2_i32 : i32 to index
    %c0_19 = arith.constant 0 : index
    %c0_20 = arith.constant 0 : index
    %32 = vector.load %arg22[%31, %c0_19, %c0_20] : memref<8x2x128xf32, #tpu.memory_space<vmem>>, vector<1x2x128xf32>
    %33 = vector.shape_cast %32 : vector<1x2x128xf32> to vector<2x128xf32>
    %34 = vector.shape_cast %30 : vector<2x128xf32> to vector<1x2x128xf32>
    tpu.vector_store %arg22[%31, %c0_19, %c0_20], %34 {strides = array<i32>} : memref<8x2x128xf32, #tpu.memory_space<vmem>>, vector<1x2x128xf32>,
    %c3_i32 = arith.constant 3 : i32
    %35 = arith.index_cast %c3_i32 : i32 to index
    %c0_21 = arith.constant 0 : index
    %c0_22 = arith.constant 0 : index
    %36 = vector.load %arg0[%35, %c0_21, %c0_22] : memref<8x2x16xf32, #tpu.memory_space<vmem>>, vector<1x2x16xf32>
    %37 = vector.shape_cast %36 : vector<1x2x16xf32> to vector<2x16xf32>
    %cst_23 = arith.constant dense<0.000000e+00> : vector<2x128xf32>
    %38 = tpu.matmul %37, %3, %cst_23 {dimension_numbers = #tpu.dot_dimension_numbers<[1], [0], [0], [1], [0, 0, 1, 1], [], []>} : vector<2x16xf32>, vector<16x128xf32>, vector<2x128xf32> -> vector<2x128xf32>
    %39 = vector.broadcast %2 : vector<1x128xf32> to vector<2x128xf32>
    %40 = arith.addf %38, %39 : vector<2x128xf32>
    %41 = arith.index_cast %c3_i32 : i32 to index
    %c0_24 = arith.constant 0 : index
    %c0_25 = arith.constant 0 : index
    %42 = vector.load %arg22[%41, %c0_24, %c0_25] : memref<8x2x128xf32, #tpu.memory_space<vmem>>, vector<1x2x128xf32>
    %43 = vector.shape_cast %42 : vector<1x2x128xf32> to vector<2x128xf32>
    %44 = vector.shape_cast %40 : vector<2x128xf32> to vector<1x2x128xf32>
    tpu.vector_store %arg22[%41, %c0_24, %c0_25], %44 {strides = array<i32>} : memref<8x2x128xf32, #tpu.memory_space<vmem>>, vector<1x2x128xf32>,
    %c4_i32 = arith.constant 4 : i32
    %45 = arith.index_cast %c4_i32 : i32 to index
    %c0_26 = arith.constant 0 : index
    %c0_27 = arith.constant 0 : index
    %46 = vector.load %arg0[%45, %c0_26, %c0_27] : memref<8x2x16xf32, #tpu.memory_space<vmem>>, vector<1x2x16xf32>
    %47 = vector.shape_cast %46 : vector<1x2x16xf32> to vector<2x16xf32>
    %cst_28 = arith.constant dense<0.000000e+00> : vector<2x128xf32>
    %48 = tpu.matmul %47, %3, %cst_28 {dimension_numbers = #tpu.dot_dimension_numbers<[1], [0], [0], [1], [0, 0, 1, 1], [], []>} : vector<2x16xf32>, vector<16x128xf32>, vector<2x128xf32> -> vector<2x128xf32>
    %49 = vector.broadcast %2 : vector<1x128xf32> to vector<2x128xf32>
    %50 = arith.addf %48, %49 : vector<2x128xf32>
    %51 = arith.index_cast %c4_i32 : i32 to index
    %c0_29 = arith.constant 0 : index
    %c0_30 = arith.constant 0 : index
    %52 = vector.load %arg22[%51, %c0_29, %c0_30] : memref<8x2x128xf32, #tpu.memory_space<vmem>>, vector<1x2x128xf32>
    %53 = vector.shape_cast %52 : vector<1x2x128xf32> to vector<2x128xf32>
    %54 = vector.shape_cast %50 : vector<2x128xf32> to vector<1x2x128xf32>
    tpu.vector_store %arg22[%51, %c0_29, %c0_30], %54 {strides = array<i32>} : memref<8x2x128xf32, #tpu.memory_space<vmem>>, vector<1x2x128xf32>,
    %c5_i32 = arith.constant 5 : i32
    %55 = arith.index_cast %c5_i32 : i32 to index
    %c0_31 = arith.constant 0 : index
    %c0_32 = arith.constant 0 : index
    %56 = vector.load %arg0[%55, %c0_31, %c0_32] : memref<8x2x16xf32, #tpu.memory_space<vmem>>, vector<1x2x16xf32>
    %57 = vector.shape_cast %56 : vector<1x2x16xf32> to vector<2x16xf32>
    %cst_33 = arith.constant dense<0.000000e+00> : vector<2x128xf32>
    %58 = tpu.matmul %57, %3, %cst_33 {dimension_numbers = #tpu.dot_dimension_numbers<[1], [0], [0], [1], [0, 0, 1, 1], [], []>} : vector<2x16xf32>, vector<16x128xf32>, vector<2x128xf32> -> vector<2x128xf32>
    %59 = vector.broadcast %2 : vector<1x128xf32> to vector<2x128xf32>
    %60 = arith.addf %58, %59 : vector<2x128xf32>
    %61 = arith.index_cast %c5_i32 : i32 to index
    %c0_34 = arith.constant 0 : index
    %c0_35 = arith.constant 0 : index
    %62 = vector.load %arg22[%61, %c0_34, %c0_35] : memref<8x2x128xf32, #tpu.memory_space<vmem>>, vector<1x2x128xf32>
    %63 = vector.shape_cast %62 : vector<1x2x128xf32> to vector<2x128xf32>
    %64 = vector.shape_cast %60 : vector<2x128xf32> to vector<1x2x128xf32>
    tpu.vector_store %arg22[%61, %c0_34, %c0_35], %64 {strides = array<i32>} : memref<8x2x128xf32, #tpu.memory_space<vmem>>, vector<1x2x128xf32>,
    %c6_i32 = arith.constant 6 : i32
    %65 = arith.index_cast %c6_i32 : i32 to index
    %c0_36 = arith.constant 0 : index
    %c0_37 = arith.constant 0 : index
    %66 = vector.load %arg0[%65, %c0_36, %c0_37] : memref<8x2x16xf32, #tpu.memory_space<vmem>>, vector<1x2x16xf32>
    %67 = vector.shape_cast %66 : vector<1x2x16xf32> to vector<2x16xf32>
    %cst_38 = arith.constant dense<0.000000e+00> : vector<2x128xf32>
    %68 = tpu.matmul %67, %3, %cst_38 {dimension_numbers = #tpu.dot_dimension_numbers<[1], [0], [0], [1], [0, 0, 1, 1], [], []>} : vector<2x16xf32>, vector<16x128xf32>, vector<2x128xf32> -> vector<2x128xf32>
    %69 = vector.broadcast %2 : vector<1x128xf32> to vector<2x128xf32>
    %70 = arith.addf %68, %69 : vector<2x128xf32>
    %71 = arith.index_cast %c6_i32 : i32 to index
    %c0_39 = arith.constant 0 : index
    %c0_40 = arith.constant 0 : index
    %72 = vector.load %arg22[%71, %c0_39, %c0_40] : memref<8x2x128xf32, #tpu.memory_space<vmem>>, vector<1x2x128xf32>
    %73 = vector.shape_cast %72 : vector<1x2x128xf32> to vector<2x128xf32>
    %74 = vector.shape_cast %70 : vector<2x128xf32> to vector<1x2x128xf32>
    tpu.vector_store %arg22[%71, %c0_39, %c0_40], %74 {strides = array<i32>} : memref<8x2x128xf32, #tpu.memory_space<vmem>>, vector<1x2x128xf32>,
    %c7_i32 = arith.constant 7 : i32
    %75 = arith.index_cast %c7_i32 : i32 to index
    %c0_41 = arith.constant 0 : index
    %c0_42 = arith.constant 0 : index
    %76 = vector.load %arg0[%75, %c0_41, %c0_42] : memref<8x2x16xf32, #tpu.memory_space<vmem>>, vector<1x2x16xf32>
    %77 = vector.shape_cast %76 : vector<1x2x16xf32> to vector<2x16xf32>
    %cst_43 = arith.constant dense<0.000000e+00> : vector<2x128xf32>
    %78 = tpu.matmul %77, %3, %cst_43 {dimension_numbers = #tpu.dot_dimension_numbers<[1], [0], [0], [1], [0, 0, 1, 1], [], []>} : vector<2x16xf32>, vector<16x128xf32>, vector<2x128xf32> -> vector<2x128xf32>
    %79 = vector.broadcast %2 : vector<1x128xf32> to vector<2x128xf32>
    %80 = arith.addf %78, %79 : vector<2x128xf32>
    %81 = arith.index_cast %c7_i32 : i32 to index
    %c0_44 = arith.constant 0 : index
    %c0_45 = arith.constant 0 : index
    %82 = vector.load %arg22[%81, %c0_44, %c0_45] : memref<8x2x128xf32, #tpu.memory_space<vmem>>, vector<1x2x128xf32>
    %83 = vector.shape_cast %82 : vector<1x2x128xf32> to vector<2x128xf32>
    %84 = vector.shape_cast %80 : vector<2x128xf32> to vector<1x2x128xf32>
    tpu.vector_store %arg22[%81, %c0_44, %c0_45], %84 {strides = array<i32>} : memref<8x2x128xf32, #tpu.memory_space<vmem>>, vector<1x2x128xf32>,
    %c8_i32 = arith.constant 8 : i32
    %cst_46 = arith.constant 0.000000e+00 : f32
    %85 = vector.broadcast %cst_46 : f32 to vector<2x32xf32>
    %c0_i32_47 = arith.constant 0 : i32
    %86 = arith.index_cast %c0_i32_47 : i32 to index
    %c0_48 = arith.constant 0 : index
    %c0_49 = arith.constant 0 : index
    %87 = vector.load %arg22[%86, %c0_48, %c0_49] : memref<8x2x128xf32, #tpu.memory_space<vmem>>, vector<1x2x128xf32>
    %88 = vector.shape_cast %87 : vector<1x2x128xf32> to vector<2x128xf32>
    %cst_50 = arith.constant dense<0.000000e+00> : vector<2x128xf32>
    %89 = tpu.matmul %85, %4, %cst_50 {dimension_numbers = #tpu.dot_dimension_numbers<[1], [0], [0], [1], [0, 0, 1, 1], [], []>} : vector<2x32xf32>, vector<32x128xf32>, vector<2x128xf32> -> vector<2x128xf32>
    %90 = arith.addf %88, %89 : vector<2x128xf32>
    %91 = vector.extract_strided_slice %90 {offsets = [0, 0], sizes = [2, 96], strides = [1, 1]} : vector<2x128xf32> to vector<2x96xf32>
    %92 = arith.negf %91 : vector<2x96xf32>
    %93 = math.exp %92 : vector<2x96xf32>
    %cst_51 = arith.constant 1.000000e+00 : f32
    %94 = vector.broadcast %cst_51 : f32 to vector<2x96xf32>
    %95 = arith.addf %94, %93 : vector<2x96xf32>
    %96 = arith.divf %94, %95 : vector<2x96xf32>
    %97 = vector.extract_strided_slice %90 {offsets = [0, 96], sizes = [2, 32], strides = [1, 1]} : vector<2x128xf32> to vector<2x32xf32>
    %98 = math.tanh %97 : vector<2x32xf32>
    %99 = vector.extract_strided_slice %96 {offsets = [0, 0], sizes = [2, 32], strides = [1, 1]} : vector<2x96xf32> to vector<2x32xf32>
    %100 = vector.extract_strided_slice %96 {offsets = [0, 32], sizes = [2, 32], strides = [1, 1]} : vector<2x96xf32> to vector<2x32xf32>
    %101 = vector.extract_strided_slice %96 {offsets = [0, 64], sizes = [2, 32], strides = [1, 1]} : vector<2x96xf32> to vector<2x32xf32>
    %102 = arith.mulf %100, %85 : vector<2x32xf32>
    %103 = arith.mulf %99, %98 : vector<2x32xf32>
    %104 = arith.addf %102, %103 : vector<2x32xf32>
    %105 = math.tanh %104 : vector<2x32xf32>
    %106 = arith.mulf %101, %105 : vector<2x32xf32>
    %107 = arith.index_cast %c0_i32_47 : i32 to index
    %c0_52 = arith.constant 0 : index
    %c0_53 = arith.constant 0 : index
    %108 = vector.load %arg21[%107, %c0_52, %c0_53] : memref<8x2x32xf32, #tpu.memory_space<vmem>>, vector<1x2x32xf32>
    %109 = vector.shape_cast %108 : vector<1x2x32xf32> to vector<2x32xf32>
    %110 = vector.shape_cast %106 : vector<2x32xf32> to vector<1x2x32xf32>
    tpu.vector_store %arg21[%107, %c0_52, %c0_53], %110 {strides = array<i32>} : memref<8x2x32xf32, #tpu.memory_space<vmem>>, vector<1x2x32xf32>,
    %c1_i32_54 = arith.constant 1 : i32
    %111 = arith.index_cast %c1_i32_54 : i32 to index
    %c0_55 = arith.constant 0 : index
    %c0_56 = arith.constant 0 : index
    %112 = vector.load %arg22[%111, %c0_55, %c0_56] : memref<8x2x128xf32, #tpu.memory_space<vmem>>, vector<1x2x128xf32>
    %113 = vector.shape_cast %112 : vector<1x2x128xf32> to vector<2x128xf32>
    %cst_57 = arith.constant dense<0.000000e+00> : vector<2x128xf32>
    %114 = tpu.matmul %106, %4, %cst_57 {dimension_numbers = #tpu.dot_dimension_numbers<[1], [0], [0], [1], [0, 0, 1, 1], [], []>} : vector<2x32xf32>, vector<32x128xf32>, vector<2x128xf32> -> vector<2x128xf32>
    %115 = arith.addf %113, %114 : vector<2x128xf32>
    %116 = vector.extract_strided_slice %115 {offsets = [0, 0], sizes = [2, 96], strides = [1, 1]} : vector<2x128xf32> to vector<2x96xf32>
    %117 = arith.negf %116 : vector<2x96xf32>
    %118 = math.exp %117 : vector<2x96xf32>
    %cst_58 = arith.constant 1.000000e+00 : f32
    %119 = vector.broadcast %cst_58 : f32 to vector<2x96xf32>
    %120 = arith.addf %119, %118 : vector<2x96xf32>
    %121 = arith.divf %119, %120 : vector<2x96xf32>
    %122 = vector.extract_strided_slice %115 {offsets = [0, 96], sizes = [2, 32], strides = [1, 1]} : vector<2x128xf32> to vector<2x32xf32>
    %123 = math.tanh %122 : vector<2x32xf32>
    %124 = vector.extract_strided_slice %121 {offsets = [0, 0], sizes = [2, 32], strides = [1, 1]} : vector<2x96xf32> to vector<2x32xf32>
    %125 = vector.extract_strided_slice %121 {offsets = [0, 32], sizes = [2, 32], strides = [1, 1]} : vector<2x96xf32> to vector<2x32xf32>
    %126 = vector.extract_strided_slice %121 {offsets = [0, 64], sizes = [2, 32], strides = [1, 1]} : vector<2x96xf32> to vector<2x32xf32>
    %127 = arith.mulf %125, %104 : vector<2x32xf32>
    %128 = arith.mulf %124, %123 : vector<2x32xf32>
    %129 = arith.addf %127, %128 : vector<2x32xf32>
    %130 = math.tanh %129 : vector<2x32xf32>
    %131 = arith.mulf %126, %130 : vector<2x32xf32>
    %132 = arith.index_cast %c1_i32_54 : i32 to index
    %c0_59 = arith.constant 0 : index
    %c0_60 = arith.constant 0 : index
    %133 = vector.load %arg21[%132, %c0_59, %c0_60] : memref<8x2x32xf32, #tpu.memory_space<vmem>>, vector<1x2x32xf32>
    %134 = vector.shape_cast %133 : vector<1x2x32xf32> to vector<2x32xf32>
    %135 = vector.shape_cast %131 : vector<2x32xf32> to vector<1x2x32xf32>
    tpu.vector_store %arg21[%132, %c0_59, %c0_60], %135 {strides = array<i32>} : memref<8x2x32xf32, #tpu.memory_space<vmem>>, vector<1x2x32xf32>,
    %c2_i32_61 = arith.constant 2 : i32
    %136 = arith.index_cast %c2_i32_61 : i32 to index
    %c0_62 = arith.constant 0 : index
    %c0_63 = arith.constant 0 : index
    %137 = vector.load %arg22[%136, %c0_62, %c0_63] : memref<8x2x128xf32, #tpu.memory_space<vmem>>, vector<1x2x128xf32>
    %138 = vector.shape_cast %137 : vector<1x2x128xf32> to vector<2x128xf32>
    %cst_64 = arith.constant dense<0.000000e+00> : vector<2x128xf32>
    %139 = tpu.matmul %131, %4, %cst_64 {dimension_numbers = #tpu.dot_dimension_numbers<[1], [0], [0], [1], [0, 0, 1, 1], [], []>} : vector<2x32xf32>, vector<32x128xf32>, vector<2x128xf32> -> vector<2x128xf32>
    %140 = arith.addf %138, %139 : vector<2x128xf32>
    %141 = vector.extract_strided_slice %140 {offsets = [0, 0], sizes = [2, 96], strides = [1, 1]} : vector<2x128xf32> to vector<2x96xf32>
    %142 = arith.negf %141 : vector<2x96xf32>
    %143 = math.exp %142 : vector<2x96xf32>
    %cst_65 = arith.constant 1.000000e+00 : f32
    %144 = vector.broadcast %cst_65 : f32 to vector<2x96xf32>
    %145 = arith.addf %144, %143 : vector<2x96xf32>
    %146 = arith.divf %144, %145 : vector<2x96xf32>
    %147 = vector.extract_strided_slice %140 {offsets = [0, 96], sizes = [2, 32], strides = [1, 1]} : vector<2x128xf32> to vector<2x32xf32>
    %148 = math.tanh %147 : vector<2x32xf32>
    %149 = vector.extract_strided_slice %146 {offsets = [0, 0], sizes = [2, 32], strides = [1, 1]} : vector<2x96xf32> to vector<2x32xf32>
    %150 = vector.extract_strided_slice %146 {offsets = [0, 32], sizes = [2, 32], strides = [1, 1]} : vector<2x96xf32> to vector<2x32xf32>
    %151 = vector.extract_strided_slice %146 {offsets = [0, 64], sizes = [2, 32], strides = [1, 1]} : vector<2x96xf32> to vector<2x32xf32>
    %152 = arith.mulf %150, %129 : vector<2x32xf32>
    %153 = arith.mulf %149, %148 : vector<2x32xf32>
    %154 = arith.addf %152, %153 : vector<2x32xf32>
    %155 = math.tanh %154 : vector<2x32xf32>
    %156 = arith.mulf %151, %155 : vector<2x32xf32>
    %157 = arith.index_cast %c2_i32_61 : i32 to index
    %c0_66 = arith.constant 0 : index
    %c0_67 = arith.constant 0 : index
    %158 = vector.load %arg21[%157, %c0_66, %c0_67] : memref<8x2x32xf32, #tpu.memory_space<vmem>>, vector<1x2x32xf32>
    %159 = vector.shape_cast %158 : vector<1x2x32xf32> to vector<2x32xf32>
    %160 = vector.shape_cast %156 : vector<2x32xf32> to vector<1x2x32xf32>
    tpu.vector_store %arg21[%157, %c0_66, %c0_67], %160 {strides = array<i32>} : memref<8x2x32xf32, #tpu.memory_space<vmem>>, vector<1x2x32xf32>,
    %c3_i32_68 = arith.constant 3 : i32
    %161 = arith.index_cast %c3_i32_68 : i32 to index
    %c0_69 = arith.constant 0 : index
    %c0_70 = arith.constant 0 : index
    %162 = vector.load %arg22[%161, %c0_69, %c0_70] : memref<8x2x128xf32, #tpu.memory_space<vmem>>, vector<1x2x128xf32>
    %163 = vector.shape_cast %162 : vector<1x2x128xf32> to vector<2x128xf32>
    %cst_71 = arith.constant dense<0.000000e+00> : vector<2x128xf32>
    %164 = tpu.matmul %156, %4, %cst_71 {dimension_numbers = #tpu.dot_dimension_numbers<[1], [0], [0], [1], [0, 0, 1, 1], [], []>} : vector<2x32xf32>, vector<32x128xf32>, vector<2x128xf32> -> vector<2x128xf32>
    %165 = arith.addf %163, %164 : vector<2x128xf32>
    %166 = vector.extract_strided_slice %165 {offsets = [0, 0], sizes = [2, 96], strides = [1, 1]} : vector<2x128xf32> to vector<2x96xf32>
    %167 = arith.negf %166 : vector<2x96xf32>
    %168 = math.exp %167 : vector<2x96xf32>
    %cst_72 = arith.constant 1.000000e+00 : f32
    %169 = vector.broadcast %cst_72 : f32 to vector<2x96xf32>
    %170 = arith.addf %169, %168 : vector<2x96xf32>
    %171 = arith.divf %169, %170 : vector<2x96xf32>
    %172 = vector.extract_strided_slice %165 {offsets = [0, 96], sizes = [2, 32], strides = [1, 1]} : vector<2x128xf32> to vector<2x32xf32>
    %173 = math.tanh %172 : vector<2x32xf32>
    %174 = vector.extract_strided_slice %171 {offsets = [0, 0], sizes = [2, 32], strides = [1, 1]} : vector<2x96xf32> to vector<2x32xf32>
    %175 = vector.extract_strided_slice %171 {offsets = [0, 32], sizes = [2, 32], strides = [1, 1]} : vector<2x96xf32> to vector<2x32xf32>
    %176 = vector.extract_strided_slice %171 {offsets = [0, 64], sizes = [2, 32], strides = [1, 1]} : vector<2x96xf32> to vector<2x32xf32>
    %177 = arith.mulf %175, %154 : vector<2x32xf32>
    %178 = arith.mulf %174, %173 : vector<2x32xf32>
    %179 = arith.addf %177, %178 : vector<2x32xf32>
    %180 = math.tanh %179 : vector<2x32xf32>
    %181 = arith.mulf %176, %180 : vector<2x32xf32>
    %182 = arith.index_cast %c3_i32_68 : i32 to index
    %c0_73 = arith.constant 0 : index
    %c0_74 = arith.constant 0 : index
    %183 = vector.load %arg21[%182, %c0_73, %c0_74] : memref<8x2x32xf32, #tpu.memory_space<vmem>>, vector<1x2x32xf32>
    %184 = vector.shape_cast %183 : vector<1x2x32xf32> to vector<2x32xf32>
    %185 = vector.shape_cast %181 : vector<2x32xf32> to vector<1x2x32xf32>
    tpu.vector_store %arg21[%182, %c0_73, %c0_74], %185 {strides = array<i32>} : memref<8x2x32xf32, #tpu.memory_space<vmem>>, vector<1x2x32xf32>,
    %c4_i32_75 = arith.constant 4 : i32
    %186 = arith.index_cast %c4_i32_75 : i32 to index
    %c0_76 = arith.constant 0 : index
    %c0_77 = arith.constant 0 : index
    %187 = vector.load %arg22[%186, %c0_76, %c0_77] : memref<8x2x128xf32, #tpu.memory_space<vmem>>, vector<1x2x128xf32>
    %188 = vector.shape_cast %187 : vector<1x2x128xf32> to vector<2x128xf32>
    %cst_78 = arith.constant dense<0.000000e+00> : vector<2x128xf32>
    %189 = tpu.matmul %181, %4, %cst_78 {dimension_numbers = #tpu.dot_dimension_numbers<[1], [0], [0], [1], [0, 0, 1, 1], [], []>} : vector<2x32xf32>, vector<32x128xf32>, vector<2x128xf32> -> vector<2x128xf32>
    %190 = arith.addf %188, %189 : vector<2x128xf32>
    %191 = vector.extract_strided_slice %190 {offsets = [0, 0], sizes = [2, 96], strides = [1, 1]} : vector<2x128xf32> to vector<2x96xf32>
    %192 = arith.negf %191 : vector<2x96xf32>
    %193 = math.exp %192 : vector<2x96xf32>
    %cst_79 = arith.constant 1.000000e+00 : f32
    %194 = vector.broadcast %cst_79 : f32 to vector<2x96xf32>
    %195 = arith.addf %194, %193 : vector<2x96xf32>
    %196 = arith.divf %194, %195 : vector<2x96xf32>
    %197 = vector.extract_strided_slice %190 {offsets = [0, 96], sizes = [2, 32], strides = [1, 1]} : vector<2x128xf32> to vector<2x32xf32>
    %198 = math.tanh %197 : vector<2x32xf32>
    %199 = vector.extract_strided_slice %196 {offsets = [0, 0], sizes = [2, 32], strides = [1, 1]} : vector<2x96xf32> to vector<2x32xf32>
    %200 = vector.extract_strided_slice %196 {offsets = [0, 32], sizes = [2, 32], strides = [1, 1]} : vector<2x96xf32> to vector<2x32xf32>
    %201 = vector.extract_strided_slice %196 {offsets = [0, 64], sizes = [2, 32], strides = [1, 1]} : vector<2x96xf32> to vector<2x32xf32>
    %202 = arith.mulf %200, %179 : vector<2x32xf32>
    %203 = arith.mulf %199, %198 : vector<2x32xf32>
    %204 = arith.addf %202, %203 : vector<2x32xf32>
    %205 = math.tanh %204 : vector<2x32xf32>
    %206 = arith.mulf %201, %205 : vector<2x32xf32>
    %207 = arith.index_cast %c4_i32_75 : i32 to index
    %c0_80 = arith.constant 0 : index
    %c0_81 = arith.constant 0 : index
    %208 = vector.load %arg21[%207, %c0_80, %c0_81] : memref<8x2x32xf32, #tpu.memory_space<vmem>>, vector<1x2x32xf32>
    %209 = vector.shape_cast %208 : vector<1x2x32xf32> to vector<2x32xf32>
    %210 = vector.shape_cast %206 : vector<2x32xf32> to vector<1x2x32xf32>
    tpu.vector_store %arg21[%207, %c0_80, %c0_81], %210 {strides = array<i32>} : memref<8x2x32xf32, #tpu.memory_space<vmem>>, vector<1x2x32xf32>,
    %c5_i32_82 = arith.constant 5 : i32
    %211 = arith.index_cast %c5_i32_82 : i32 to index
    %c0_83 = arith.constant 0 : index
    %c0_84 = arith.constant 0 : index
    %212 = vector.load %arg22[%211, %c0_83, %c0_84] : memref<8x2x128xf32, #tpu.memory_space<vmem>>, vector<1x2x128xf32>
    %213 = vector.shape_cast %212 : vector<1x2x128xf32> to vector<2x128xf32>
    %cst_85 = arith.constant dense<0.000000e+00> : vector<2x128xf32>
    %214 = tpu.matmul %206, %4, %cst_85 {dimension_numbers = #tpu.dot_dimension_numbers<[1], [0], [0], [1], [0, 0, 1, 1], [], []>} : vector<2x32xf32>, vector<32x128xf32>, vector<2x128xf32> -> vector<2x128xf32>
    %215 = arith.addf %213, %214 : vector<2x128xf32>
    %216 = vector.extract_strided_slice %215 {offsets = [0, 0], sizes = [2, 96], strides = [1, 1]} : vector<2x128xf32> to vector<2x96xf32>
    %217 = arith.negf %216 : vector<2x96xf32>
    %218 = math.exp %217 : vector<2x96xf32>
    %cst_86 = arith.constant 1.000000e+00 : f32
    %219 = vector.broadcast %cst_86 : f32 to vector<2x96xf32>
    %220 = arith.addf %219, %218 : vector<2x96xf32>
    %221 = arith.divf %219, %220 : vector<2x96xf32>
    %222 = vector.extract_strided_slice %215 {offsets = [0, 96], sizes = [2, 32], strides = [1, 1]} : vector<2x128xf32> to vector<2x32xf32>
    %223 = math.tanh %222 : vector<2x32xf32>
    %224 = vector.extract_strided_slice %221 {offsets = [0, 0], sizes = [2, 32], strides = [1, 1]} : vector<2x96xf32> to vector<2x32xf32>
    %225 = vector.extract_strided_slice %221 {offsets = [0, 32], sizes = [2, 32], strides = [1, 1]} : vector<2x96xf32> to vector<2x32xf32>
    %226 = vector.extract_strided_slice %221 {offsets = [0, 64], sizes = [2, 32], strides = [1, 1]} : vector<2x96xf32> to vector<2x32xf32>
    %227 = arith.mulf %225, %204 : vector<2x32xf32>
    %228 = arith.mulf %224, %223 : vector<2x32xf32>
    %229 = arith.addf %227, %228 : vector<2x32xf32>
    %230 = math.tanh %229 : vector<2x32xf32>
    %231 = arith.mulf %226, %230 : vector<2x32xf32>
    %232 = arith.index_cast %c5_i32_82 : i32 to index
    %c0_87 = arith.constant 0 : index
    %c0_88 = arith.constant 0 : index
    %233 = vector.load %arg21[%232, %c0_87, %c0_88] : memref<8x2x32xf32, #tpu.memory_space<vmem>>, vector<1x2x32xf32>
    %234 = vector.shape_cast %233 : vector<1x2x32xf32> to vector<2x32xf32>
    %235 = vector.shape_cast %231 : vector<2x32xf32> to vector<1x2x32xf32>
    tpu.vector_store %arg21[%232, %c0_87, %c0_88], %235 {strides = array<i32>} : memref<8x2x32xf32, #tpu.memory_space<vmem>>, vector<1x2x32xf32>,
    %c6_i32_89 = arith.constant 6 : i32
    %236 = arith.index_cast %c6_i32_89 : i32 to index
    %c0_90 = arith.constant 0 : index
    %c0_91 = arith.constant 0 : index
    %237 = vector.load %arg22[%236, %c0_90, %c0_91] : memref<8x2x128xf32, #tpu.memory_space<vmem>>, vector<1x2x128xf32>
    %238 = vector.shape_cast %237 : vector<1x2x128xf32> to vector<2x128xf32>
    %cst_92 = arith.constant dense<0.000000e+00> : vector<2x128xf32>
    %239 = tpu.matmul %231, %4, %cst_92 {dimension_numbers = #tpu.dot_dimension_numbers<[1], [0], [0], [1], [0, 0, 1, 1], [], []>} : vector<2x32xf32>, vector<32x128xf32>, vector<2x128xf32> -> vector<2x128xf32>
    %240 = arith.addf %238, %239 : vector<2x128xf32>
    %241 = vector.extract_strided_slice %240 {offsets = [0, 0], sizes = [2, 96], strides = [1, 1]} : vector<2x128xf32> to vector<2x96xf32>
    %242 = arith.negf %241 : vector<2x96xf32>
    %243 = math.exp %242 : vector<2x96xf32>
    %cst_93 = arith.constant 1.000000e+00 : f32
    %244 = vector.broadcast %cst_93 : f32 to vector<2x96xf32>
    %245 = arith.addf %244, %243 : vector<2x96xf32>
    %246 = arith.divf %244, %245 : vector<2x96xf32>
    %247 = vector.extract_strided_slice %240 {offsets = [0, 96], sizes = [2, 32], strides = [1, 1]} : vector<2x128xf32> to vector<2x32xf32>
    %248 = math.tanh %247 : vector<2x32xf32>
    %249 = vector.extract_strided_slice %246 {offsets = [0, 0], sizes = [2, 32], strides = [1, 1]} : vector<2x96xf32> to vector<2x32xf32>
    %250 = vector.extract_strided_slice %246 {offsets = [0, 32], sizes = [2, 32], strides = [1, 1]} : vector<2x96xf32> to vector<2x32xf32>
    %251 = vector.extract_strided_slice %246 {offsets = [0, 64], sizes = [2, 32], strides = [1, 1]} : vector<2x96xf32> to vector<2x32xf32>
    %252 = arith.mulf %250, %229 : vector<2x32xf32>
    %253 = arith.mulf %249, %248 : vector<2x32xf32>
    %254 = arith.addf %252, %253 : vector<2x32xf32>
    %255 = math.tanh %254 : vector<2x32xf32>
    %256 = arith.mulf %251, %255 : vector<2x32xf32>
    %257 = arith.index_cast %c6_i32_89 : i32 to index
    %c0_94 = arith.constant 0 : index
    %c0_95 = arith.constant 0 : index
    %258 = vector.load %arg21[%257, %c0_94, %c0_95] : memref<8x2x32xf32, #tpu.memory_space<vmem>>, vector<1x2x32xf32>
    %259 = vector.shape_cast %258 : vector<1x2x32xf32> to vector<2x32xf32>
    %260 = vector.shape_cast %256 : vector<2x32xf32> to vector<1x2x32xf32>
    tpu.vector_store %arg21[%257, %c0_94, %c0_95], %260 {strides = array<i32>} : memref<8x2x32xf32, #tpu.memory_space<vmem>>, vector<1x2x32xf32>,
    %c7_i32_96 = arith.constant 7 : i32
    %261 = arith.index_cast %c7_i32_96 : i32 to index
    %c0_97 = arith.constant 0 : index
    %c0_98 = arith.constant 0 : index
    %262 = vector.load %arg22[%261, %c0_97, %c0_98] : memref<8x2x128xf32, #tpu.memory_space<vmem>>, vector<1x2x128xf32>
    %263 = vector.shape_cast %262 : vector<1x2x128xf32> to vector<2x128xf32>
    %cst_99 = arith.constant dense<0.000000e+00> : vector<2x128xf32>
    %264 = tpu.matmul %256, %4, %cst_99 {dimension_numbers = #tpu.dot_dimension_numbers<[1], [0], [0], [1], [0, 0, 1, 1], [], []>} : vector<2x32xf32>, vector<32x128xf32>, vector<2x128xf32> -> vector<2x128xf32>
    %265 = arith.addf %263, %264 : vector<2x128xf32>
    %266 = vector.extract_strided_slice %265 {offsets = [0, 0], sizes = [2, 96], strides = [1, 1]} : vector<2x128xf32> to vector<2x96xf32>
    %267 = arith.negf %266 : vector<2x96xf32>
    %268 = math.exp %267 : vector<2x96xf32>
    %cst_100 = arith.constant 1.000000e+00 : f32
    %269 = vector.broadcast %cst_100 : f32 to vector<2x96xf32>
    %270 = arith.addf %269, %268 : vector<2x96xf32>
    %271 = arith.divf %269, %270 : vector<2x96xf32>
    %272 = vector.extract_strided_slice %265 {offsets = [0, 96], sizes = [2, 32], strides = [1, 1]} : vector<2x128xf32> to vector<2x32xf32>
    %273 = math.tanh %272 : vector<2x32xf32>
    %274 = vector.extract_strided_slice %271 {offsets = [0, 0], sizes = [2, 32], strides = [1, 1]} : vector<2x96xf32> to vector<2x32xf32>
    %275 = vector.extract_strided_slice %271 {offsets = [0, 32], sizes = [2, 32], strides = [1, 1]} : vector<2x96xf32> to vector<2x32xf32>
    %276 = vector.extract_strided_slice %271 {offsets = [0, 64], sizes = [2, 32], strides = [1, 1]} : vector<2x96xf32> to vector<2x32xf32>
    %277 = arith.mulf %275, %254 : vector<2x32xf32>
    %278 = arith.mulf %274, %273 : vector<2x32xf32>
    %279 = arith.addf %277, %278 : vector<2x32xf32>
    %280 = math.tanh %279 : vector<2x32xf32>
    %281 = arith.mulf %276, %280 : vector<2x32xf32>
    %282 = arith.index_cast %c7_i32_96 : i32 to index
    %c0_101 = arith.constant 0 : index
    %c0_102 = arith.constant 0 : index
    %283 = vector.load %arg21[%282, %c0_101, %c0_102] : memref<8x2x32xf32, #tpu.memory_space<vmem>>, vector<1x2x32xf32>
    %284 = vector.shape_cast %283 : vector<1x2x32xf32> to vector<2x32xf32>
    %285 = vector.shape_cast %281 : vector<2x32xf32> to vector<1x2x32xf32>
    tpu.vector_store %arg21[%282, %c0_101, %c0_102], %285 {strides = array<i32>} : memref<8x2x32xf32, #tpu.memory_space<vmem>>, vector<1x2x32xf32>,
    %c8_i32_103 = arith.constant 8 : i32
    %c0_104 = arith.constant 0 : index
    %c0_105 = arith.constant 0 : index
    %286 = vector.load %arg7[%c0_104, %c0_105] : memref<1x128xf32, #tpu.memory_space<vmem>>, vector<1x128xf32>
    %c0_106 = arith.constant 0 : index
    %c0_107 = arith.constant 0 : index
    %287 = vector.load %arg8[%c0_106, %c0_107] : memref<1x128xf32, #tpu.memory_space<vmem>>, vector<1x128xf32>
    %288 = arith.addf %286, %287 : vector<1x128xf32>
    %c0_108 = arith.constant 0 : index
    %c0_109 = arith.constant 0 : index
    %289 = vector.load %arg5[%c0_108, %c0_109] : memref<32x128xf32, #tpu.memory_space<vmem>>, vector<32x128xf32>
    %c0_110 = arith.constant 0 : index
    %c0_111 = arith.constant 0 : index
    %290 = vector.load %arg6[%c0_110, %c0_111] : memref<32x128xf32, #tpu.memory_space<vmem>>, vector<32x128xf32>
    %c0_i32_112 = arith.constant 0 : i32
    %291 = arith.index_cast %c0_i32_112 : i32 to index
    %c0_113 = arith.constant 0 : index
    %c0_114 = arith.constant 0 : index
    %292 = vector.load %arg21[%291, %c0_113, %c0_114] : memref<8x2x32xf32, #tpu.memory_space<vmem>>, vector<1x2x32xf32>
    %293 = vector.shape_cast %292 : vector<1x2x32xf32> to vector<2x32xf32>
    %cst_115 = arith.constant dense<0.000000e+00> : vector<2x128xf32>
    %294 = tpu.matmul %293, %289, %cst_115 {dimension_numbers = #tpu.dot_dimension_numbers<[1], [0], [0], [1], [0, 0, 1, 1], [], []>} : vector<2x32xf32>, vector<32x128xf32>, vector<2x128xf32> -> vector<2x128xf32>
    %295 = vector.broadcast %288 : vector<1x128xf32> to vector<2x128xf32>
    %296 = arith.addf %294, %295 : vector<2x128xf32>
    %297 = arith.index_cast %c0_i32_112 : i32 to index
    %c0_116 = arith.constant 0 : index
    %c0_117 = arith.constant 0 : index
    %298 = vector.load %arg22[%297, %c0_116, %c0_117] : memref<8x2x128xf32, #tpu.memory_space<vmem>>, vector<1x2x128xf32>
    %299 = vector.shape_cast %298 : vector<1x2x128xf32> to vector<2x128xf32>
    %300 = vector.shape_cast %296 : vector<2x128xf32> to vector<1x2x128xf32>
    tpu.vector_store %arg22[%297, %c0_116, %c0_117], %300 {strides = array<i32>} : memref<8x2x128xf32, #tpu.memory_space<vmem>>, vector<1x2x128xf32>,
    %c1_i32_118 = arith.constant 1 : i32
    %301 = arith.index_cast %c1_i32_118 : i32 to index
    %c0_119 = arith.constant 0 : index
    %c0_120 = arith.constant 0 : index
    %302 = vector.load %arg21[%301, %c0_119, %c0_120] : memref<8x2x32xf32, #tpu.memory_space<vmem>>, vector<1x2x32xf32>
    %303 = vector.shape_cast %302 : vector<1x2x32xf32> to vector<2x32xf32>
    %cst_121 = arith.constant dense<0.000000e+00> : vector<2x128xf32>
    %304 = tpu.matmul %303, %289, %cst_121 {dimension_numbers = #tpu.dot_dimension_numbers<[1], [0], [0], [1], [0, 0, 1, 1], [], []>} : vector<2x32xf32>, vector<32x128xf32>, vector<2x128xf32> -> vector<2x128xf32>
    %305 = vector.broadcast %288 : vector<1x128xf32> to vector<2x128xf32>
    %306 = arith.addf %304, %305 : vector<2x128xf32>
    %307 = arith.index_cast %c1_i32_118 : i32 to index
    %c0_122 = arith.constant 0 : index
    %c0_123 = arith.constant 0 : index
    %308 = vector.load %arg22[%307, %c0_122, %c0_123] : memref<8x2x128xf32, #tpu.memory_space<vmem>>, vector<1x2x128xf32>
    %309 = vector.shape_cast %308 : vector<1x2x128xf32> to vector<2x128xf32>
    %310 = vector.shape_cast %306 : vector<2x128xf32> to vector<1x2x128xf32>
    tpu.vector_store %arg22[%307, %c0_122, %c0_123], %310 {strides = array<i32>} : memref<8x2x128xf32, #tpu.memory_space<vmem>>, vector<1x2x128xf32>,
    %c2_i32_124 = arith.constant 2 : i32
    %311 = arith.index_cast %c2_i32_124 : i32 to index
    %c0_125 = arith.constant 0 : index
    %c0_126 = arith.constant 0 : index
    %312 = vector.load %arg21[%311, %c0_125, %c0_126] : memref<8x2x32xf32, #tpu.memory_space<vmem>>, vector<1x2x32xf32>
    %313 = vector.shape_cast %312 : vector<1x2x32xf32> to vector<2x32xf32>
    %cst_127 = arith.constant dense<0.000000e+00> : vector<2x128xf32>
    %314 = tpu.matmul %313, %289, %cst_127 {dimension_numbers = #tpu.dot_dimension_numbers<[1], [0], [0], [1], [0, 0, 1, 1], [], []>} : vector<2x32xf32>, vector<32x128xf32>, vector<2x128xf32> -> vector<2x128xf32>
    %315 = vector.broadcast %288 : vector<1x128xf32> to vector<2x128xf32>
    %316 = arith.addf %314, %315 : vector<2x128xf32>
    %317 = arith.index_cast %c2_i32_124 : i32 to index
    %c0_128 = arith.constant 0 : index
    %c0_129 = arith.constant 0 : index
    %318 = vector.load %arg22[%317, %c0_128, %c0_129] : memref<8x2x128xf32, #tpu.memory_space<vmem>>, vector<1x2x128xf32>
    %319 = vector.shape_cast %318 : vector<1x2x128xf32> to vector<2x128xf32>
    %320 = vector.shape_cast %316 : vector<2x128xf32> to vector<1x2x128xf32>
    tpu.vector_store %arg22[%317, %c0_128, %c0_129], %320 {strides = array<i32>} : memref<8x2x128xf32, #tpu.memory_space<vmem>>, vector<1x2x128xf32>,
    %c3_i32_130 = arith.constant 3 : i32
    %321 = arith.index_cast %c3_i32_130 : i32 to index
    %c0_131 = arith.constant 0 : index
    %c0_132 = arith.constant 0 : index
    %322 = vector.load %arg21[%321, %c0_131, %c0_132] : memref<8x2x32xf32, #tpu.memory_space<vmem>>, vector<1x2x32xf32>
    %323 = vector.shape_cast %322 : vector<1x2x32xf32> to vector<2x32xf32>
    %cst_133 = arith.constant dense<0.000000e+00> : vector<2x128xf32>
    %324 = tpu.matmul %323, %289, %cst_133 {dimension_numbers = #tpu.dot_dimension_numbers<[1], [0], [0], [1], [0, 0, 1, 1], [], []>} : vector<2x32xf32>, vector<32x128xf32>, vector<2x128xf32> -> vector<2x128xf32>
    %325 = vector.broadcast %288 : vector<1x128xf32> to vector<2x128xf32>
    %326 = arith.addf %324, %325 : vector<2x128xf32>
    %327 = arith.index_cast %c3_i32_130 : i32 to index
    %c0_134 = arith.constant 0 : index
    %c0_135 = arith.constant 0 : index
    %328 = vector.load %arg22[%327, %c0_134, %c0_135] : memref<8x2x128xf32, #tpu.memory_space<vmem>>, vector<1x2x128xf32>
    %329 = vector.shape_cast %328 : vector<1x2x128xf32> to vector<2x128xf32>
    %330 = vector.shape_cast %326 : vector<2x128xf32> to vector<1x2x128xf32>
    tpu.vector_store %arg22[%327, %c0_134, %c0_135], %330 {strides = array<i32>} : memref<8x2x128xf32, #tpu.memory_space<vmem>>, vector<1x2x128xf32>,
    %c4_i32_136 = arith.constant 4 : i32
    %331 = arith.index_cast %c4_i32_136 : i32 to index
    %c0_137 = arith.constant 0 : index
    %c0_138 = arith.constant 0 : index
    %332 = vector.load %arg21[%331, %c0_137, %c0_138] : memref<8x2x32xf32, #tpu.memory_space<vmem>>, vector<1x2x32xf32>
    %333 = vector.shape_cast %332 : vector<1x2x32xf32> to vector<2x32xf32>
    %cst_139 = arith.constant dense<0.000000e+00> : vector<2x128xf32>
    %334 = tpu.matmul %333, %289, %cst_139 {dimension_numbers = #tpu.dot_dimension_numbers<[1], [0], [0], [1], [0, 0, 1, 1], [], []>} : vector<2x32xf32>, vector<32x128xf32>, vector<2x128xf32> -> vector<2x128xf32>
    %335 = vector.broadcast %288 : vector<1x128xf32> to vector<2x128xf32>
    %336 = arith.addf %334, %335 : vector<2x128xf32>
    %337 = arith.index_cast %c4_i32_136 : i32 to index
    %c0_140 = arith.constant 0 : index
    %c0_141 = arith.constant 0 : index
    %338 = vector.load %arg22[%337, %c0_140, %c0_141] : memref<8x2x128xf32, #tpu.memory_space<vmem>>, vector<1x2x128xf32>
    %339 = vector.shape_cast %338 : vector<1x2x128xf32> to vector<2x128xf32>
    %340 = vector.shape_cast %336 : vector<2x128xf32> to vector<1x2x128xf32>
    tpu.vector_store %arg22[%337, %c0_140, %c0_141], %340 {strides = array<i32>} : memref<8x2x128xf32, #tpu.memory_space<vmem>>, vector<1x2x128xf32>,
    %c5_i32_142 = arith.constant 5 : i32
    %341 = arith.index_cast %c5_i32_142 : i32 to index
    %c0_143 = arith.constant 0 : index
    %c0_144 = arith.constant 0 : index
    %342 = vector.load %arg21[%341, %c0_143, %c0_144] : memref<8x2x32xf32, #tpu.memory_space<vmem>>, vector<1x2x32xf32>
    %343 = vector.shape_cast %342 : vector<1x2x32xf32> to vector<2x32xf32>
    %cst_145 = arith.constant dense<0.000000e+00> : vector<2x128xf32>
    %344 = tpu.matmul %343, %289, %cst_145 {dimension_numbers = #tpu.dot_dimension_numbers<[1], [0], [0], [1], [0, 0, 1, 1], [], []>} : vector<2x32xf32>, vector<32x128xf32>, vector<2x128xf32> -> vector<2x128xf32>
    %345 = vector.broadcast %288 : vector<1x128xf32> to vector<2x128xf32>
    %346 = arith.addf %344, %345 : vector<2x128xf32>
    %347 = arith.index_cast %c5_i32_142 : i32 to index
    %c0_146 = arith.constant 0 : index
    %c0_147 = arith.constant 0 : index
    %348 = vector.load %arg22[%347, %c0_146, %c0_147] : memref<8x2x128xf32, #tpu.memory_space<vmem>>, vector<1x2x128xf32>
    %349 = vector.shape_cast %348 : vector<1x2x128xf32> to vector<2x128xf32>
    %350 = vector.shape_cast %346 : vector<2x128xf32> to vector<1x2x128xf32>
    tpu.vector_store %arg22[%347, %c0_146, %c0_147], %350 {strides = array<i32>} : memref<8x2x128xf32, #tpu.memory_space<vmem>>, vector<1x2x128xf32>,
    %c6_i32_148 = arith.constant 6 : i32
    %351 = arith.index_cast %c6_i32_148 : i32 to index
    %c0_149 = arith.constant 0 : index
    %c0_150 = arith.constant 0 : index
    %352 = vector.load %arg21[%351, %c0_149, %c0_150] : memref<8x2x32xf32, #tpu.memory_space<vmem>>, vector<1x2x32xf32>
    %353 = vector.shape_cast %352 : vector<1x2x32xf32> to vector<2x32xf32>
    %cst_151 = arith.constant dense<0.000000e+00> : vector<2x128xf32>
    %354 = tpu.matmul %353, %289, %cst_151 {dimension_numbers = #tpu.dot_dimension_numbers<[1], [0], [0], [1], [0, 0, 1, 1], [], []>} : vector<2x32xf32>, vector<32x128xf32>, vector<2x128xf32> -> vector<2x128xf32>
    %355 = vector.broadcast %288 : vector<1x128xf32> to vector<2x128xf32>
    %356 = arith.addf %354, %355 : vector<2x128xf32>
    %357 = arith.index_cast %c6_i32_148 : i32 to index
    %c0_152 = arith.constant 0 : index
    %c0_153 = arith.constant 0 : index
    %358 = vector.load %arg22[%357, %c0_152, %c0_153] : memref<8x2x128xf32, #tpu.memory_space<vmem>>, vector<1x2x128xf32>
    %359 = vector.shape_cast %358 : vector<1x2x128xf32> to vector<2x128xf32>
    %360 = vector.shape_cast %356 : vector<2x128xf32> to vector<1x2x128xf32>
    tpu.vector_store %arg22[%357, %c0_152, %c0_153], %360 {strides = array<i32>} : memref<8x2x128xf32, #tpu.memory_space<vmem>>, vector<1x2x128xf32>,
    %c7_i32_154 = arith.constant 7 : i32
    %361 = arith.index_cast %c7_i32_154 : i32 to index
    %c0_155 = arith.constant 0 : index
    %c0_156 = arith.constant 0 : index
    %362 = vector.load %arg21[%361, %c0_155, %c0_156] : memref<8x2x32xf32, #tpu.memory_space<vmem>>, vector<1x2x32xf32>
    %363 = vector.shape_cast %362 : vector<1x2x32xf32> to vector<2x32xf32>
    %cst_157 = arith.constant dense<0.000000e+00> : vector<2x128xf32>
    %364 = tpu.matmul %363, %289, %cst_157 {dimension_numbers = #tpu.dot_dimension_numbers<[1], [0], [0], [1], [0, 0, 1, 1], [], []>} : vector<2x32xf32>, vector<32x128xf32>, vector<2x128xf32> -> vector<2x128xf32>
    %365 = vector.broadcast %288 : vector<1x128xf32> to vector<2x128xf32>
    %366 = arith.addf %364, %365 : vector<2x128xf32>
    %367 = arith.index_cast %c7_i32_154 : i32 to index
    %c0_158 = arith.constant 0 : index
    %c0_159 = arith.constant 0 : index
    %368 = vector.load %arg22[%367, %c0_158, %c0_159] : memref<8x2x128xf32, #tpu.memory_space<vmem>>, vector<1x2x128xf32>
    %369 = vector.shape_cast %368 : vector<1x2x128xf32> to vector<2x128xf32>
    %370 = vector.shape_cast %366 : vector<2x128xf32> to vector<1x2x128xf32>
    tpu.vector_store %arg22[%367, %c0_158, %c0_159], %370 {strides = array<i32>} : memref<8x2x128xf32, #tpu.memory_space<vmem>>, vector<1x2x128xf32>,
    %c8_i32_160 = arith.constant 8 : i32
    %cst_161 = arith.constant 0.000000e+00 : f32
    %371 = vector.broadcast %cst_161 : f32 to vector<2x32xf32>
    %c0_i32_162 = arith.constant 0 : i32
    %372 = arith.index_cast %c0_i32_162 : i32 to index
    %c0_163 = arith.constant 0 : index
    %c0_164 = arith.constant 0 : index
    %373 = vector.load %arg22[%372, %c0_163, %c0_164] : memref<8x2x128xf32, #tpu.memory_space<vmem>>, vector<1x2x128xf32>
    %374 = vector.shape_cast %373 : vector<1x2x128xf32> to vector<2x128xf32>
    %cst_165 = arith.constant dense<0.000000e+00> : vector<2x128xf32>
    %375 = tpu.matmul %371, %290, %cst_165 {dimension_numbers = #tpu.dot_dimension_numbers<[1], [0], [0], [1], [0, 0, 1, 1], [], []>} : vector<2x32xf32>, vector<32x128xf32>, vector<2x128xf32> -> vector<2x128xf32>
    %376 = arith.addf %374, %375 : vector<2x128xf32>
    %377 = vector.extract_strided_slice %376 {offsets = [0, 0], sizes = [2, 96], strides = [1, 1]} : vector<2x128xf32> to vector<2x96xf32>
    %378 = arith.negf %377 : vector<2x96xf32>
    %379 = math.exp %378 : vector<2x96xf32>
    %cst_166 = arith.constant 1.000000e+00 : f32
    %380 = vector.broadcast %cst_166 : f32 to vector<2x96xf32>
    %381 = arith.addf %380, %379 : vector<2x96xf32>
    %382 = arith.divf %380, %381 : vector<2x96xf32>
    %383 = vector.extract_strided_slice %376 {offsets = [0, 96], sizes = [2, 32], strides = [1, 1]} : vector<2x128xf32> to vector<2x32xf32>
    %384 = math.tanh %383 : vector<2x32xf32>
    %385 = vector.extract_strided_slice %382 {offsets = [0, 0], sizes = [2, 32], strides = [1, 1]} : vector<2x96xf32> to vector<2x32xf32>
    %386 = vector.extract_strided_slice %382 {offsets = [0, 32], sizes = [2, 32], strides = [1, 1]} : vector<2x96xf32> to vector<2x32xf32>
    %387 = vector.extract_strided_slice %382 {offsets = [0, 64], sizes = [2, 32], strides = [1, 1]} : vector<2x96xf32> to vector<2x32xf32>
    %388 = arith.mulf %386, %371 : vector<2x32xf32>
    %389 = arith.mulf %385, %384 : vector<2x32xf32>
    %390 = arith.addf %388, %389 : vector<2x32xf32>
    %391 = math.tanh %390 : vector<2x32xf32>
    %392 = arith.mulf %387, %391 : vector<2x32xf32>
    %393 = arith.index_cast %c0_i32_162 : i32 to index
    %c0_167 = arith.constant 0 : index
    %c0_168 = arith.constant 0 : index
    %394 = vector.load %arg21[%393, %c0_167, %c0_168] : memref<8x2x32xf32, #tpu.memory_space<vmem>>, vector<1x2x32xf32>
    %395 = vector.shape_cast %394 : vector<1x2x32xf32> to vector<2x32xf32>
    %396 = vector.shape_cast %392 : vector<2x32xf32> to vector<1x2x32xf32>
    tpu.vector_store %arg21[%393, %c0_167, %c0_168], %396 {strides = array<i32>} : memref<8x2x32xf32, #tpu.memory_space<vmem>>, vector<1x2x32xf32>,
    %c1_i32_169 = arith.constant 1 : i32
    %397 = arith.index_cast %c1_i32_169 : i32 to index
    %c0_170 = arith.constant 0 : index
    %c0_171 = arith.constant 0 : index
    %398 = vector.load %arg22[%397, %c0_170, %c0_171] : memref<8x2x128xf32, #tpu.memory_space<vmem>>, vector<1x2x128xf32>
    %399 = vector.shape_cast %398 : vector<1x2x128xf32> to vector<2x128xf32>
    %cst_172 = arith.constant dense<0.000000e+00> : vector<2x128xf32>
    %400 = tpu.matmul %392, %290, %cst_172 {dimension_numbers = #tpu.dot_dimension_numbers<[1], [0], [0], [1], [0, 0, 1, 1], [], []>} : vector<2x32xf32>, vector<32x128xf32>, vector<2x128xf32> -> vector<2x128xf32>
    %401 = arith.addf %399, %400 : vector<2x128xf32>
    %402 = vector.extract_strided_slice %401 {offsets = [0, 0], sizes = [2, 96], strides = [1, 1]} : vector<2x128xf32> to vector<2x96xf32>
    %403 = arith.negf %402 : vector<2x96xf32>
    %404 = math.exp %403 : vector<2x96xf32>
    %cst_173 = arith.constant 1.000000e+00 : f32
    %405 = vector.broadcast %cst_173 : f32 to vector<2x96xf32>
    %406 = arith.addf %405, %404 : vector<2x96xf32>
    %407 = arith.divf %405, %406 : vector<2x96xf32>
    %408 = vector.extract_strided_slice %401 {offsets = [0, 96], sizes = [2, 32], strides = [1, 1]} : vector<2x128xf32> to vector<2x32xf32>
    %409 = math.tanh %408 : vector<2x32xf32>
    %410 = vector.extract_strided_slice %407 {offsets = [0, 0], sizes = [2, 32], strides = [1, 1]} : vector<2x96xf32> to vector<2x32xf32>
    %411 = vector.extract_strided_slice %407 {offsets = [0, 32], sizes = [2, 32], strides = [1, 1]} : vector<2x96xf32> to vector<2x32xf32>
    %412 = vector.extract_strided_slice %407 {offsets = [0, 64], sizes = [2, 32], strides = [1, 1]} : vector<2x96xf32> to vector<2x32xf32>
    %413 = arith.mulf %411, %390 : vector<2x32xf32>
    %414 = arith.mulf %410, %409 : vector<2x32xf32>
    %415 = arith.addf %413, %414 : vector<2x32xf32>
    %416 = math.tanh %415 : vector<2x32xf32>
    %417 = arith.mulf %412, %416 : vector<2x32xf32>
    %418 = arith.index_cast %c1_i32_169 : i32 to index
    %c0_174 = arith.constant 0 : index
    %c0_175 = arith.constant 0 : index
    %419 = vector.load %arg21[%418, %c0_174, %c0_175] : memref<8x2x32xf32, #tpu.memory_space<vmem>>, vector<1x2x32xf32>
    %420 = vector.shape_cast %419 : vector<1x2x32xf32> to vector<2x32xf32>
    %421 = vector.shape_cast %417 : vector<2x32xf32> to vector<1x2x32xf32>
    tpu.vector_store %arg21[%418, %c0_174, %c0_175], %421 {strides = array<i32>} : memref<8x2x32xf32, #tpu.memory_space<vmem>>, vector<1x2x32xf32>,
    %c2_i32_176 = arith.constant 2 : i32
    %422 = arith.index_cast %c2_i32_176 : i32 to index
    %c0_177 = arith.constant 0 : index
    %c0_178 = arith.constant 0 : index
    %423 = vector.load %arg22[%422, %c0_177, %c0_178] : memref<8x2x128xf32, #tpu.memory_space<vmem>>, vector<1x2x128xf32>
    %424 = vector.shape_cast %423 : vector<1x2x128xf32> to vector<2x128xf32>
    %cst_179 = arith.constant dense<0.000000e+00> : vector<2x128xf32>
    %425 = tpu.matmul %417, %290, %cst_179 {dimension_numbers = #tpu.dot_dimension_numbers<[1], [0], [0], [1], [0, 0, 1, 1], [], []>} : vector<2x32xf32>, vector<32x128xf32>, vector<2x128xf32> -> vector<2x128xf32>
    %426 = arith.addf %424, %425 : vector<2x128xf32>
    %427 = vector.extract_strided_slice %426 {offsets = [0, 0], sizes = [2, 96], strides = [1, 1]} : vector<2x128xf32> to vector<2x96xf32>
    %428 = arith.negf %427 : vector<2x96xf32>
    %429 = math.exp %428 : vector<2x96xf32>
    %cst_180 = arith.constant 1.000000e+00 : f32
    %430 = vector.broadcast %cst_180 : f32 to vector<2x96xf32>
    %431 = arith.addf %430, %429 : vector<2x96xf32>
    %432 = arith.divf %430, %431 : vector<2x96xf32>
    %433 = vector.extract_strided_slice %426 {offsets = [0, 96], sizes = [2, 32], strides = [1, 1]} : vector<2x128xf32> to vector<2x32xf32>
    %434 = math.tanh %433 : vector<2x32xf32>
    %435 = vector.extract_strided_slice %432 {offsets = [0, 0], sizes = [2, 32], strides = [1, 1]} : vector<2x96xf32> to vector<2x32xf32>
    %436 = vector.extract_strided_slice %432 {offsets = [0, 32], sizes = [2, 32], strides = [1, 1]} : vector<2x96xf32> to vector<2x32xf32>
    %437 = vector.extract_strided_slice %432 {offsets = [0, 64], sizes = [2, 32], strides = [1, 1]} : vector<2x96xf32> to vector<2x32xf32>
    %438 = arith.mulf %436, %415 : vector<2x32xf32>
    %439 = arith.mulf %435, %434 : vector<2x32xf32>
    %440 = arith.addf %438, %439 : vector<2x32xf32>
    %441 = math.tanh %440 : vector<2x32xf32>
    %442 = arith.mulf %437, %441 : vector<2x32xf32>
    %443 = arith.index_cast %c2_i32_176 : i32 to index
    %c0_181 = arith.constant 0 : index
    %c0_182 = arith.constant 0 : index
    %444 = vector.load %arg21[%443, %c0_181, %c0_182] : memref<8x2x32xf32, #tpu.memory_space<vmem>>, vector<1x2x32xf32>
    %445 = vector.shape_cast %444 : vector<1x2x32xf32> to vector<2x32xf32>
    %446 = vector.shape_cast %442 : vector<2x32xf32> to vector<1x2x32xf32>
    tpu.vector_store %arg21[%443, %c0_181, %c0_182], %446 {strides = array<i32>} : memref<8x2x32xf32, #tpu.memory_space<vmem>>, vector<1x2x32xf32>,
    %c3_i32_183 = arith.constant 3 : i32
    %447 = arith.index_cast %c3_i32_183 : i32 to index
    %c0_184 = arith.constant 0 : index
    %c0_185 = arith.constant 0 : index
    %448 = vector.load %arg22[%447, %c0_184, %c0_185] : memref<8x2x128xf32, #tpu.memory_space<vmem>>, vector<1x2x128xf32>
    %449 = vector.shape_cast %448 : vector<1x2x128xf32> to vector<2x128xf32>
    %cst_186 = arith.constant dense<0.000000e+00> : vector<2x128xf32>
    %450 = tpu.matmul %442, %290, %cst_186 {dimension_numbers = #tpu.dot_dimension_numbers<[1], [0], [0], [1], [0, 0, 1, 1], [], []>} : vector<2x32xf32>, vector<32x128xf32>, vector<2x128xf32> -> vector<2x128xf32>
    %451 = arith.addf %449, %450 : vector<2x128xf32>
    %452 = vector.extract_strided_slice %451 {offsets = [0, 0], sizes = [2, 96], strides = [1, 1]} : vector<2x128xf32> to vector<2x96xf32>
    %453 = arith.negf %452 : vector<2x96xf32>
    %454 = math.exp %453 : vector<2x96xf32>
    %cst_187 = arith.constant 1.000000e+00 : f32
    %455 = vector.broadcast %cst_187 : f32 to vector<2x96xf32>
    %456 = arith.addf %455, %454 : vector<2x96xf32>
    %457 = arith.divf %455, %456 : vector<2x96xf32>
    %458 = vector.extract_strided_slice %451 {offsets = [0, 96], sizes = [2, 32], strides = [1, 1]} : vector<2x128xf32> to vector<2x32xf32>
    %459 = math.tanh %458 : vector<2x32xf32>
    %460 = vector.extract_strided_slice %457 {offsets = [0, 0], sizes = [2, 32], strides = [1, 1]} : vector<2x96xf32> to vector<2x32xf32>
    %461 = vector.extract_strided_slice %457 {offsets = [0, 32], sizes = [2, 32], strides = [1, 1]} : vector<2x96xf32> to vector<2x32xf32>
    %462 = vector.extract_strided_slice %457 {offsets = [0, 64], sizes = [2, 32], strides = [1, 1]} : vector<2x96xf32> to vector<2x32xf32>
    %463 = arith.mulf %461, %440 : vector<2x32xf32>
    %464 = arith.mulf %460, %459 : vector<2x32xf32>
    %465 = arith.addf %463, %464 : vector<2x32xf32>
    %466 = math.tanh %465 : vector<2x32xf32>
    %467 = arith.mulf %462, %466 : vector<2x32xf32>
    %468 = arith.index_cast %c3_i32_183 : i32 to index
    %c0_188 = arith.constant 0 : index
    %c0_189 = arith.constant 0 : index
    %469 = vector.load %arg21[%468, %c0_188, %c0_189] : memref<8x2x32xf32, #tpu.memory_space<vmem>>, vector<1x2x32xf32>
    %470 = vector.shape_cast %469 : vector<1x2x32xf32> to vector<2x32xf32>
    %471 = vector.shape_cast %467 : vector<2x32xf32> to vector<1x2x32xf32>
    tpu.vector_store %arg21[%468, %c0_188, %c0_189], %471 {strides = array<i32>} : memref<8x2x32xf32, #tpu.memory_space<vmem>>, vector<1x2x32xf32>,
    %c4_i32_190 = arith.constant 4 : i32
    %472 = arith.index_cast %c4_i32_190 : i32 to index
    %c0_191 = arith.constant 0 : index
    %c0_192 = arith.constant 0 : index
    %473 = vector.load %arg22[%472, %c0_191, %c0_192] : memref<8x2x128xf32, #tpu.memory_space<vmem>>, vector<1x2x128xf32>
    %474 = vector.shape_cast %473 : vector<1x2x128xf32> to vector<2x128xf32>
    %cst_193 = arith.constant dense<0.000000e+00> : vector<2x128xf32>
    %475 = tpu.matmul %467, %290, %cst_193 {dimension_numbers = #tpu.dot_dimension_numbers<[1], [0], [0], [1], [0, 0, 1, 1], [], []>} : vector<2x32xf32>, vector<32x128xf32>, vector<2x128xf32> -> vector<2x128xf32>
    %476 = arith.addf %474, %475 : vector<2x128xf32>
    %477 = vector.extract_strided_slice %476 {offsets = [0, 0], sizes = [2, 96], strides = [1, 1]} : vector<2x128xf32> to vector<2x96xf32>
    %478 = arith.negf %477 : vector<2x96xf32>
    %479 = math.exp %478 : vector<2x96xf32>
    %cst_194 = arith.constant 1.000000e+00 : f32
    %480 = vector.broadcast %cst_194 : f32 to vector<2x96xf32>
    %481 = arith.addf %480, %479 : vector<2x96xf32>
    %482 = arith.divf %480, %481 : vector<2x96xf32>
    %483 = vector.extract_strided_slice %476 {offsets = [0, 96], sizes = [2, 32], strides = [1, 1]} : vector<2x128xf32> to vector<2x32xf32>
    %484 = math.tanh %483 : vector<2x32xf32>
    %485 = vector.extract_strided_slice %482 {offsets = [0, 0], sizes = [2, 32], strides = [1, 1]} : vector<2x96xf32> to vector<2x32xf32>
    %486 = vector.extract_strided_slice %482 {offsets = [0, 32], sizes = [2, 32], strides = [1, 1]} : vector<2x96xf32> to vector<2x32xf32>
    %487 = vector.extract_strided_slice %482 {offsets = [0, 64], sizes = [2, 32], strides = [1, 1]} : vector<2x96xf32> to vector<2x32xf32>
    %488 = arith.mulf %486, %465 : vector<2x32xf32>
    %489 = arith.mulf %485, %484 : vector<2x32xf32>
    %490 = arith.addf %488, %489 : vector<2x32xf32>
    %491 = math.tanh %490 : vector<2x32xf32>
    %492 = arith.mulf %487, %491 : vector<2x32xf32>
    %493 = arith.index_cast %c4_i32_190 : i32 to index
    %c0_195 = arith.constant 0 : index
    %c0_196 = arith.constant 0 : index
    %494 = vector.load %arg21[%493, %c0_195, %c0_196] : memref<8x2x32xf32, #tpu.memory_space<vmem>>, vector<1x2x32xf32>
    %495 = vector.shape_cast %494 : vector<1x2x32xf32> to vector<2x32xf32>
    %496 = vector.shape_cast %492 : vector<2x32xf32> to vector<1x2x32xf32>
    tpu.vector_store %arg21[%493, %c0_195, %c0_196], %496 {strides = array<i32>} : memref<8x2x32xf32, #tpu.memory_space<vmem>>, vector<1x2x32xf32>,
    %c5_i32_197 = arith.constant 5 : i32
    %497 = arith.index_cast %c5_i32_197 : i32 to index
    %c0_198 = arith.constant 0 : index
    %c0_199 = arith.constant 0 : index
    %498 = vector.load %arg22[%497, %c0_198, %c0_199] : memref<8x2x128xf32, #tpu.memory_space<vmem>>, vector<1x2x128xf32>
    %499 = vector.shape_cast %498 : vector<1x2x128xf32> to vector<2x128xf32>
    %cst_200 = arith.constant dense<0.000000e+00> : vector<2x128xf32>
    %500 = tpu.matmul %492, %290, %cst_200 {dimension_numbers = #tpu.dot_dimension_numbers<[1], [0], [0], [1], [0, 0, 1, 1], [], []>} : vector<2x32xf32>, vector<32x128xf32>, vector<2x128xf32> -> vector<2x128xf32>
    %501 = arith.addf %499, %500 : vector<2x128xf32>
    %502 = vector.extract_strided_slice %501 {offsets = [0, 0], sizes = [2, 96], strides = [1, 1]} : vector<2x128xf32> to vector<2x96xf32>
    %503 = arith.negf %502 : vector<2x96xf32>
    %504 = math.exp %503 : vector<2x96xf32>
    %cst_201 = arith.constant 1.000000e+00 : f32
    %505 = vector.broadcast %cst_201 : f32 to vector<2x96xf32>
    %506 = arith.addf %505, %504 : vector<2x96xf32>
    %507 = arith.divf %505, %506 : vector<2x96xf32>
    %508 = vector.extract_strided_slice %501 {offsets = [0, 96], sizes = [2, 32], strides = [1, 1]} : vector<2x128xf32> to vector<2x32xf32>
    %509 = math.tanh %508 : vector<2x32xf32>
    %510 = vector.extract_strided_slice %507 {offsets = [0, 0], sizes = [2, 32], strides = [1, 1]} : vector<2x96xf32> to vector<2x32xf32>
    %511 = vector.extract_strided_slice %507 {offsets = [0, 32], sizes = [2, 32], strides = [1, 1]} : vector<2x96xf32> to vector<2x32xf32>
    %512 = vector.extract_strided_slice %507 {offsets = [0, 64], sizes = [2, 32], strides = [1, 1]} : vector<2x96xf32> to vector<2x32xf32>
    %513 = arith.mulf %511, %490 : vector<2x32xf32>
    %514 = arith.mulf %510, %509 : vector<2x32xf32>
    %515 = arith.addf %513, %514 : vector<2x32xf32>
    %516 = math.tanh %515 : vector<2x32xf32>
    %517 = arith.mulf %512, %516 : vector<2x32xf32>
    %518 = arith.index_cast %c5_i32_197 : i32 to index
    %c0_202 = arith.constant 0 : index
    %c0_203 = arith.constant 0 : index
    %519 = vector.load %arg21[%518, %c0_202, %c0_203] : memref<8x2x32xf32, #tpu.memory_space<vmem>>, vector<1x2x32xf32>
    %520 = vector.shape_cast %519 : vector<1x2x32xf32> to vector<2x32xf32>
    %521 = vector.shape_cast %517 : vector<2x32xf32> to vector<1x2x32xf32>
    tpu.vector_store %arg21[%518, %c0_202, %c0_203], %521 {strides = array<i32>} : memref<8x2x32xf32, #tpu.memory_space<vmem>>, vector<1x2x32xf32>,
    %c6_i32_204 = arith.constant 6 : i32
    %522 = arith.index_cast %c6_i32_204 : i32 to index
    %c0_205 = arith.constant 0 : index
    %c0_206 = arith.constant 0 : index
    %523 = vector.load %arg22[%522, %c0_205, %c0_206] : memref<8x2x128xf32, #tpu.memory_space<vmem>>, vector<1x2x128xf32>
    %524 = vector.shape_cast %523 : vector<1x2x128xf32> to vector<2x128xf32>
    %cst_207 = arith.constant dense<0.000000e+00> : vector<2x128xf32>
    %525 = tpu.matmul %517, %290, %cst_207 {dimension_numbers = #tpu.dot_dimension_numbers<[1], [0], [0], [1], [0, 0, 1, 1], [], []>} : vector<2x32xf32>, vector<32x128xf32>, vector<2x128xf32> -> vector<2x128xf32>
    %526 = arith.addf %524, %525 : vector<2x128xf32>
    %527 = vector.extract_strided_slice %526 {offsets = [0, 0], sizes = [2, 96], strides = [1, 1]} : vector<2x128xf32> to vector<2x96xf32>
    %528 = arith.negf %527 : vector<2x96xf32>
    %529 = math.exp %528 : vector<2x96xf32>
    %cst_208 = arith.constant 1.000000e+00 : f32
    %530 = vector.broadcast %cst_208 : f32 to vector<2x96xf32>
    %531 = arith.addf %530, %529 : vector<2x96xf32>
    %532 = arith.divf %530, %531 : vector<2x96xf32>
    %533 = vector.extract_strided_slice %526 {offsets = [0, 96], sizes = [2, 32], strides = [1, 1]} : vector<2x128xf32> to vector<2x32xf32>
    %534 = math.tanh %533 : vector<2x32xf32>
    %535 = vector.extract_strided_slice %532 {offsets = [0, 0], sizes = [2, 32], strides = [1, 1]} : vector<2x96xf32> to vector<2x32xf32>
    %536 = vector.extract_strided_slice %532 {offsets = [0, 32], sizes = [2, 32], strides = [1, 1]} : vector<2x96xf32> to vector<2x32xf32>
    %537 = vector.extract_strided_slice %532 {offsets = [0, 64], sizes = [2, 32], strides = [1, 1]} : vector<2x96xf32> to vector<2x32xf32>
    %538 = arith.mulf %536, %515 : vector<2x32xf32>
    %539 = arith.mulf %535, %534 : vector<2x32xf32>
    %540 = arith.addf %538, %539 : vector<2x32xf32>
    %541 = math.tanh %540 : vector<2x32xf32>
    %542 = arith.mulf %537, %541 : vector<2x32xf32>
    %543 = arith.index_cast %c6_i32_204 : i32 to index
    %c0_209 = arith.constant 0 : index
    %c0_210 = arith.constant 0 : index
    %544 = vector.load %arg21[%543, %c0_209, %c0_210] : memref<8x2x32xf32, #tpu.memory_space<vmem>>, vector<1x2x32xf32>
    %545 = vector.shape_cast %544 : vector<1x2x32xf32> to vector<2x32xf32>
    %546 = vector.shape_cast %542 : vector<2x32xf32> to vector<1x2x32xf32>
    tpu.vector_store %arg21[%543, %c0_209, %c0_210], %546 {strides = array<i32>} : memref<8x2x32xf32, #tpu.memory_space<vmem>>, vector<1x2x32xf32>,
    %c7_i32_211 = arith.constant 7 : i32
    %547 = arith.index_cast %c7_i32_211 : i32 to index
    %c0_212 = arith.constant 0 : index
    %c0_213 = arith.constant 0 : index
    %548 = vector.load %arg22[%547, %c0_212, %c0_213] : memref<8x2x128xf32, #tpu.memory_space<vmem>>, vector<1x2x128xf32>
    %549 = vector.shape_cast %548 : vector<1x2x128xf32> to vector<2x128xf32>
    %cst_214 = arith.constant dense<0.000000e+00> : vector<2x128xf32>
    %550 = tpu.matmul %542, %290, %cst_214 {dimension_numbers = #tpu.dot_dimension_numbers<[1], [0], [0], [1], [0, 0, 1, 1], [], []>} : vector<2x32xf32>, vector<32x128xf32>, vector<2x128xf32> -> vector<2x128xf32>
    %551 = arith.addf %549, %550 : vector<2x128xf32>
    %552 = vector.extract_strided_slice %551 {offsets = [0, 0], sizes = [2, 96], strides = [1, 1]} : vector<2x128xf32> to vector<2x96xf32>
    %553 = arith.negf %552 : vector<2x96xf32>
    %554 = math.exp %553 : vector<2x96xf32>
    %cst_215 = arith.constant 1.000000e+00 : f32
    %555 = vector.broadcast %cst_215 : f32 to vector<2x96xf32>
    %556 = arith.addf %555, %554 : vector<2x96xf32>
    %557 = arith.divf %555, %556 : vector<2x96xf32>
    %558 = vector.extract_strided_slice %551 {offsets = [0, 96], sizes = [2, 32], strides = [1, 1]} : vector<2x128xf32> to vector<2x32xf32>
    %559 = math.tanh %558 : vector<2x32xf32>
    %560 = vector.extract_strided_slice %557 {offsets = [0, 0], sizes = [2, 32], strides = [1, 1]} : vector<2x96xf32> to vector<2x32xf32>
    %561 = vector.extract_strided_slice %557 {offsets = [0, 32], sizes = [2, 32], strides = [1, 1]} : vector<2x96xf32> to vector<2x32xf32>
    %562 = vector.extract_strided_slice %557 {offsets = [0, 64], sizes = [2, 32], strides = [1, 1]} : vector<2x96xf32> to vector<2x32xf32>
    %563 = arith.mulf %561, %540 : vector<2x32xf32>
    %564 = arith.mulf %560, %559 : vector<2x32xf32>
    %565 = arith.addf %563, %564 : vector<2x32xf32>
    %566 = math.tanh %565 : vector<2x32xf32>
    %567 = arith.mulf %562, %566 : vector<2x32xf32>
    %568 = arith.index_cast %c7_i32_211 : i32 to index
    %c0_216 = arith.constant 0 : index
    %c0_217 = arith.constant 0 : index
    %569 = vector.load %arg21[%568, %c0_216, %c0_217] : memref<8x2x32xf32, #tpu.memory_space<vmem>>, vector<1x2x32xf32>
    %570 = vector.shape_cast %569 : vector<1x2x32xf32> to vector<2x32xf32>
    %571 = vector.shape_cast %567 : vector<2x32xf32> to vector<1x2x32xf32>
    tpu.vector_store %arg21[%568, %c0_216, %c0_217], %571 {strides = array<i32>} : memref<8x2x32xf32, #tpu.memory_space<vmem>>, vector<1x2x32xf32>,
    %c8_i32_218 = arith.constant 8 : i32
    %c0_219 = arith.constant 0 : index
    %c0_220 = arith.constant 0 : index
    %572 = vector.load %arg11[%c0_219, %c0_220] : memref<1x128xf32, #tpu.memory_space<vmem>>, vector<1x128xf32>
    %c0_221 = arith.constant 0 : index
    %c0_222 = arith.constant 0 : index
    %573 = vector.load %arg12[%c0_221, %c0_222] : memref<1x128xf32, #tpu.memory_space<vmem>>, vector<1x128xf32>
    %574 = arith.addf %572, %573 : vector<1x128xf32>
    %c0_223 = arith.constant 0 : index
    %c0_224 = arith.constant 0 : index
    %575 = vector.load %arg9[%c0_223, %c0_224] : memref<32x128xf32, #tpu.memory_space<vmem>>, vector<32x128xf32>
    %c0_225 = arith.constant 0 : index
    %c0_226 = arith.constant 0 : index
    %576 = vector.load %arg10[%c0_225, %c0_226] : memref<32x128xf32, #tpu.memory_space<vmem>>, vector<32x128xf32>
    %c0_i32_227 = arith.constant 0 : i32
    %577 = arith.index_cast %c0_i32_227 : i32 to index
    %c0_228 = arith.constant 0 : index
    %c0_229 = arith.constant 0 : index
    %578 = vector.load %arg21[%577, %c0_228, %c0_229] : memref<8x2x32xf32, #tpu.memory_space<vmem>>, vector<1x2x32xf32>
    %579 = vector.shape_cast %578 : vector<1x2x32xf32> to vector<2x32xf32>
    %cst_230 = arith.constant dense<0.000000e+00> : vector<2x128xf32>
    %580 = tpu.matmul %579, %575, %cst_230 {dimension_numbers = #tpu.dot_dimension_numbers<[1], [0], [0], [1], [0, 0, 1, 1], [], []>} : vector<2x32xf32>, vector<32x128xf32>, vector<2x128xf32> -> vector<2x128xf32>
    %581 = vector.broadcast %574 : vector<1x128xf32> to vector<2x128xf32>
    %582 = arith.addf %580, %581 : vector<2x128xf32>
    %583 = arith.index_cast %c0_i32_227 : i32 to index
    %c0_231 = arith.constant 0 : index
    %c0_232 = arith.constant 0 : index
    %584 = vector.load %arg22[%583, %c0_231, %c0_232] : memref<8x2x128xf32, #tpu.memory_space<vmem>>, vector<1x2x128xf32>
    %585 = vector.shape_cast %584 : vector<1x2x128xf32> to vector<2x128xf32>
    %586 = vector.shape_cast %582 : vector<2x128xf32> to vector<1x2x128xf32>
    tpu.vector_store %arg22[%583, %c0_231, %c0_232], %586 {strides = array<i32>} : memref<8x2x128xf32, #tpu.memory_space<vmem>>, vector<1x2x128xf32>,
    %c1_i32_233 = arith.constant 1 : i32
    %587 = arith.index_cast %c1_i32_233 : i32 to index
    %c0_234 = arith.constant 0 : index
    %c0_235 = arith.constant 0 : index
    %588 = vector.load %arg21[%587, %c0_234, %c0_235] : memref<8x2x32xf32, #tpu.memory_space<vmem>>, vector<1x2x32xf32>
    %589 = vector.shape_cast %588 : vector<1x2x32xf32> to vector<2x32xf32>
    %cst_236 = arith.constant dense<0.000000e+00> : vector<2x128xf32>
    %590 = tpu.matmul %589, %575, %cst_236 {dimension_numbers = #tpu.dot_dimension_numbers<[1], [0], [0], [1], [0, 0, 1, 1], [], []>} : vector<2x32xf32>, vector<32x128xf32>, vector<2x128xf32> -> vector<2x128xf32>
    %591 = vector.broadcast %574 : vector<1x128xf32> to vector<2x128xf32>
    %592 = arith.addf %590, %591 : vector<2x128xf32>
    %593 = arith.index_cast %c1_i32_233 : i32 to index
    %c0_237 = arith.constant 0 : index
    %c0_238 = arith.constant 0 : index
    %594 = vector.load %arg22[%593, %c0_237, %c0_238] : memref<8x2x128xf32, #tpu.memory_space<vmem>>, vector<1x2x128xf32>
    %595 = vector.shape_cast %594 : vector<1x2x128xf32> to vector<2x128xf32>
    %596 = vector.shape_cast %592 : vector<2x128xf32> to vector<1x2x128xf32>
    tpu.vector_store %arg22[%593, %c0_237, %c0_238], %596 {strides = array<i32>} : memref<8x2x128xf32, #tpu.memory_space<vmem>>, vector<1x2x128xf32>,
    %c2_i32_239 = arith.constant 2 : i32
    %597 = arith.index_cast %c2_i32_239 : i32 to index
    %c0_240 = arith.constant 0 : index
    %c0_241 = arith.constant 0 : index
    %598 = vector.load %arg21[%597, %c0_240, %c0_241] : memref<8x2x32xf32, #tpu.memory_space<vmem>>, vector<1x2x32xf32>
    %599 = vector.shape_cast %598 : vector<1x2x32xf32> to vector<2x32xf32>
    %cst_242 = arith.constant dense<0.000000e+00> : vector<2x128xf32>
    %600 = tpu.matmul %599, %575, %cst_242 {dimension_numbers = #tpu.dot_dimension_numbers<[1], [0], [0], [1], [0, 0, 1, 1], [], []>} : vector<2x32xf32>, vector<32x128xf32>, vector<2x128xf32> -> vector<2x128xf32>
    %601 = vector.broadcast %574 : vector<1x128xf32> to vector<2x128xf32>
    %602 = arith.addf %600, %601 : vector<2x128xf32>
    %603 = arith.index_cast %c2_i32_239 : i32 to index
    %c0_243 = arith.constant 0 : index
    %c0_244 = arith.constant 0 : index
    %604 = vector.load %arg22[%603, %c0_243, %c0_244] : memref<8x2x128xf32, #tpu.memory_space<vmem>>, vector<1x2x128xf32>
    %605 = vector.shape_cast %604 : vector<1x2x128xf32> to vector<2x128xf32>
    %606 = vector.shape_cast %602 : vector<2x128xf32> to vector<1x2x128xf32>
    tpu.vector_store %arg22[%603, %c0_243, %c0_244], %606 {strides = array<i32>} : memref<8x2x128xf32, #tpu.memory_space<vmem>>, vector<1x2x128xf32>,
    %c3_i32_245 = arith.constant 3 : i32
    %607 = arith.index_cast %c3_i32_245 : i32 to index
    %c0_246 = arith.constant 0 : index
    %c0_247 = arith.constant 0 : index
    %608 = vector.load %arg21[%607, %c0_246, %c0_247] : memref<8x2x32xf32, #tpu.memory_space<vmem>>, vector<1x2x32xf32>
    %609 = vector.shape_cast %608 : vector<1x2x32xf32> to vector<2x32xf32>
    %cst_248 = arith.constant dense<0.000000e+00> : vector<2x128xf32>
    %610 = tpu.matmul %609, %575, %cst_248 {dimension_numbers = #tpu.dot_dimension_numbers<[1], [0], [0], [1], [0, 0, 1, 1], [], []>} : vector<2x32xf32>, vector<32x128xf32>, vector<2x128xf32> -> vector<2x128xf32>
    %611 = vector.broadcast %574 : vector<1x128xf32> to vector<2x128xf32>
    %612 = arith.addf %610, %611 : vector<2x128xf32>
    %613 = arith.index_cast %c3_i32_245 : i32 to index
    %c0_249 = arith.constant 0 : index
    %c0_250 = arith.constant 0 : index
    %614 = vector.load %arg22[%613, %c0_249, %c0_250] : memref<8x2x128xf32, #tpu.memory_space<vmem>>, vector<1x2x128xf32>
    %615 = vector.shape_cast %614 : vector<1x2x128xf32> to vector<2x128xf32>
    %616 = vector.shape_cast %612 : vector<2x128xf32> to vector<1x2x128xf32>
    tpu.vector_store %arg22[%613, %c0_249, %c0_250], %616 {strides = array<i32>} : memref<8x2x128xf32, #tpu.memory_space<vmem>>, vector<1x2x128xf32>,
    %c4_i32_251 = arith.constant 4 : i32
    %617 = arith.index_cast %c4_i32_251 : i32 to index
    %c0_252 = arith.constant 0 : index
    %c0_253 = arith.constant 0 : index
    %618 = vector.load %arg21[%617, %c0_252, %c0_253] : memref<8x2x32xf32, #tpu.memory_space<vmem>>, vector<1x2x32xf32>
    %619 = vector.shape_cast %618 : vector<1x2x32xf32> to vector<2x32xf32>
    %cst_254 = arith.constant dense<0.000000e+00> : vector<2x128xf32>
    %620 = tpu.matmul %619, %575, %cst_254 {dimension_numbers = #tpu.dot_dimension_numbers<[1], [0], [0], [1], [0, 0, 1, 1], [], []>} : vector<2x32xf32>, vector<32x128xf32>, vector<2x128xf32> -> vector<2x128xf32>
    %621 = vector.broadcast %574 : vector<1x128xf32> to vector<2x128xf32>
    %622 = arith.addf %620, %621 : vector<2x128xf32>
    %623 = arith.index_cast %c4_i32_251 : i32 to index
    %c0_255 = arith.constant 0 : index
    %c0_256 = arith.constant 0 : index
    %624 = vector.load %arg22[%623, %c0_255, %c0_256] : memref<8x2x128xf32, #tpu.memory_space<vmem>>, vector<1x2x128xf32>
    %625 = vector.shape_cast %624 : vector<1x2x128xf32> to vector<2x128xf32>
    %626 = vector.shape_cast %622 : vector<2x128xf32> to vector<1x2x128xf32>
    tpu.vector_store %arg22[%623, %c0_255, %c0_256], %626 {strides = array<i32>} : memref<8x2x128xf32, #tpu.memory_space<vmem>>, vector<1x2x128xf32>,
    %c5_i32_257 = arith.constant 5 : i32
    %627 = arith.index_cast %c5_i32_257 : i32 to index
    %c0_258 = arith.constant 0 : index
    %c0_259 = arith.constant 0 : index
    %628 = vector.load %arg21[%627, %c0_258, %c0_259] : memref<8x2x32xf32, #tpu.memory_space<vmem>>, vector<1x2x32xf32>
    %629 = vector.shape_cast %628 : vector<1x2x32xf32> to vector<2x32xf32>
    %cst_260 = arith.constant dense<0.000000e+00> : vector<2x128xf32>
    %630 = tpu.matmul %629, %575, %cst_260 {dimension_numbers = #tpu.dot_dimension_numbers<[1], [0], [0], [1], [0, 0, 1, 1], [], []>} : vector<2x32xf32>, vector<32x128xf32>, vector<2x128xf32> -> vector<2x128xf32>
    %631 = vector.broadcast %574 : vector<1x128xf32> to vector<2x128xf32>
    %632 = arith.addf %630, %631 : vector<2x128xf32>
    %633 = arith.index_cast %c5_i32_257 : i32 to index
    %c0_261 = arith.constant 0 : index
    %c0_262 = arith.constant 0 : index
    %634 = vector.load %arg22[%633, %c0_261, %c0_262] : memref<8x2x128xf32, #tpu.memory_space<vmem>>, vector<1x2x128xf32>
    %635 = vector.shape_cast %634 : vector<1x2x128xf32> to vector<2x128xf32>
    %636 = vector.shape_cast %632 : vector<2x128xf32> to vector<1x2x128xf32>
    tpu.vector_store %arg22[%633, %c0_261, %c0_262], %636 {strides = array<i32>} : memref<8x2x128xf32, #tpu.memory_space<vmem>>, vector<1x2x128xf32>,
    %c6_i32_263 = arith.constant 6 : i32
    %637 = arith.index_cast %c6_i32_263 : i32 to index
    %c0_264 = arith.constant 0 : index
    %c0_265 = arith.constant 0 : index
    %638 = vector.load %arg21[%637, %c0_264, %c0_265] : memref<8x2x32xf32, #tpu.memory_space<vmem>>, vector<1x2x32xf32>
    %639 = vector.shape_cast %638 : vector<1x2x32xf32> to vector<2x32xf32>
    %cst_266 = arith.constant dense<0.000000e+00> : vector<2x128xf32>
    %640 = tpu.matmul %639, %575, %cst_266 {dimension_numbers = #tpu.dot_dimension_numbers<[1], [0], [0], [1], [0, 0, 1, 1], [], []>} : vector<2x32xf32>, vector<32x128xf32>, vector<2x128xf32> -> vector<2x128xf32>
    %641 = vector.broadcast %574 : vector<1x128xf32> to vector<2x128xf32>
    %642 = arith.addf %640, %641 : vector<2x128xf32>
    %643 = arith.index_cast %c6_i32_263 : i32 to index
    %c0_267 = arith.constant 0 : index
    %c0_268 = arith.constant 0 : index
    %644 = vector.load %arg22[%643, %c0_267, %c0_268] : memref<8x2x128xf32, #tpu.memory_space<vmem>>, vector<1x2x128xf32>
    %645 = vector.shape_cast %644 : vector<1x2x128xf32> to vector<2x128xf32>
    %646 = vector.shape_cast %642 : vector<2x128xf32> to vector<1x2x128xf32>
    tpu.vector_store %arg22[%643, %c0_267, %c0_268], %646 {strides = array<i32>} : memref<8x2x128xf32, #tpu.memory_space<vmem>>, vector<1x2x128xf32>,
    %c7_i32_269 = arith.constant 7 : i32
    %647 = arith.index_cast %c7_i32_269 : i32 to index
    %c0_270 = arith.constant 0 : index
    %c0_271 = arith.constant 0 : index
    %648 = vector.load %arg21[%647, %c0_270, %c0_271] : memref<8x2x32xf32, #tpu.memory_space<vmem>>, vector<1x2x32xf32>
    %649 = vector.shape_cast %648 : vector<1x2x32xf32> to vector<2x32xf32>
    %cst_272 = arith.constant dense<0.000000e+00> : vector<2x128xf32>
    %650 = tpu.matmul %649, %575, %cst_272 {dimension_numbers = #tpu.dot_dimension_numbers<[1], [0], [0], [1], [0, 0, 1, 1], [], []>} : vector<2x32xf32>, vector<32x128xf32>, vector<2x128xf32> -> vector<2x128xf32>
    %651 = vector.broadcast %574 : vector<1x128xf32> to vector<2x128xf32>
    %652 = arith.addf %650, %651 : vector<2x128xf32>
    %653 = arith.index_cast %c7_i32_269 : i32 to index
    %c0_273 = arith.constant 0 : index
    %c0_274 = arith.constant 0 : index
    %654 = vector.load %arg22[%653, %c0_273, %c0_274] : memref<8x2x128xf32, #tpu.memory_space<vmem>>, vector<1x2x128xf32>
    %655 = vector.shape_cast %654 : vector<1x2x128xf32> to vector<2x128xf32>
    %656 = vector.shape_cast %652 : vector<2x128xf32> to vector<1x2x128xf32>
    tpu.vector_store %arg22[%653, %c0_273, %c0_274], %656 {strides = array<i32>} : memref<8x2x128xf32, #tpu.memory_space<vmem>>, vector<1x2x128xf32>,
    %c8_i32_275 = arith.constant 8 : i32
    %cst_276 = arith.constant 0.000000e+00 : f32
    %657 = vector.broadcast %cst_276 : f32 to vector<2x32xf32>
    %c0_i32_277 = arith.constant 0 : i32
    %658 = arith.index_cast %c0_i32_277 : i32 to index
    %c0_278 = arith.constant 0 : index
    %c0_279 = arith.constant 0 : index
    %659 = vector.load %arg22[%658, %c0_278, %c0_279] : memref<8x2x128xf32, #tpu.memory_space<vmem>>, vector<1x2x128xf32>
    %660 = vector.shape_cast %659 : vector<1x2x128xf32> to vector<2x128xf32>
    %cst_280 = arith.constant dense<0.000000e+00> : vector<2x128xf32>
    %661 = tpu.matmul %657, %576, %cst_280 {dimension_numbers = #tpu.dot_dimension_numbers<[1], [0], [0], [1], [0, 0, 1, 1], [], []>} : vector<2x32xf32>, vector<32x128xf32>, vector<2x128xf32> -> vector<2x128xf32>
    %662 = arith.addf %660, %661 : vector<2x128xf32>
    %663 = vector.extract_strided_slice %662 {offsets = [0, 0], sizes = [2, 96], strides = [1, 1]} : vector<2x128xf32> to vector<2x96xf32>
    %664 = arith.negf %663 : vector<2x96xf32>
    %665 = math.exp %664 : vector<2x96xf32>
    %cst_281 = arith.constant 1.000000e+00 : f32
    %666 = vector.broadcast %cst_281 : f32 to vector<2x96xf32>
    %667 = arith.addf %666, %665 : vector<2x96xf32>
    %668 = arith.divf %666, %667 : vector<2x96xf32>
    %669 = vector.extract_strided_slice %662 {offsets = [0, 96], sizes = [2, 32], strides = [1, 1]} : vector<2x128xf32> to vector<2x32xf32>
    %670 = math.tanh %669 : vector<2x32xf32>
    %671 = vector.extract_strided_slice %668 {offsets = [0, 0], sizes = [2, 32], strides = [1, 1]} : vector<2x96xf32> to vector<2x32xf32>
    %672 = vector.extract_strided_slice %668 {offsets = [0, 32], sizes = [2, 32], strides = [1, 1]} : vector<2x96xf32> to vector<2x32xf32>
    %673 = vector.extract_strided_slice %668 {offsets = [0, 64], sizes = [2, 32], strides = [1, 1]} : vector<2x96xf32> to vector<2x32xf32>
    %674 = arith.mulf %672, %657 : vector<2x32xf32>
    %675 = arith.mulf %671, %670 : vector<2x32xf32>
    %676 = arith.addf %674, %675 : vector<2x32xf32>
    %677 = math.tanh %676 : vector<2x32xf32>
    %678 = arith.mulf %673, %677 : vector<2x32xf32>
    %679 = arith.index_cast %c0_i32_277 : i32 to index
    %c0_282 = arith.constant 0 : index
    %c0_283 = arith.constant 0 : index
    %680 = vector.load %arg21[%679, %c0_282, %c0_283] : memref<8x2x32xf32, #tpu.memory_space<vmem>>, vector<1x2x32xf32>
    %681 = vector.shape_cast %680 : vector<1x2x32xf32> to vector<2x32xf32>
    %682 = vector.shape_cast %678 : vector<2x32xf32> to vector<1x2x32xf32>
    tpu.vector_store %arg21[%679, %c0_282, %c0_283], %682 {strides = array<i32>} : memref<8x2x32xf32, #tpu.memory_space<vmem>>, vector<1x2x32xf32>,
    %c1_i32_284 = arith.constant 1 : i32
    %683 = arith.index_cast %c1_i32_284 : i32 to index
    %c0_285 = arith.constant 0 : index
    %c0_286 = arith.constant 0 : index
    %684 = vector.load %arg22[%683, %c0_285, %c0_286] : memref<8x2x128xf32, #tpu.memory_space<vmem>>, vector<1x2x128xf32>
    %685 = vector.shape_cast %684 : vector<1x2x128xf32> to vector<2x128xf32>
    %cst_287 = arith.constant dense<0.000000e+00> : vector<2x128xf32>
    %686 = tpu.matmul %678, %576, %cst_287 {dimension_numbers = #tpu.dot_dimension_numbers<[1], [0], [0], [1], [0, 0, 1, 1], [], []>} : vector<2x32xf32>, vector<32x128xf32>, vector<2x128xf32> -> vector<2x128xf32>
    %687 = arith.addf %685, %686 : vector<2x128xf32>
    %688 = vector.extract_strided_slice %687 {offsets = [0, 0], sizes = [2, 96], strides = [1, 1]} : vector<2x128xf32> to vector<2x96xf32>
    %689 = arith.negf %688 : vector<2x96xf32>
    %690 = math.exp %689 : vector<2x96xf32>
    %cst_288 = arith.constant 1.000000e+00 : f32
    %691 = vector.broadcast %cst_288 : f32 to vector<2x96xf32>
    %692 = arith.addf %691, %690 : vector<2x96xf32>
    %693 = arith.divf %691, %692 : vector<2x96xf32>
    %694 = vector.extract_strided_slice %687 {offsets = [0, 96], sizes = [2, 32], strides = [1, 1]} : vector<2x128xf32> to vector<2x32xf32>
    %695 = math.tanh %694 : vector<2x32xf32>
    %696 = vector.extract_strided_slice %693 {offsets = [0, 0], sizes = [2, 32], strides = [1, 1]} : vector<2x96xf32> to vector<2x32xf32>
    %697 = vector.extract_strided_slice %693 {offsets = [0, 32], sizes = [2, 32], strides = [1, 1]} : vector<2x96xf32> to vector<2x32xf32>
    %698 = vector.extract_strided_slice %693 {offsets = [0, 64], sizes = [2, 32], strides = [1, 1]} : vector<2x96xf32> to vector<2x32xf32>
    %699 = arith.mulf %697, %676 : vector<2x32xf32>
    %700 = arith.mulf %696, %695 : vector<2x32xf32>
    %701 = arith.addf %699, %700 : vector<2x32xf32>
    %702 = math.tanh %701 : vector<2x32xf32>
    %703 = arith.mulf %698, %702 : vector<2x32xf32>
    %704 = arith.index_cast %c1_i32_284 : i32 to index
    %c0_289 = arith.constant 0 : index
    %c0_290 = arith.constant 0 : index
    %705 = vector.load %arg21[%704, %c0_289, %c0_290] : memref<8x2x32xf32, #tpu.memory_space<vmem>>, vector<1x2x32xf32>
    %706 = vector.shape_cast %705 : vector<1x2x32xf32> to vector<2x32xf32>
    %707 = vector.shape_cast %703 : vector<2x32xf32> to vector<1x2x32xf32>
    tpu.vector_store %arg21[%704, %c0_289, %c0_290], %707 {strides = array<i32>} : memref<8x2x32xf32, #tpu.memory_space<vmem>>, vector<1x2x32xf32>,
    %c2_i32_291 = arith.constant 2 : i32
    %708 = arith.index_cast %c2_i32_291 : i32 to index
    %c0_292 = arith.constant 0 : index
    %c0_293 = arith.constant 0 : index
    %709 = vector.load %arg22[%708, %c0_292, %c0_293] : memref<8x2x128xf32, #tpu.memory_space<vmem>>, vector<1x2x128xf32>
    %710 = vector.shape_cast %709 : vector<1x2x128xf32> to vector<2x128xf32>
    %cst_294 = arith.constant dense<0.000000e+00> : vector<2x128xf32>
    %711 = tpu.matmul %703, %576, %cst_294 {dimension_numbers = #tpu.dot_dimension_numbers<[1], [0], [0], [1], [0, 0, 1, 1], [], []>} : vector<2x32xf32>, vector<32x128xf32>, vector<2x128xf32> -> vector<2x128xf32>
    %712 = arith.addf %710, %711 : vector<2x128xf32>
    %713 = vector.extract_strided_slice %712 {offsets = [0, 0], sizes = [2, 96], strides = [1, 1]} : vector<2x128xf32> to vector<2x96xf32>
    %714 = arith.negf %713 : vector<2x96xf32>
    %715 = math.exp %714 : vector<2x96xf32>
    %cst_295 = arith.constant 1.000000e+00 : f32
    %716 = vector.broadcast %cst_295 : f32 to vector<2x96xf32>
    %717 = arith.addf %716, %715 : vector<2x96xf32>
    %718 = arith.divf %716, %717 : vector<2x96xf32>
    %719 = vector.extract_strided_slice %712 {offsets = [0, 96], sizes = [2, 32], strides = [1, 1]} : vector<2x128xf32> to vector<2x32xf32>
    %720 = math.tanh %719 : vector<2x32xf32>
    %721 = vector.extract_strided_slice %718 {offsets = [0, 0], sizes = [2, 32], strides = [1, 1]} : vector<2x96xf32> to vector<2x32xf32>
    %722 = vector.extract_strided_slice %718 {offsets = [0, 32], sizes = [2, 32], strides = [1, 1]} : vector<2x96xf32> to vector<2x32xf32>
    %723 = vector.extract_strided_slice %718 {offsets = [0, 64], sizes = [2, 32], strides = [1, 1]} : vector<2x96xf32> to vector<2x32xf32>
    %724 = arith.mulf %722, %701 : vector<2x32xf32>
    %725 = arith.mulf %721, %720 : vector<2x32xf32>
    %726 = arith.addf %724, %725 : vector<2x32xf32>
    %727 = math.tanh %726 : vector<2x32xf32>
    %728 = arith.mulf %723, %727 : vector<2x32xf32>
    %729 = arith.index_cast %c2_i32_291 : i32 to index
    %c0_296 = arith.constant 0 : index
    %c0_297 = arith.constant 0 : index
    %730 = vector.load %arg21[%729, %c0_296, %c0_297] : memref<8x2x32xf32, #tpu.memory_space<vmem>>, vector<1x2x32xf32>
    %731 = vector.shape_cast %730 : vector<1x2x32xf32> to vector<2x32xf32>
    %732 = vector.shape_cast %728 : vector<2x32xf32> to vector<1x2x32xf32>
    tpu.vector_store %arg21[%729, %c0_296, %c0_297], %732 {strides = array<i32>} : memref<8x2x32xf32, #tpu.memory_space<vmem>>, vector<1x2x32xf32>,
    %c3_i32_298 = arith.constant 3 : i32
    %733 = arith.index_cast %c3_i32_298 : i32 to index
    %c0_299 = arith.constant 0 : index
    %c0_300 = arith.constant 0 : index
    %734 = vector.load %arg22[%733, %c0_299, %c0_300] : memref<8x2x128xf32, #tpu.memory_space<vmem>>, vector<1x2x128xf32>
    %735 = vector.shape_cast %734 : vector<1x2x128xf32> to vector<2x128xf32>
    %cst_301 = arith.constant dense<0.000000e+00> : vector<2x128xf32>
    %736 = tpu.matmul %728, %576, %cst_301 {dimension_numbers = #tpu.dot_dimension_numbers<[1], [0], [0], [1], [0, 0, 1, 1], [], []>} : vector<2x32xf32>, vector<32x128xf32>, vector<2x128xf32> -> vector<2x128xf32>
    %737 = arith.addf %735, %736 : vector<2x128xf32>
    %738 = vector.extract_strided_slice %737 {offsets = [0, 0], sizes = [2, 96], strides = [1, 1]} : vector<2x128xf32> to vector<2x96xf32>
    %739 = arith.negf %738 : vector<2x96xf32>
    %740 = math.exp %739 : vector<2x96xf32>
    %cst_302 = arith.constant 1.000000e+00 : f32
    %741 = vector.broadcast %cst_302 : f32 to vector<2x96xf32>
    %742 = arith.addf %741, %740 : vector<2x96xf32>
    %743 = arith.divf %741, %742 : vector<2x96xf32>
    %744 = vector.extract_strided_slice %737 {offsets = [0, 96], sizes = [2, 32], strides = [1, 1]} : vector<2x128xf32> to vector<2x32xf32>
    %745 = math.tanh %744 : vector<2x32xf32>
    %746 = vector.extract_strided_slice %743 {offsets = [0, 0], sizes = [2, 32], strides = [1, 1]} : vector<2x96xf32> to vector<2x32xf32>
    %747 = vector.extract_strided_slice %743 {offsets = [0, 32], sizes = [2, 32], strides = [1, 1]} : vector<2x96xf32> to vector<2x32xf32>
    %748 = vector.extract_strided_slice %743 {offsets = [0, 64], sizes = [2, 32], strides = [1, 1]} : vector<2x96xf32> to vector<2x32xf32>
    %749 = arith.mulf %747, %726 : vector<2x32xf32>
    %750 = arith.mulf %746, %745 : vector<2x32xf32>
    %751 = arith.addf %749, %750 : vector<2x32xf32>
    %752 = math.tanh %751 : vector<2x32xf32>
    %753 = arith.mulf %748, %752 : vector<2x32xf32>
    %754 = arith.index_cast %c3_i32_298 : i32 to index
    %c0_303 = arith.constant 0 : index
    %c0_304 = arith.constant 0 : index
    %755 = vector.load %arg21[%754, %c0_303, %c0_304] : memref<8x2x32xf32, #tpu.memory_space<vmem>>, vector<1x2x32xf32>
    %756 = vector.shape_cast %755 : vector<1x2x32xf32> to vector<2x32xf32>
    %757 = vector.shape_cast %753 : vector<2x32xf32> to vector<1x2x32xf32>
    tpu.vector_store %arg21[%754, %c0_303, %c0_304], %757 {strides = array<i32>} : memref<8x2x32xf32, #tpu.memory_space<vmem>>, vector<1x2x32xf32>,
    %c4_i32_305 = arith.constant 4 : i32
    %758 = arith.index_cast %c4_i32_305 : i32 to index
    %c0_306 = arith.constant 0 : index
    %c0_307 = arith.constant 0 : index
    %759 = vector.load %arg22[%758, %c0_306, %c0_307] : memref<8x2x128xf32, #tpu.memory_space<vmem>>, vector<1x2x128xf32>
    %760 = vector.shape_cast %759 : vector<1x2x128xf32> to vector<2x128xf32>
    %cst_308 = arith.constant dense<0.000000e+00> : vector<2x128xf32>
    %761 = tpu.matmul %753, %576, %cst_308 {dimension_numbers = #tpu.dot_dimension_numbers<[1], [0], [0], [1], [0, 0, 1, 1], [], []>} : vector<2x32xf32>, vector<32x128xf32>, vector<2x128xf32> -> vector<2x128xf32>
    %762 = arith.addf %760, %761 : vector<2x128xf32>
    %763 = vector.extract_strided_slice %762 {offsets = [0, 0], sizes = [2, 96], strides = [1, 1]} : vector<2x128xf32> to vector<2x96xf32>
    %764 = arith.negf %763 : vector<2x96xf32>
    %765 = math.exp %764 : vector<2x96xf32>
    %cst_309 = arith.constant 1.000000e+00 : f32
    %766 = vector.broadcast %cst_309 : f32 to vector<2x96xf32>
    %767 = arith.addf %766, %765 : vector<2x96xf32>
    %768 = arith.divf %766, %767 : vector<2x96xf32>
    %769 = vector.extract_strided_slice %762 {offsets = [0, 96], sizes = [2, 32], strides = [1, 1]} : vector<2x128xf32> to vector<2x32xf32>
    %770 = math.tanh %769 : vector<2x32xf32>
    %771 = vector.extract_strided_slice %768 {offsets = [0, 0], sizes = [2, 32], strides = [1, 1]} : vector<2x96xf32> to vector<2x32xf32>
    %772 = vector.extract_strided_slice %768 {offsets = [0, 32], sizes = [2, 32], strides = [1, 1]} : vector<2x96xf32> to vector<2x32xf32>
    %773 = vector.extract_strided_slice %768 {offsets = [0, 64], sizes = [2, 32], strides = [1, 1]} : vector<2x96xf32> to vector<2x32xf32>
    %774 = arith.mulf %772, %751 : vector<2x32xf32>
    %775 = arith.mulf %771, %770 : vector<2x32xf32>
    %776 = arith.addf %774, %775 : vector<2x32xf32>
    %777 = math.tanh %776 : vector<2x32xf32>
    %778 = arith.mulf %773, %777 : vector<2x32xf32>
    %779 = arith.index_cast %c4_i32_305 : i32 to index
    %c0_310 = arith.constant 0 : index
    %c0_311 = arith.constant 0 : index
    %780 = vector.load %arg21[%779, %c0_310, %c0_311] : memref<8x2x32xf32, #tpu.memory_space<vmem>>, vector<1x2x32xf32>
    %781 = vector.shape_cast %780 : vector<1x2x32xf32> to vector<2x32xf32>
    %782 = vector.shape_cast %778 : vector<2x32xf32> to vector<1x2x32xf32>
    tpu.vector_store %arg21[%779, %c0_310, %c0_311], %782 {strides = array<i32>} : memref<8x2x32xf32, #tpu.memory_space<vmem>>, vector<1x2x32xf32>,
    %c5_i32_312 = arith.constant 5 : i32
    %783 = arith.index_cast %c5_i32_312 : i32 to index
    %c0_313 = arith.constant 0 : index
    %c0_314 = arith.constant 0 : index
    %784 = vector.load %arg22[%783, %c0_313, %c0_314] : memref<8x2x128xf32, #tpu.memory_space<vmem>>, vector<1x2x128xf32>
    %785 = vector.shape_cast %784 : vector<1x2x128xf32> to vector<2x128xf32>
    %cst_315 = arith.constant dense<0.000000e+00> : vector<2x128xf32>
    %786 = tpu.matmul %778, %576, %cst_315 {dimension_numbers = #tpu.dot_dimension_numbers<[1], [0], [0], [1], [0, 0, 1, 1], [], []>} : vector<2x32xf32>, vector<32x128xf32>, vector<2x128xf32> -> vector<2x128xf32>
    %787 = arith.addf %785, %786 : vector<2x128xf32>
    %788 = vector.extract_strided_slice %787 {offsets = [0, 0], sizes = [2, 96], strides = [1, 1]} : vector<2x128xf32> to vector<2x96xf32>
    %789 = arith.negf %788 : vector<2x96xf32>
    %790 = math.exp %789 : vector<2x96xf32>
    %cst_316 = arith.constant 1.000000e+00 : f32
    %791 = vector.broadcast %cst_316 : f32 to vector<2x96xf32>
    %792 = arith.addf %791, %790 : vector<2x96xf32>
    %793 = arith.divf %791, %792 : vector<2x96xf32>
    %794 = vector.extract_strided_slice %787 {offsets = [0, 96], sizes = [2, 32], strides = [1, 1]} : vector<2x128xf32> to vector<2x32xf32>
    %795 = math.tanh %794 : vector<2x32xf32>
    %796 = vector.extract_strided_slice %793 {offsets = [0, 0], sizes = [2, 32], strides = [1, 1]} : vector<2x96xf32> to vector<2x32xf32>
    %797 = vector.extract_strided_slice %793 {offsets = [0, 32], sizes = [2, 32], strides = [1, 1]} : vector<2x96xf32> to vector<2x32xf32>
    %798 = vector.extract_strided_slice %793 {offsets = [0, 64], sizes = [2, 32], strides = [1, 1]} : vector<2x96xf32> to vector<2x32xf32>
    %799 = arith.mulf %797, %776 : vector<2x32xf32>
    %800 = arith.mulf %796, %795 : vector<2x32xf32>
    %801 = arith.addf %799, %800 : vector<2x32xf32>
    %802 = math.tanh %801 : vector<2x32xf32>
    %803 = arith.mulf %798, %802 : vector<2x32xf32>
    %804 = arith.index_cast %c5_i32_312 : i32 to index
    %c0_317 = arith.constant 0 : index
    %c0_318 = arith.constant 0 : index
    %805 = vector.load %arg21[%804, %c0_317, %c0_318] : memref<8x2x32xf32, #tpu.memory_space<vmem>>, vector<1x2x32xf32>
    %806 = vector.shape_cast %805 : vector<1x2x32xf32> to vector<2x32xf32>
    %807 = vector.shape_cast %803 : vector<2x32xf32> to vector<1x2x32xf32>
    tpu.vector_store %arg21[%804, %c0_317, %c0_318], %807 {strides = array<i32>} : memref<8x2x32xf32, #tpu.memory_space<vmem>>, vector<1x2x32xf32>,
    %c6_i32_319 = arith.constant 6 : i32
    %808 = arith.index_cast %c6_i32_319 : i32 to index
    %c0_320 = arith.constant 0 : index
    %c0_321 = arith.constant 0 : index
    %809 = vector.load %arg22[%808, %c0_320, %c0_321] : memref<8x2x128xf32, #tpu.memory_space<vmem>>, vector<1x2x128xf32>
    %810 = vector.shape_cast %809 : vector<1x2x128xf32> to vector<2x128xf32>
    %cst_322 = arith.constant dense<0.000000e+00> : vector<2x128xf32>
    %811 = tpu.matmul %803, %576, %cst_322 {dimension_numbers = #tpu.dot_dimension_numbers<[1], [0], [0], [1], [0, 0, 1, 1], [], []>} : vector<2x32xf32>, vector<32x128xf32>, vector<2x128xf32> -> vector<2x128xf32>
    %812 = arith.addf %810, %811 : vector<2x128xf32>
    %813 = vector.extract_strided_slice %812 {offsets = [0, 0], sizes = [2, 96], strides = [1, 1]} : vector<2x128xf32> to vector<2x96xf32>
    %814 = arith.negf %813 : vector<2x96xf32>
    %815 = math.exp %814 : vector<2x96xf32>
    %cst_323 = arith.constant 1.000000e+00 : f32
    %816 = vector.broadcast %cst_323 : f32 to vector<2x96xf32>
    %817 = arith.addf %816, %815 : vector<2x96xf32>
    %818 = arith.divf %816, %817 : vector<2x96xf32>
    %819 = vector.extract_strided_slice %812 {offsets = [0, 96], sizes = [2, 32], strides = [1, 1]} : vector<2x128xf32> to vector<2x32xf32>
    %820 = math.tanh %819 : vector<2x32xf32>
    %821 = vector.extract_strided_slice %818 {offsets = [0, 0], sizes = [2, 32], strides = [1, 1]} : vector<2x96xf32> to vector<2x32xf32>
    %822 = vector.extract_strided_slice %818 {offsets = [0, 32], sizes = [2, 32], strides = [1, 1]} : vector<2x96xf32> to vector<2x32xf32>
    %823 = vector.extract_strided_slice %818 {offsets = [0, 64], sizes = [2, 32], strides = [1, 1]} : vector<2x96xf32> to vector<2x32xf32>
    %824 = arith.mulf %822, %801 : vector<2x32xf32>
    %825 = arith.mulf %821, %820 : vector<2x32xf32>
    %826 = arith.addf %824, %825 : vector<2x32xf32>
    %827 = math.tanh %826 : vector<2x32xf32>
    %828 = arith.mulf %823, %827 : vector<2x32xf32>
    %829 = arith.index_cast %c6_i32_319 : i32 to index
    %c0_324 = arith.constant 0 : index
    %c0_325 = arith.constant 0 : index
    %830 = vector.load %arg21[%829, %c0_324, %c0_325] : memref<8x2x32xf32, #tpu.memory_space<vmem>>, vector<1x2x32xf32>
    %831 = vector.shape_cast %830 : vector<1x2x32xf32> to vector<2x32xf32>
    %832 = vector.shape_cast %828 : vector<2x32xf32> to vector<1x2x32xf32>
    tpu.vector_store %arg21[%829, %c0_324, %c0_325], %832 {strides = array<i32>} : memref<8x2x32xf32, #tpu.memory_space<vmem>>, vector<1x2x32xf32>,
    %c7_i32_326 = arith.constant 7 : i32
    %833 = arith.index_cast %c7_i32_326 : i32 to index
    %c0_327 = arith.constant 0 : index
    %c0_328 = arith.constant 0 : index
    %834 = vector.load %arg22[%833, %c0_327, %c0_328] : memref<8x2x128xf32, #tpu.memory_space<vmem>>, vector<1x2x128xf32>
    %835 = vector.shape_cast %834 : vector<1x2x128xf32> to vector<2x128xf32>
    %cst_329 = arith.constant dense<0.000000e+00> : vector<2x128xf32>
    %836 = tpu.matmul %828, %576, %cst_329 {dimension_numbers = #tpu.dot_dimension_numbers<[1], [0], [0], [1], [0, 0, 1, 1], [], []>} : vector<2x32xf32>, vector<32x128xf32>, vector<2x128xf32> -> vector<2x128xf32>
    %837 = arith.addf %835, %836 : vector<2x128xf32>
    %838 = vector.extract_strided_slice %837 {offsets = [0, 0], sizes = [2, 96], strides = [1, 1]} : vector<2x128xf32> to vector<2x96xf32>
    %839 = arith.negf %838 : vector<2x96xf32>
    %840 = math.exp %839 : vector<2x96xf32>
    %cst_330 = arith.constant 1.000000e+00 : f32
    %841 = vector.broadcast %cst_330 : f32 to vector<2x96xf32>
    %842 = arith.addf %841, %840 : vector<2x96xf32>
    %843 = arith.divf %841, %842 : vector<2x96xf32>
    %844 = vector.extract_strided_slice %837 {offsets = [0, 96], sizes = [2, 32], strides = [1, 1]} : vector<2x128xf32> to vector<2x32xf32>
    %845 = math.tanh %844 : vector<2x32xf32>
    %846 = vector.extract_strided_slice %843 {offsets = [0, 0], sizes = [2, 32], strides = [1, 1]} : vector<2x96xf32> to vector<2x32xf32>
    %847 = vector.extract_strided_slice %843 {offsets = [0, 32], sizes = [2, 32], strides = [1, 1]} : vector<2x96xf32> to vector<2x32xf32>
    %848 = vector.extract_strided_slice %843 {offsets = [0, 64], sizes = [2, 32], strides = [1, 1]} : vector<2x96xf32> to vector<2x32xf32>
    %849 = arith.mulf %847, %826 : vector<2x32xf32>
    %850 = arith.mulf %846, %845 : vector<2x32xf32>
    %851 = arith.addf %849, %850 : vector<2x32xf32>
    %852 = math.tanh %851 : vector<2x32xf32>
    %853 = arith.mulf %848, %852 : vector<2x32xf32>
    %854 = arith.index_cast %c7_i32_326 : i32 to index
    %c0_331 = arith.constant 0 : index
    %c0_332 = arith.constant 0 : index
    %855 = vector.load %arg21[%854, %c0_331, %c0_332] : memref<8x2x32xf32, #tpu.memory_space<vmem>>, vector<1x2x32xf32>
    %856 = vector.shape_cast %855 : vector<1x2x32xf32> to vector<2x32xf32>
    %857 = vector.shape_cast %853 : vector<2x32xf32> to vector<1x2x32xf32>
    tpu.vector_store %arg21[%854, %c0_331, %c0_332], %857 {strides = array<i32>} : memref<8x2x32xf32, #tpu.memory_space<vmem>>, vector<1x2x32xf32>,
    %c8_i32_333 = arith.constant 8 : i32
    %c0_334 = arith.constant 0 : index
    %c0_335 = arith.constant 0 : index
    %858 = vector.load %arg15[%c0_334, %c0_335] : memref<1x128xf32, #tpu.memory_space<vmem>>, vector<1x128xf32>
    %c0_336 = arith.constant 0 : index
    %c0_337 = arith.constant 0 : index
    %859 = vector.load %arg16[%c0_336, %c0_337] : memref<1x128xf32, #tpu.memory_space<vmem>>, vector<1x128xf32>
    %860 = arith.addf %858, %859 : vector<1x128xf32>
    %c0_338 = arith.constant 0 : index
    %c0_339 = arith.constant 0 : index
    %861 = vector.load %arg13[%c0_338, %c0_339] : memref<32x128xf32, #tpu.memory_space<vmem>>, vector<32x128xf32>
    %c0_340 = arith.constant 0 : index
    %c0_341 = arith.constant 0 : index
    %862 = vector.load %arg14[%c0_340, %c0_341] : memref<32x128xf32, #tpu.memory_space<vmem>>, vector<32x128xf32>
    %c0_i32_342 = arith.constant 0 : i32
    %863 = arith.index_cast %c0_i32_342 : i32 to index
    %c0_343 = arith.constant 0 : index
    %c0_344 = arith.constant 0 : index
    %864 = vector.load %arg21[%863, %c0_343, %c0_344] : memref<8x2x32xf32, #tpu.memory_space<vmem>>, vector<1x2x32xf32>
    %865 = vector.shape_cast %864 : vector<1x2x32xf32> to vector<2x32xf32>
    %cst_345 = arith.constant dense<0.000000e+00> : vector<2x128xf32>
    %866 = tpu.matmul %865, %861, %cst_345 {dimension_numbers = #tpu.dot_dimension_numbers<[1], [0], [0], [1], [0, 0, 1, 1], [], []>} : vector<2x32xf32>, vector<32x128xf32>, vector<2x128xf32> -> vector<2x128xf32>
    %867 = vector.broadcast %860 : vector<1x128xf32> to vector<2x128xf32>
    %868 = arith.addf %866, %867 : vector<2x128xf32>
    %869 = arith.index_cast %c0_i32_342 : i32 to index
    %c0_346 = arith.constant 0 : index
    %c0_347 = arith.constant 0 : index
    %870 = vector.load %arg22[%869, %c0_346, %c0_347] : memref<8x2x128xf32, #tpu.memory_space<vmem>>, vector<1x2x128xf32>
    %871 = vector.shape_cast %870 : vector<1x2x128xf32> to vector<2x128xf32>
    %872 = vector.shape_cast %868 : vector<2x128xf32> to vector<1x2x128xf32>
    tpu.vector_store %arg22[%869, %c0_346, %c0_347], %872 {strides = array<i32>} : memref<8x2x128xf32, #tpu.memory_space<vmem>>, vector<1x2x128xf32>,
    %c1_i32_348 = arith.constant 1 : i32
    %873 = arith.index_cast %c1_i32_348 : i32 to index
    %c0_349 = arith.constant 0 : index
    %c0_350 = arith.constant 0 : index
    %874 = vector.load %arg21[%873, %c0_349, %c0_350] : memref<8x2x32xf32, #tpu.memory_space<vmem>>, vector<1x2x32xf32>
    %875 = vector.shape_cast %874 : vector<1x2x32xf32> to vector<2x32xf32>
    %cst_351 = arith.constant dense<0.000000e+00> : vector<2x128xf32>
    %876 = tpu.matmul %875, %861, %cst_351 {dimension_numbers = #tpu.dot_dimension_numbers<[1], [0], [0], [1], [0, 0, 1, 1], [], []>} : vector<2x32xf32>, vector<32x128xf32>, vector<2x128xf32> -> vector<2x128xf32>
    %877 = vector.broadcast %860 : vector<1x128xf32> to vector<2x128xf32>
    %878 = arith.addf %876, %877 : vector<2x128xf32>
    %879 = arith.index_cast %c1_i32_348 : i32 to index
    %c0_352 = arith.constant 0 : index
    %c0_353 = arith.constant 0 : index
    %880 = vector.load %arg22[%879, %c0_352, %c0_353] : memref<8x2x128xf32, #tpu.memory_space<vmem>>, vector<1x2x128xf32>
    %881 = vector.shape_cast %880 : vector<1x2x128xf32> to vector<2x128xf32>
    %882 = vector.shape_cast %878 : vector<2x128xf32> to vector<1x2x128xf32>
    tpu.vector_store %arg22[%879, %c0_352, %c0_353], %882 {strides = array<i32>} : memref<8x2x128xf32, #tpu.memory_space<vmem>>, vector<1x2x128xf32>,
    %c2_i32_354 = arith.constant 2 : i32
    %883 = arith.index_cast %c2_i32_354 : i32 to index
    %c0_355 = arith.constant 0 : index
    %c0_356 = arith.constant 0 : index
    %884 = vector.load %arg21[%883, %c0_355, %c0_356] : memref<8x2x32xf32, #tpu.memory_space<vmem>>, vector<1x2x32xf32>
    %885 = vector.shape_cast %884 : vector<1x2x32xf32> to vector<2x32xf32>
    %cst_357 = arith.constant dense<0.000000e+00> : vector<2x128xf32>
    %886 = tpu.matmul %885, %861, %cst_357 {dimension_numbers = #tpu.dot_dimension_numbers<[1], [0], [0], [1], [0, 0, 1, 1], [], []>} : vector<2x32xf32>, vector<32x128xf32>, vector<2x128xf32> -> vector<2x128xf32>
    %887 = vector.broadcast %860 : vector<1x128xf32> to vector<2x128xf32>
    %888 = arith.addf %886, %887 : vector<2x128xf32>
    %889 = arith.index_cast %c2_i32_354 : i32 to index
    %c0_358 = arith.constant 0 : index
    %c0_359 = arith.constant 0 : index
    %890 = vector.load %arg22[%889, %c0_358, %c0_359] : memref<8x2x128xf32, #tpu.memory_space<vmem>>, vector<1x2x128xf32>
    %891 = vector.shape_cast %890 : vector<1x2x128xf32> to vector<2x128xf32>
    %892 = vector.shape_cast %888 : vector<2x128xf32> to vector<1x2x128xf32>
    tpu.vector_store %arg22[%889, %c0_358, %c0_359], %892 {strides = array<i32>} : memref<8x2x128xf32, #tpu.memory_space<vmem>>, vector<1x2x128xf32>,
    %c3_i32_360 = arith.constant 3 : i32
    %893 = arith.index_cast %c3_i32_360 : i32 to index
    %c0_361 = arith.constant 0 : index
    %c0_362 = arith.constant 0 : index
    %894 = vector.load %arg21[%893, %c0_361, %c0_362] : memref<8x2x32xf32, #tpu.memory_space<vmem>>, vector<1x2x32xf32>
    %895 = vector.shape_cast %894 : vector<1x2x32xf32> to vector<2x32xf32>
    %cst_363 = arith.constant dense<0.000000e+00> : vector<2x128xf32>
    %896 = tpu.matmul %895, %861, %cst_363 {dimension_numbers = #tpu.dot_dimension_numbers<[1], [0], [0], [1], [0, 0, 1, 1], [], []>} : vector<2x32xf32>, vector<32x128xf32>, vector<2x128xf32> -> vector<2x128xf32>
    %897 = vector.broadcast %860 : vector<1x128xf32> to vector<2x128xf32>
    %898 = arith.addf %896, %897 : vector<2x128xf32>
    %899 = arith.index_cast %c3_i32_360 : i32 to index
    %c0_364 = arith.constant 0 : index
    %c0_365 = arith.constant 0 : index
    %900 = vector.load %arg22[%899, %c0_364, %c0_365] : memref<8x2x128xf32, #tpu.memory_space<vmem>>, vector<1x2x128xf32>
    %901 = vector.shape_cast %900 : vector<1x2x128xf32> to vector<2x128xf32>
    %902 = vector.shape_cast %898 : vector<2x128xf32> to vector<1x2x128xf32>
    tpu.vector_store %arg22[%899, %c0_364, %c0_365], %902 {strides = array<i32>} : memref<8x2x128xf32, #tpu.memory_space<vmem>>, vector<1x2x128xf32>,
    %c4_i32_366 = arith.constant 4 : i32
    %903 = arith.index_cast %c4_i32_366 : i32 to index
    %c0_367 = arith.constant 0 : index
    %c0_368 = arith.constant 0 : index
    %904 = vector.load %arg21[%903, %c0_367, %c0_368] : memref<8x2x32xf32, #tpu.memory_space<vmem>>, vector<1x2x32xf32>
    %905 = vector.shape_cast %904 : vector<1x2x32xf32> to vector<2x32xf32>
    %cst_369 = arith.constant dense<0.000000e+00> : vector<2x128xf32>
    %906 = tpu.matmul %905, %861, %cst_369 {dimension_numbers = #tpu.dot_dimension_numbers<[1], [0], [0], [1], [0, 0, 1, 1], [], []>} : vector<2x32xf32>, vector<32x128xf32>, vector<2x128xf32> -> vector<2x128xf32>
    %907 = vector.broadcast %860 : vector<1x128xf32> to vector<2x128xf32>
    %908 = arith.addf %906, %907 : vector<2x128xf32>
    %909 = arith.index_cast %c4_i32_366 : i32 to index
    %c0_370 = arith.constant 0 : index
    %c0_371 = arith.constant 0 : index
    %910 = vector.load %arg22[%909, %c0_370, %c0_371] : memref<8x2x128xf32, #tpu.memory_space<vmem>>, vector<1x2x128xf32>
    %911 = vector.shape_cast %910 : vector<1x2x128xf32> to vector<2x128xf32>
    %912 = vector.shape_cast %908 : vector<2x128xf32> to vector<1x2x128xf32>
    tpu.vector_store %arg22[%909, %c0_370, %c0_371], %912 {strides = array<i32>} : memref<8x2x128xf32, #tpu.memory_space<vmem>>, vector<1x2x128xf32>,
    %c5_i32_372 = arith.constant 5 : i32
    %913 = arith.index_cast %c5_i32_372 : i32 to index
    %c0_373 = arith.constant 0 : index
    %c0_374 = arith.constant 0 : index
    %914 = vector.load %arg21[%913, %c0_373, %c0_374] : memref<8x2x32xf32, #tpu.memory_space<vmem>>, vector<1x2x32xf32>
    %915 = vector.shape_cast %914 : vector<1x2x32xf32> to vector<2x32xf32>
    %cst_375 = arith.constant dense<0.000000e+00> : vector<2x128xf32>
    %916 = tpu.matmul %915, %861, %cst_375 {dimension_numbers = #tpu.dot_dimension_numbers<[1], [0], [0], [1], [0, 0, 1, 1], [], []>} : vector<2x32xf32>, vector<32x128xf32>, vector<2x128xf32> -> vector<2x128xf32>
    %917 = vector.broadcast %860 : vector<1x128xf32> to vector<2x128xf32>
    %918 = arith.addf %916, %917 : vector<2x128xf32>
    %919 = arith.index_cast %c5_i32_372 : i32 to index
    %c0_376 = arith.constant 0 : index
    %c0_377 = arith.constant 0 : index
    %920 = vector.load %arg22[%919, %c0_376, %c0_377] : memref<8x2x128xf32, #tpu.memory_space<vmem>>, vector<1x2x128xf32>
    %921 = vector.shape_cast %920 : vector<1x2x128xf32> to vector<2x128xf32>
    %922 = vector.shape_cast %918 : vector<2x128xf32> to vector<1x2x128xf32>
    tpu.vector_store %arg22[%919, %c0_376, %c0_377], %922 {strides = array<i32>} : memref<8x2x128xf32, #tpu.memory_space<vmem>>, vector<1x2x128xf32>,
    %c6_i32_378 = arith.constant 6 : i32
    %923 = arith.index_cast %c6_i32_378 : i32 to index
    %c0_379 = arith.constant 0 : index
    %c0_380 = arith.constant 0 : index
    %924 = vector.load %arg21[%923, %c0_379, %c0_380] : memref<8x2x32xf32, #tpu.memory_space<vmem>>, vector<1x2x32xf32>
    %925 = vector.shape_cast %924 : vector<1x2x32xf32> to vector<2x32xf32>
    %cst_381 = arith.constant dense<0.000000e+00> : vector<2x128xf32>
    %926 = tpu.matmul %925, %861, %cst_381 {dimension_numbers = #tpu.dot_dimension_numbers<[1], [0], [0], [1], [0, 0, 1, 1], [], []>} : vector<2x32xf32>, vector<32x128xf32>, vector<2x128xf32> -> vector<2x128xf32>
    %927 = vector.broadcast %860 : vector<1x128xf32> to vector<2x128xf32>
    %928 = arith.addf %926, %927 : vector<2x128xf32>
    %929 = arith.index_cast %c6_i32_378 : i32 to index
    %c0_382 = arith.constant 0 : index
    %c0_383 = arith.constant 0 : index
    %930 = vector.load %arg22[%929, %c0_382, %c0_383] : memref<8x2x128xf32, #tpu.memory_space<vmem>>, vector<1x2x128xf32>
    %931 = vector.shape_cast %930 : vector<1x2x128xf32> to vector<2x128xf32>
    %932 = vector.shape_cast %928 : vector<2x128xf32> to vector<1x2x128xf32>
    tpu.vector_store %arg22[%929, %c0_382, %c0_383], %932 {strides = array<i32>} : memref<8x2x128xf32, #tpu.memory_space<vmem>>, vector<1x2x128xf32>,
    %c7_i32_384 = arith.constant 7 : i32
    %933 = arith.index_cast %c7_i32_384 : i32 to index
    %c0_385 = arith.constant 0 : index
    %c0_386 = arith.constant 0 : index
    %934 = vector.load %arg21[%933, %c0_385, %c0_386] : memref<8x2x32xf32, #tpu.memory_space<vmem>>, vector<1x2x32xf32>
    %935 = vector.shape_cast %934 : vector<1x2x32xf32> to vector<2x32xf32>
    %cst_387 = arith.constant dense<0.000000e+00> : vector<2x128xf32>
    %936 = tpu.matmul %935, %861, %cst_387 {dimension_numbers = #tpu.dot_dimension_numbers<[1], [0], [0], [1], [0, 0, 1, 1], [], []>} : vector<2x32xf32>, vector<32x128xf32>, vector<2x128xf32> -> vector<2x128xf32>
    %937 = vector.broadcast %860 : vector<1x128xf32> to vector<2x128xf32>
    %938 = arith.addf %936, %937 : vector<2x128xf32>
    %939 = arith.index_cast %c7_i32_384 : i32 to index
    %c0_388 = arith.constant 0 : index
    %c0_389 = arith.constant 0 : index
    %940 = vector.load %arg22[%939, %c0_388, %c0_389] : memref<8x2x128xf32, #tpu.memory_space<vmem>>, vector<1x2x128xf32>
    %941 = vector.shape_cast %940 : vector<1x2x128xf32> to vector<2x128xf32>
    %942 = vector.shape_cast %938 : vector<2x128xf32> to vector<1x2x128xf32>
    tpu.vector_store %arg22[%939, %c0_388, %c0_389], %942 {strides = array<i32>} : memref<8x2x128xf32, #tpu.memory_space<vmem>>, vector<1x2x128xf32>,
    %c8_i32_390 = arith.constant 8 : i32
    %cst_391 = arith.constant 0.000000e+00 : f32
    %943 = vector.broadcast %cst_391 : f32 to vector<2x32xf32>
    %c0_i32_392 = arith.constant 0 : i32
    %944 = arith.index_cast %c0_i32_392 : i32 to index
    %c0_393 = arith.constant 0 : index
    %c0_394 = arith.constant 0 : index
    %945 = vector.load %arg22[%944, %c0_393, %c0_394] : memref<8x2x128xf32, #tpu.memory_space<vmem>>, vector<1x2x128xf32>
    %946 = vector.shape_cast %945 : vector<1x2x128xf32> to vector<2x128xf32>
    %cst_395 = arith.constant dense<0.000000e+00> : vector<2x128xf32>
    %947 = tpu.matmul %943, %862, %cst_395 {dimension_numbers = #tpu.dot_dimension_numbers<[1], [0], [0], [1], [0, 0, 1, 1], [], []>} : vector<2x32xf32>, vector<32x128xf32>, vector<2x128xf32> -> vector<2x128xf32>
    %948 = arith.addf %946, %947 : vector<2x128xf32>
    %949 = vector.extract_strided_slice %948 {offsets = [0, 0], sizes = [2, 96], strides = [1, 1]} : vector<2x128xf32> to vector<2x96xf32>
    %950 = arith.negf %949 : vector<2x96xf32>
    %951 = math.exp %950 : vector<2x96xf32>
    %cst_396 = arith.constant 1.000000e+00 : f32
    %952 = vector.broadcast %cst_396 : f32 to vector<2x96xf32>
    %953 = arith.addf %952, %951 : vector<2x96xf32>
    %954 = arith.divf %952, %953 : vector<2x96xf32>
    %955 = vector.extract_strided_slice %948 {offsets = [0, 96], sizes = [2, 32], strides = [1, 1]} : vector<2x128xf32> to vector<2x32xf32>
    %956 = math.tanh %955 : vector<2x32xf32>
    %957 = vector.extract_strided_slice %954 {offsets = [0, 0], sizes = [2, 32], strides = [1, 1]} : vector<2x96xf32> to vector<2x32xf32>
    %958 = vector.extract_strided_slice %954 {offsets = [0, 32], sizes = [2, 32], strides = [1, 1]} : vector<2x96xf32> to vector<2x32xf32>
    %959 = vector.extract_strided_slice %954 {offsets = [0, 64], sizes = [2, 32], strides = [1, 1]} : vector<2x96xf32> to vector<2x32xf32>
    %960 = arith.mulf %958, %943 : vector<2x32xf32>
    %961 = arith.mulf %957, %956 : vector<2x32xf32>
    %962 = arith.addf %960, %961 : vector<2x32xf32>
    %963 = math.tanh %962 : vector<2x32xf32>
    %964 = arith.mulf %959, %963 : vector<2x32xf32>
    %c1_i32_397 = arith.constant 1 : i32
    %965 = arith.index_cast %c1_i32_397 : i32 to index
    %c0_398 = arith.constant 0 : index
    %c0_399 = arith.constant 0 : index
    %966 = vector.load %arg22[%965, %c0_398, %c0_399] : memref<8x2x128xf32, #tpu.memory_space<vmem>>, vector<1x2x128xf32>
    %967 = vector.shape_cast %966 : vector<1x2x128xf32> to vector<2x128xf32>
    %cst_400 = arith.constant dense<0.000000e+00> : vector<2x128xf32>
    %968 = tpu.matmul %964, %862, %cst_400 {dimension_numbers = #tpu.dot_dimension_numbers<[1], [0], [0], [1], [0, 0, 1, 1], [], []>} : vector<2x32xf32>, vector<32x128xf32>, vector<2x128xf32> -> vector<2x128xf32>
    %969 = arith.addf %967, %968 : vector<2x128xf32>
    %970 = vector.extract_strided_slice %969 {offsets = [0, 0], sizes = [2, 96], strides = [1, 1]} : vector<2x128xf32> to vector<2x96xf32>
    %971 = arith.negf %970 : vector<2x96xf32>
    %972 = math.exp %971 : vector<2x96xf32>
    %cst_401 = arith.constant 1.000000e+00 : f32
    %973 = vector.broadcast %cst_401 : f32 to vector<2x96xf32>
    %974 = arith.addf %973, %972 : vector<2x96xf32>
    %975 = arith.divf %973, %974 : vector<2x96xf32>
    %976 = vector.extract_strided_slice %969 {offsets = [0, 96], sizes = [2, 32], strides = [1, 1]} : vector<2x128xf32> to vector<2x32xf32>
    %977 = math.tanh %976 : vector<2x32xf32>
    %978 = vector.extract_strided_slice %975 {offsets = [0, 0], sizes = [2, 32], strides = [1, 1]} : vector<2x96xf32> to vector<2x32xf32>
    %979 = vector.extract_strided_slice %975 {offsets = [0, 32], sizes = [2, 32], strides = [1, 1]} : vector<2x96xf32> to vector<2x32xf32>
    %980 = vector.extract_strided_slice %975 {offsets = [0, 64], sizes = [2, 32], strides = [1, 1]} : vector<2x96xf32> to vector<2x32xf32>
    %981 = arith.mulf %979, %962 : vector<2x32xf32>
    %982 = arith.mulf %978, %977 : vector<2x32xf32>
    %983 = arith.addf %981, %982 : vector<2x32xf32>
    %984 = math.tanh %983 : vector<2x32xf32>
    %985 = arith.mulf %980, %984 : vector<2x32xf32>
    %c2_i32_402 = arith.constant 2 : i32
    %986 = arith.index_cast %c2_i32_402 : i32 to index
    %c0_403 = arith.constant 0 : index
    %c0_404 = arith.constant 0 : index
    %987 = vector.load %arg22[%986, %c0_403, %c0_404] : memref<8x2x128xf32, #tpu.memory_space<vmem>>, vector<1x2x128xf32>
    %988 = vector.shape_cast %987 : vector<1x2x128xf32> to vector<2x128xf32>
    %cst_405 = arith.constant dense<0.000000e+00> : vector<2x128xf32>
    %989 = tpu.matmul %985, %862, %cst_405 {dimension_numbers = #tpu.dot_dimension_numbers<[1], [0], [0], [1], [0, 0, 1, 1], [], []>} : vector<2x32xf32>, vector<32x128xf32>, vector<2x128xf32> -> vector<2x128xf32>
    %990 = arith.addf %988, %989 : vector<2x128xf32>
    %991 = vector.extract_strided_slice %990 {offsets = [0, 0], sizes = [2, 96], strides = [1, 1]} : vector<2x128xf32> to vector<2x96xf32>
    %992 = arith.negf %991 : vector<2x96xf32>
    %993 = math.exp %992 : vector<2x96xf32>
    %cst_406 = arith.constant 1.000000e+00 : f32
    %994 = vector.broadcast %cst_406 : f32 to vector<2x96xf32>
    %995 = arith.addf %994, %993 : vector<2x96xf32>
    %996 = arith.divf %994, %995 : vector<2x96xf32>
    %997 = vector.extract_strided_slice %990 {offsets = [0, 96], sizes = [2, 32], strides = [1, 1]} : vector<2x128xf32> to vector<2x32xf32>
    %998 = math.tanh %997 : vector<2x32xf32>
    %999 = vector.extract_strided_slice %996 {offsets = [0, 0], sizes = [2, 32], strides = [1, 1]} : vector<2x96xf32> to vector<2x32xf32>
    %1000 = vector.extract_strided_slice %996 {offsets = [0, 32], sizes = [2, 32], strides = [1, 1]} : vector<2x96xf32> to vector<2x32xf32>
    %1001 = vector.extract_strided_slice %996 {offsets = [0, 64], sizes = [2, 32], strides = [1, 1]} : vector<2x96xf32> to vector<2x32xf32>
    %1002 = arith.mulf %1000, %983 : vector<2x32xf32>
    %1003 = arith.mulf %999, %998 : vector<2x32xf32>
    %1004 = arith.addf %1002, %1003 : vector<2x32xf32>
    %1005 = math.tanh %1004 : vector<2x32xf32>
    %1006 = arith.mulf %1001, %1005 : vector<2x32xf32>
    %c3_i32_407 = arith.constant 3 : i32
    %1007 = arith.index_cast %c3_i32_407 : i32 to index
    %c0_408 = arith.constant 0 : index
    %c0_409 = arith.constant 0 : index
    %1008 = vector.load %arg22[%1007, %c0_408, %c0_409] : memref<8x2x128xf32, #tpu.memory_space<vmem>>, vector<1x2x128xf32>
    %1009 = vector.shape_cast %1008 : vector<1x2x128xf32> to vector<2x128xf32>
    %cst_410 = arith.constant dense<0.000000e+00> : vector<2x128xf32>
    %1010 = tpu.matmul %1006, %862, %cst_410 {dimension_numbers = #tpu.dot_dimension_numbers<[1], [0], [0], [1], [0, 0, 1, 1], [], []>} : vector<2x32xf32>, vector<32x128xf32>, vector<2x128xf32> -> vector<2x128xf32>
    %1011 = arith.addf %1009, %1010 : vector<2x128xf32>
    %1012 = vector.extract_strided_slice %1011 {offsets = [0, 0], sizes = [2, 96], strides = [1, 1]} : vector<2x128xf32> to vector<2x96xf32>
    %1013 = arith.negf %1012 : vector<2x96xf32>
    %1014 = math.exp %1013 : vector<2x96xf32>
    %cst_411 = arith.constant 1.000000e+00 : f32
    %1015 = vector.broadcast %cst_411 : f32 to vector<2x96xf32>
    %1016 = arith.addf %1015, %1014 : vector<2x96xf32>
    %1017 = arith.divf %1015, %1016 : vector<2x96xf32>
    %1018 = vector.extract_strided_slice %1011 {offsets = [0, 96], sizes = [2, 32], strides = [1, 1]} : vector<2x128xf32> to vector<2x32xf32>
    %1019 = math.tanh %1018 : vector<2x32xf32>
    %1020 = vector.extract_strided_slice %1017 {offsets = [0, 0], sizes = [2, 32], strides = [1, 1]} : vector<2x96xf32> to vector<2x32xf32>
    %1021 = vector.extract_strided_slice %1017 {offsets = [0, 32], sizes = [2, 32], strides = [1, 1]} : vector<2x96xf32> to vector<2x32xf32>
    %1022 = vector.extract_strided_slice %1017 {offsets = [0, 64], sizes = [2, 32], strides = [1, 1]} : vector<2x96xf32> to vector<2x32xf32>
    %1023 = arith.mulf %1021, %1004 : vector<2x32xf32>
    %1024 = arith.mulf %1020, %1019 : vector<2x32xf32>
    %1025 = arith.addf %1023, %1024 : vector<2x32xf32>
    %1026 = math.tanh %1025 : vector<2x32xf32>
    %1027 = arith.mulf %1022, %1026 : vector<2x32xf32>
    %c4_i32_412 = arith.constant 4 : i32
    %1028 = arith.index_cast %c4_i32_412 : i32 to index
    %c0_413 = arith.constant 0 : index
    %c0_414 = arith.constant 0 : index
    %1029 = vector.load %arg22[%1028, %c0_413, %c0_414] : memref<8x2x128xf32, #tpu.memory_space<vmem>>, vector<1x2x128xf32>
    %1030 = vector.shape_cast %1029 : vector<1x2x128xf32> to vector<2x128xf32>
    %cst_415 = arith.constant dense<0.000000e+00> : vector<2x128xf32>
    %1031 = tpu.matmul %1027, %862, %cst_415 {dimension_numbers = #tpu.dot_dimension_numbers<[1], [0], [0], [1], [0, 0, 1, 1], [], []>} : vector<2x32xf32>, vector<32x128xf32>, vector<2x128xf32> -> vector<2x128xf32>
    %1032 = arith.addf %1030, %1031 : vector<2x128xf32>
    %1033 = vector.extract_strided_slice %1032 {offsets = [0, 0], sizes = [2, 96], strides = [1, 1]} : vector<2x128xf32> to vector<2x96xf32>
    %1034 = arith.negf %1033 : vector<2x96xf32>
    %1035 = math.exp %1034 : vector<2x96xf32>
    %cst_416 = arith.constant 1.000000e+00 : f32
    %1036 = vector.broadcast %cst_416 : f32 to vector<2x96xf32>
    %1037 = arith.addf %1036, %1035 : vector<2x96xf32>
    %1038 = arith.divf %1036, %1037 : vector<2x96xf32>
    %1039 = vector.extract_strided_slice %1032 {offsets = [0, 96], sizes = [2, 32], strides = [1, 1]} : vector<2x128xf32> to vector<2x32xf32>
    %1040 = math.tanh %1039 : vector<2x32xf32>
    %1041 = vector.extract_strided_slice %1038 {offsets = [0, 0], sizes = [2, 32], strides = [1, 1]} : vector<2x96xf32> to vector<2x32xf32>
    %1042 = vector.extract_strided_slice %1038 {offsets = [0, 32], sizes = [2, 32], strides = [1, 1]} : vector<2x96xf32> to vector<2x32xf32>
    %1043 = vector.extract_strided_slice %1038 {offsets = [0, 64], sizes = [2, 32], strides = [1, 1]} : vector<2x96xf32> to vector<2x32xf32>
    %1044 = arith.mulf %1042, %1025 : vector<2x32xf32>
    %1045 = arith.mulf %1041, %1040 : vector<2x32xf32>
    %1046 = arith.addf %1044, %1045 : vector<2x32xf32>
    %1047 = math.tanh %1046 : vector<2x32xf32>
    %1048 = arith.mulf %1043, %1047 : vector<2x32xf32>
    %c5_i32_417 = arith.constant 5 : i32
    %1049 = arith.index_cast %c5_i32_417 : i32 to index
    %c0_418 = arith.constant 0 : index
    %c0_419 = arith.constant 0 : index
    %1050 = vector.load %arg22[%1049, %c0_418, %c0_419] : memref<8x2x128xf32, #tpu.memory_space<vmem>>, vector<1x2x128xf32>
    %1051 = vector.shape_cast %1050 : vector<1x2x128xf32> to vector<2x128xf32>
    %cst_420 = arith.constant dense<0.000000e+00> : vector<2x128xf32>
    %1052 = tpu.matmul %1048, %862, %cst_420 {dimension_numbers = #tpu.dot_dimension_numbers<[1], [0], [0], [1], [0, 0, 1, 1], [], []>} : vector<2x32xf32>, vector<32x128xf32>, vector<2x128xf32> -> vector<2x128xf32>
    %1053 = arith.addf %1051, %1052 : vector<2x128xf32>
    %1054 = vector.extract_strided_slice %1053 {offsets = [0, 0], sizes = [2, 96], strides = [1, 1]} : vector<2x128xf32> to vector<2x96xf32>
    %1055 = arith.negf %1054 : vector<2x96xf32>
    %1056 = math.exp %1055 : vector<2x96xf32>
    %cst_421 = arith.constant 1.000000e+00 : f32
    %1057 = vector.broadcast %cst_421 : f32 to vector<2x96xf32>
    %1058 = arith.addf %1057, %1056 : vector<2x96xf32>
    %1059 = arith.divf %1057, %1058 : vector<2x96xf32>
    %1060 = vector.extract_strided_slice %1053 {offsets = [0, 96], sizes = [2, 32], strides = [1, 1]} : vector<2x128xf32> to vector<2x32xf32>
    %1061 = math.tanh %1060 : vector<2x32xf32>
    %1062 = vector.extract_strided_slice %1059 {offsets = [0, 0], sizes = [2, 32], strides = [1, 1]} : vector<2x96xf32> to vector<2x32xf32>
    %1063 = vector.extract_strided_slice %1059 {offsets = [0, 32], sizes = [2, 32], strides = [1, 1]} : vector<2x96xf32> to vector<2x32xf32>
    %1064 = vector.extract_strided_slice %1059 {offsets = [0, 64], sizes = [2, 32], strides = [1, 1]} : vector<2x96xf32> to vector<2x32xf32>
    %1065 = arith.mulf %1063, %1046 : vector<2x32xf32>
    %1066 = arith.mulf %1062, %1061 : vector<2x32xf32>
    %1067 = arith.addf %1065, %1066 : vector<2x32xf32>
    %1068 = math.tanh %1067 : vector<2x32xf32>
    %1069 = arith.mulf %1064, %1068 : vector<2x32xf32>
    %c6_i32_422 = arith.constant 6 : i32
    %1070 = arith.index_cast %c6_i32_422 : i32 to index
    %c0_423 = arith.constant 0 : index
    %c0_424 = arith.constant 0 : index
    %1071 = vector.load %arg22[%1070, %c0_423, %c0_424] : memref<8x2x128xf32, #tpu.memory_space<vmem>>, vector<1x2x128xf32>
    %1072 = vector.shape_cast %1071 : vector<1x2x128xf32> to vector<2x128xf32>
    %cst_425 = arith.constant dense<0.000000e+00> : vector<2x128xf32>
    %1073 = tpu.matmul %1069, %862, %cst_425 {dimension_numbers = #tpu.dot_dimension_numbers<[1], [0], [0], [1], [0, 0, 1, 1], [], []>} : vector<2x32xf32>, vector<32x128xf32>, vector<2x128xf32> -> vector<2x128xf32>
    %1074 = arith.addf %1072, %1073 : vector<2x128xf32>
    %1075 = vector.extract_strided_slice %1074 {offsets = [0, 0], sizes = [2, 96], strides = [1, 1]} : vector<2x128xf32> to vector<2x96xf32>
    %1076 = arith.negf %1075 : vector<2x96xf32>
    %1077 = math.exp %1076 : vector<2x96xf32>
    %cst_426 = arith.constant 1.000000e+00 : f32
    %1078 = vector.broadcast %cst_426 : f32 to vector<2x96xf32>
    %1079 = arith.addf %1078, %1077 : vector<2x96xf32>
    %1080 = arith.divf %1078, %1079 : vector<2x96xf32>
    %1081 = vector.extract_strided_slice %1074 {offsets = [0, 96], sizes = [2, 32], strides = [1, 1]} : vector<2x128xf32> to vector<2x32xf32>
    %1082 = math.tanh %1081 : vector<2x32xf32>
    %1083 = vector.extract_strided_slice %1080 {offsets = [0, 0], sizes = [2, 32], strides = [1, 1]} : vector<2x96xf32> to vector<2x32xf32>
    %1084 = vector.extract_strided_slice %1080 {offsets = [0, 32], sizes = [2, 32], strides = [1, 1]} : vector<2x96xf32> to vector<2x32xf32>
    %1085 = vector.extract_strided_slice %1080 {offsets = [0, 64], sizes = [2, 32], strides = [1, 1]} : vector<2x96xf32> to vector<2x32xf32>
    %1086 = arith.mulf %1084, %1067 : vector<2x32xf32>
    %1087 = arith.mulf %1083, %1082 : vector<2x32xf32>
    %1088 = arith.addf %1086, %1087 : vector<2x32xf32>
    %1089 = math.tanh %1088 : vector<2x32xf32>
    %1090 = arith.mulf %1085, %1089 : vector<2x32xf32>
    %c7_i32_427 = arith.constant 7 : i32
    %1091 = arith.index_cast %c7_i32_427 : i32 to index
    %c0_428 = arith.constant 0 : index
    %c0_429 = arith.constant 0 : index
    %1092 = vector.load %arg22[%1091, %c0_428, %c0_429] : memref<8x2x128xf32, #tpu.memory_space<vmem>>, vector<1x2x128xf32>
    %1093 = vector.shape_cast %1092 : vector<1x2x128xf32> to vector<2x128xf32>
    %cst_430 = arith.constant dense<0.000000e+00> : vector<2x128xf32>
    %1094 = tpu.matmul %1090, %862, %cst_430 {dimension_numbers = #tpu.dot_dimension_numbers<[1], [0], [0], [1], [0, 0, 1, 1], [], []>} : vector<2x32xf32>, vector<32x128xf32>, vector<2x128xf32> -> vector<2x128xf32>
    %1095 = arith.addf %1093, %1094 : vector<2x128xf32>
    %1096 = vector.extract_strided_slice %1095 {offsets = [0, 0], sizes = [2, 96], strides = [1, 1]} : vector<2x128xf32> to vector<2x96xf32>
    %1097 = arith.negf %1096 : vector<2x96xf32>
    %1098 = math.exp %1097 : vector<2x96xf32>
    %cst_431 = arith.constant 1.000000e+00 : f32
    %1099 = vector.broadcast %cst_431 : f32 to vector<2x96xf32>
    %1100 = arith.addf %1099, %1098 : vector<2x96xf32>
    %1101 = arith.divf %1099, %1100 : vector<2x96xf32>
    %1102 = vector.extract_strided_slice %1095 {offsets = [0, 96], sizes = [2, 32], strides = [1, 1]} : vector<2x128xf32> to vector<2x32xf32>
    %1103 = math.tanh %1102 : vector<2x32xf32>
    %1104 = vector.extract_strided_slice %1101 {offsets = [0, 0], sizes = [2, 32], strides = [1, 1]} : vector<2x96xf32> to vector<2x32xf32>
    %1105 = vector.extract_strided_slice %1101 {offsets = [0, 32], sizes = [2, 32], strides = [1, 1]} : vector<2x96xf32> to vector<2x32xf32>
    %1106 = vector.extract_strided_slice %1101 {offsets = [0, 64], sizes = [2, 32], strides = [1, 1]} : vector<2x96xf32> to vector<2x32xf32>
    %1107 = arith.mulf %1105, %1088 : vector<2x32xf32>
    %1108 = arith.mulf %1104, %1103 : vector<2x32xf32>
    %1109 = arith.addf %1107, %1108 : vector<2x32xf32>
    %1110 = math.tanh %1109 : vector<2x32xf32>
    %1111 = arith.mulf %1106, %1110 : vector<2x32xf32>
    %c8_i32_432 = arith.constant 8 : i32
    %c0_433 = arith.constant 0 : index
    %c0_434 = arith.constant 0 : index
    %1112 = vector.load %arg17[%c0_433, %c0_434] : memref<32x10xf32, #tpu.memory_space<vmem>>, vector<32x10xf32>
    %cst_435 = arith.constant dense<0.000000e+00> : vector<2x10xf32>
    %1113 = tpu.matmul %1111, %1112, %cst_435 {dimension_numbers = #tpu.dot_dimension_numbers<[1], [0], [0], [1], [0, 0, 1, 1], [], []>} : vector<2x32xf32>, vector<32x10xf32>, vector<2x10xf32> -> vector<2x10xf32>
    %c0_436 = arith.constant 0 : index
    %c0_437 = arith.constant 0 : index
    %1114 = vector.load %arg18[%c0_436, %c0_437] : memref<1x10xf32, #tpu.memory_space<vmem>>, vector<1x10xf32>
    %1115 = vector.broadcast %1114 : vector<1x10xf32> to vector<2x10xf32>
    %1116 = arith.addf %1113, %1115 : vector<2x10xf32>
    %c0_438 = arith.constant 0 : index
    %c0_439 = arith.constant 0 : index
    %1117 = vector.load %arg19[%c0_438, %c0_439] : memref<2x10xf32, #tpu.memory_space<vmem>>, vector<2x10xf32>
    tpu.vector_store %arg19[%c0_438, %c0_439], %1116 {strides = array<i32>} : memref<2x10xf32, #tpu.memory_space<vmem>>, vector<2x10xf32>,
    %cst_440 = arith.constant 0.000000e+00 : f32
    %1118 = vector.broadcast %cst_440 : f32 to vector<1x1xf32>
    %c0_441 = arith.constant 0 : index
    %c0_442 = arith.constant 0 : index
    %1119 = vector.load %arg1[%c0_441, %c0_442] : memref<16x128xf32, #tpu.memory_space<vmem>>, vector<16x128xf32>
    %1120 = arith.mulf %1119, %1119 : vector<16x128xf32>
    %1121 = vector.shape_cast %1120 : vector<16x128xf32> to vector<1x16x128xf32>
    %cst_443 = arith.constant dense<0.000000e+00> : vector<1xf32>
    %1122 = vector.multi_reduction <add>, %1121, %cst_443 [1, 2] : vector<1x16x128xf32> to vector<1xf32>
    %1123 = vector.shape_cast %1122 : vector<1xf32> to vector<1x1x1xf32>
    %1124 = vector.extract %1123[0, 0, 0] : f32 from vector<1x1x1xf32>
    %1125 = vector.broadcast %1124 : f32 to vector<1x1xf32>
    %1126 = math.sqrt %1125 : vector<1x1xf32>
    %1127 = arith.addf %1118, %1126 : vector<1x1xf32>
    %c0_444 = arith.constant 0 : index
    %c0_445 = arith.constant 0 : index
    %1128 = vector.load %arg2[%c0_444, %c0_445] : memref<32x128xf32, #tpu.memory_space<vmem>>, vector<32x128xf32>
    %1129 = arith.mulf %1128, %1128 : vector<32x128xf32>
    %1130 = vector.shape_cast %1129 : vector<32x128xf32> to vector<1x32x128xf32>
    %cst_446 = arith.constant dense<0.000000e+00> : vector<1xf32>
    %1131 = vector.multi_reduction <add>, %1130, %cst_446 [1, 2] : vector<1x32x128xf32> to vector<1xf32>
    %1132 = vector.shape_cast %1131 : vector<1xf32> to vector<1x1x1xf32>
    %1133 = vector.extract %1132[0, 0, 0] : f32 from vector<1x1x1xf32>
    %1134 = vector.broadcast %1133 : f32 to vector<1x1xf32>
    %1135 = math.sqrt %1134 : vector<1x1xf32>
    %1136 = arith.addf %1127, %1135 : vector<1x1xf32>
    %c0_447 = arith.constant 0 : index
    %c0_448 = arith.constant 0 : index
    %1137 = vector.load %arg3[%c0_447, %c0_448] : memref<1x128xf32, #tpu.memory_space<vmem>>, vector<1x128xf32>
    %1138 = arith.mulf %1137, %1137 : vector<1x128xf32>
    %1139 = vector.shape_cast %1138 : vector<1x128xf32> to vector<1x1x128xf32>
    %cst_449 = arith.constant dense<0.000000e+00> : vector<1xf32>
    %1140 = vector.multi_reduction <add>, %1139, %cst_449 [1, 2] : vector<1x1x128xf32> to vector<1xf32>
    %1141 = vector.shape_cast %1140 : vector<1xf32> to vector<1x1x1xf32>
    %1142 = vector.extract %1141[0, 0, 0] : f32 from vector<1x1x1xf32>
    %1143 = vector.broadcast %1142 : f32 to vector<1x1xf32>
    %1144 = math.sqrt %1143 : vector<1x1xf32>
    %1145 = arith.addf %1136, %1144 : vector<1x1xf32>
    %c0_450 = arith.constant 0 : index
    %c0_451 = arith.constant 0 : index
    %1146 = vector.load %arg4[%c0_450, %c0_451] : memref<1x128xf32, #tpu.memory_space<vmem>>, vector<1x128xf32>
    %1147 = arith.mulf %1146, %1146 : vector<1x128xf32>
    %1148 = vector.shape_cast %1147 : vector<1x128xf32> to vector<1x1x128xf32>
    %cst_452 = arith.constant dense<0.000000e+00> : vector<1xf32>
    %1149 = vector.multi_reduction <add>, %1148, %cst_452 [1, 2] : vector<1x1x128xf32> to vector<1xf32>
    %1150 = vector.shape_cast %1149 : vector<1xf32> to vector<1x1x1xf32>
    %1151 = vector.extract %1150[0, 0, 0] : f32 from vector<1x1x1xf32>
    %1152 = vector.broadcast %1151 : f32 to vector<1x1xf32>
    %1153 = math.sqrt %1152 : vector<1x1xf32>
    %1154 = arith.addf %1145, %1153 : vector<1x1xf32>
    %c0_453 = arith.constant 0 : index
    %c0_454 = arith.constant 0 : index
    %1155 = vector.load %arg5[%c0_453, %c0_454] : memref<32x128xf32, #tpu.memory_space<vmem>>, vector<32x128xf32>
    %1156 = arith.mulf %1155, %1155 : vector<32x128xf32>
    %1157 = vector.shape_cast %1156 : vector<32x128xf32> to vector<1x32x128xf32>
    %cst_455 = arith.constant dense<0.000000e+00> : vector<1xf32>
    %1158 = vector.multi_reduction <add>, %1157, %cst_455 [1, 2] : vector<1x32x128xf32> to vector<1xf32>
    %1159 = vector.shape_cast %1158 : vector<1xf32> to vector<1x1x1xf32>
    %1160 = vector.extract %1159[0, 0, 0] : f32 from vector<1x1x1xf32>
    %1161 = vector.broadcast %1160 : f32 to vector<1x1xf32>
    %1162 = math.sqrt %1161 : vector<1x1xf32>
    %1163 = arith.addf %1154, %1162 : vector<1x1xf32>
    %c0_456 = arith.constant 0 : index
    %c0_457 = arith.constant 0 : index
    %1164 = vector.load %arg6[%c0_456, %c0_457] : memref<32x128xf32, #tpu.memory_space<vmem>>, vector<32x128xf32>
    %1165 = arith.mulf %1164, %1164 : vector<32x128xf32>
    %1166 = vector.shape_cast %1165 : vector<32x128xf32> to vector<1x32x128xf32>
    %cst_458 = arith.constant dense<0.000000e+00> : vector<1xf32>
    %1167 = vector.multi_reduction <add>, %1166, %cst_458 [1, 2] : vector<1x32x128xf32> to vector<1xf32>
    %1168 = vector.shape_cast %1167 : vector<1xf32> to vector<1x1x1xf32>
    %1169 = vector.extract %1168[0, 0, 0] : f32 from vector<1x1x1xf32>
    %1170 = vector.broadcast %1169 : f32 to vector<1x1xf32>
    %1171 = math.sqrt %1170 : vector<1x1xf32>
    %1172 = arith.addf %1163, %1171 : vector<1x1xf32>
    %c0_459 = arith.constant 0 : index
    %c0_460 = arith.constant 0 : index
    %1173 = vector.load %arg7[%c0_459, %c0_460] : memref<1x128xf32, #tpu.memory_space<vmem>>, vector<1x128xf32>
    %1174 = arith.mulf %1173, %1173 : vector<1x128xf32>
    %1175 = vector.shape_cast %1174 : vector<1x128xf32> to vector<1x1x128xf32>
    %cst_461 = arith.constant dense<0.000000e+00> : vector<1xf32>
    %1176 = vector.multi_reduction <add>, %1175, %cst_461 [1, 2] : vector<1x1x128xf32> to vector<1xf32>
    %1177 = vector.shape_cast %1176 : vector<1xf32> to vector<1x1x1xf32>
    %1178 = vector.extract %1177[0, 0, 0] : f32 from vector<1x1x1xf32>
    %1179 = vector.broadcast %1178 : f32 to vector<1x1xf32>
    %1180 = math.sqrt %1179 : vector<1x1xf32>
    %1181 = arith.addf %1172, %1180 : vector<1x1xf32>
    %c0_462 = arith.constant 0 : index
    %c0_463 = arith.constant 0 : index
    %1182 = vector.load %arg8[%c0_462, %c0_463] : memref<1x128xf32, #tpu.memory_space<vmem>>, vector<1x128xf32>
    %1183 = arith.mulf %1182, %1182 : vector<1x128xf32>
    %1184 = vector.shape_cast %1183 : vector<1x128xf32> to vector<1x1x128xf32>
    %cst_464 = arith.constant dense<0.000000e+00> : vector<1xf32>
    %1185 = vector.multi_reduction <add>, %1184, %cst_464 [1, 2] : vector<1x1x128xf32> to vector<1xf32>
    %1186 = vector.shape_cast %1185 : vector<1xf32> to vector<1x1x1xf32>
    %1187 = vector.extract %1186[0, 0, 0] : f32 from vector<1x1x1xf32>
    %1188 = vector.broadcast %1187 : f32 to vector<1x1xf32>
    %1189 = math.sqrt %1188 : vector<1x1xf32>
    %1190 = arith.addf %1181, %1189 : vector<1x1xf32>
    %c0_465 = arith.constant 0 : index
    %c0_466 = arith.constant 0 : index
    %1191 = vector.load %arg9[%c0_465, %c0_466] : memref<32x128xf32, #tpu.memory_space<vmem>>, vector<32x128xf32>
    %1192 = arith.mulf %1191, %1191 : vector<32x128xf32>
    %1193 = vector.shape_cast %1192 : vector<32x128xf32> to vector<1x32x128xf32>
    %cst_467 = arith.constant dense<0.000000e+00> : vector<1xf32>
    %1194 = vector.multi_reduction <add>, %1193, %cst_467 [1, 2] : vector<1x32x128xf32> to vector<1xf32>
    %1195 = vector.shape_cast %1194 : vector<1xf32> to vector<1x1x1xf32>
    %1196 = vector.extract %1195[0, 0, 0] : f32 from vector<1x1x1xf32>
    %1197 = vector.broadcast %1196 : f32 to vector<1x1xf32>
    %1198 = math.sqrt %1197 : vector<1x1xf32>
    %1199 = arith.addf %1190, %1198 : vector<1x1xf32>
    %c0_468 = arith.constant 0 : index
    %c0_469 = arith.constant 0 : index
    %1200 = vector.load %arg10[%c0_468, %c0_469] : memref<32x128xf32, #tpu.memory_space<vmem>>, vector<32x128xf32>
    %1201 = arith.mulf %1200, %1200 : vector<32x128xf32>
    %1202 = vector.shape_cast %1201 : vector<32x128xf32> to vector<1x32x128xf32>
    %cst_470 = arith.constant dense<0.000000e+00> : vector<1xf32>
    %1203 = vector.multi_reduction <add>, %1202, %cst_470 [1, 2] : vector<1x32x128xf32> to vector<1xf32>
    %1204 = vector.shape_cast %1203 : vector<1xf32> to vector<1x1x1xf32>
    %1205 = vector.extract %1204[0, 0, 0] : f32 from vector<1x1x1xf32>
    %1206 = vector.broadcast %1205 : f32 to vector<1x1xf32>
    %1207 = math.sqrt %1206 : vector<1x1xf32>
    %1208 = arith.addf %1199, %1207 : vector<1x1xf32>
    %c0_471 = arith.constant 0 : index
    %c0_472 = arith.constant 0 : index
    %1209 = vector.load %arg11[%c0_471, %c0_472] : memref<1x128xf32, #tpu.memory_space<vmem>>, vector<1x128xf32>
    %1210 = arith.mulf %1209, %1209 : vector<1x128xf32>
    %1211 = vector.shape_cast %1210 : vector<1x128xf32> to vector<1x1x128xf32>
    %cst_473 = arith.constant dense<0.000000e+00> : vector<1xf32>
    %1212 = vector.multi_reduction <add>, %1211, %cst_473 [1, 2] : vector<1x1x128xf32> to vector<1xf32>
    %1213 = vector.shape_cast %1212 : vector<1xf32> to vector<1x1x1xf32>
    %1214 = vector.extract %1213[0, 0, 0] : f32 from vector<1x1x1xf32>
    %1215 = vector.broadcast %1214 : f32 to vector<1x1xf32>
    %1216 = math.sqrt %1215 : vector<1x1xf32>
    %1217 = arith.addf %1208, %1216 : vector<1x1xf32>
    %c0_474 = arith.constant 0 : index
    %c0_475 = arith.constant 0 : index
    %1218 = vector.load %arg12[%c0_474, %c0_475] : memref<1x128xf32, #tpu.memory_space<vmem>>, vector<1x128xf32>
    %1219 = arith.mulf %1218, %1218 : vector<1x128xf32>
    %1220 = vector.shape_cast %1219 : vector<1x128xf32> to vector<1x1x128xf32>
    %cst_476 = arith.constant dense<0.000000e+00> : vector<1xf32>
    %1221 = vector.multi_reduction <add>, %1220, %cst_476 [1, 2] : vector<1x1x128xf32> to vector<1xf32>
    %1222 = vector.shape_cast %1221 : vector<1xf32> to vector<1x1x1xf32>
    %1223 = vector.extract %1222[0, 0, 0] : f32 from vector<1x1x1xf32>
    %1224 = vector.broadcast %1223 : f32 to vector<1x1xf32>
    %1225 = math.sqrt %1224 : vector<1x1xf32>
    %1226 = arith.addf %1217, %1225 : vector<1x1xf32>
    %c0_477 = arith.constant 0 : index
    %c0_478 = arith.constant 0 : index
    %1227 = vector.load %arg13[%c0_477, %c0_478] : memref<32x128xf32, #tpu.memory_space<vmem>>, vector<32x128xf32>
    %1228 = arith.mulf %1227, %1227 : vector<32x128xf32>
    %1229 = vector.shape_cast %1228 : vector<32x128xf32> to vector<1x32x128xf32>
    %cst_479 = arith.constant dense<0.000000e+00> : vector<1xf32>
    %1230 = vector.multi_reduction <add>, %1229, %cst_479 [1, 2] : vector<1x32x128xf32> to vector<1xf32>
    %1231 = vector.shape_cast %1230 : vector<1xf32> to vector<1x1x1xf32>
    %1232 = vector.extract %1231[0, 0, 0] : f32 from vector<1x1x1xf32>
    %1233 = vector.broadcast %1232 : f32 to vector<1x1xf32>
    %1234 = math.sqrt %1233 : vector<1x1xf32>
    %1235 = arith.addf %1226, %1234 : vector<1x1xf32>
    %c0_480 = arith.constant 0 : index
    %c0_481 = arith.constant 0 : index
    %1236 = vector.load %arg14[%c0_480, %c0_481] : memref<32x128xf32, #tpu.memory_space<vmem>>, vector<32x128xf32>
    %1237 = arith.mulf %1236, %1236 : vector<32x128xf32>
    %1238 = vector.shape_cast %1237 : vector<32x128xf32> to vector<1x32x128xf32>
    %cst_482 = arith.constant dense<0.000000e+00> : vector<1xf32>
    %1239 = vector.multi_reduction <add>, %1238, %cst_482 [1, 2] : vector<1x32x128xf32> to vector<1xf32>
    %1240 = vector.shape_cast %1239 : vector<1xf32> to vector<1x1x1xf32>
    %1241 = vector.extract %1240[0, 0, 0] : f32 from vector<1x1x1xf32>
    %1242 = vector.broadcast %1241 : f32 to vector<1x1xf32>
    %1243 = math.sqrt %1242 : vector<1x1xf32>
    %1244 = arith.addf %1235, %1243 : vector<1x1xf32>
    %c0_483 = arith.constant 0 : index
    %c0_484 = arith.constant 0 : index
    %1245 = vector.load %arg15[%c0_483, %c0_484] : memref<1x128xf32, #tpu.memory_space<vmem>>, vector<1x128xf32>
    %1246 = arith.mulf %1245, %1245 : vector<1x128xf32>
    %1247 = vector.shape_cast %1246 : vector<1x128xf32> to vector<1x1x128xf32>
    %cst_485 = arith.constant dense<0.000000e+00> : vector<1xf32>
    %1248 = vector.multi_reduction <add>, %1247, %cst_485 [1, 2] : vector<1x1x128xf32> to vector<1xf32>
    %1249 = vector.shape_cast %1248 : vector<1xf32> to vector<1x1x1xf32>
    %1250 = vector.extract %1249[0, 0, 0] : f32 from vector<1x1x1xf32>
    %1251 = vector.broadcast %1250 : f32 to vector<1x1xf32>
    %1252 = math.sqrt %1251 : vector<1x1xf32>
    %1253 = arith.addf %1244, %1252 : vector<1x1xf32>
    %c0_486 = arith.constant 0 : index
    %c0_487 = arith.constant 0 : index
    %1254 = vector.load %arg16[%c0_486, %c0_487] : memref<1x128xf32, #tpu.memory_space<vmem>>, vector<1x128xf32>
    %1255 = arith.mulf %1254, %1254 : vector<1x128xf32>
    %1256 = vector.shape_cast %1255 : vector<1x128xf32> to vector<1x1x128xf32>
    %cst_488 = arith.constant dense<0.000000e+00> : vector<1xf32>
    %1257 = vector.multi_reduction <add>, %1256, %cst_488 [1, 2] : vector<1x1x128xf32> to vector<1xf32>
    %1258 = vector.shape_cast %1257 : vector<1xf32> to vector<1x1x1xf32>
    %1259 = vector.extract %1258[0, 0, 0] : f32 from vector<1x1x1xf32>
    %1260 = vector.broadcast %1259 : f32 to vector<1x1xf32>
    %1261 = math.sqrt %1260 : vector<1x1xf32>
    %1262 = arith.addf %1253, %1261 : vector<1x1xf32>
    %c0_489 = arith.constant 0 : index
    %c0_490 = arith.constant 0 : index
    %1263 = vector.load %arg17[%c0_489, %c0_490] : memref<32x10xf32, #tpu.memory_space<vmem>>, vector<32x10xf32>
    %1264 = arith.mulf %1263, %1263 : vector<32x10xf32>
    %1265 = vector.shape_cast %1264 : vector<32x10xf32> to vector<1x32x10xf32>
    %cst_491 = arith.constant dense<0.000000e+00> : vector<1xf32>
    %1266 = vector.multi_reduction <add>, %1265, %cst_491 [1, 2] : vector<1x32x10xf32> to vector<1xf32>
    %1267 = vector.shape_cast %1266 : vector<1xf32> to vector<1x1x1xf32>
    %1268 = vector.extract %1267[0, 0, 0] : f32 from vector<1x1x1xf32>
    %1269 = vector.broadcast %1268 : f32 to vector<1x1xf32>
    %1270 = math.sqrt %1269 : vector<1x1xf32>
    %1271 = arith.addf %1262, %1270 : vector<1x1xf32>
    %c0_492 = arith.constant 0 : index
    %c0_493 = arith.constant 0 : index
    %1272 = vector.load %arg18[%c0_492, %c0_493] : memref<1x10xf32, #tpu.memory_space<vmem>>, vector<1x10xf32>
    %1273 = arith.mulf %1272, %1272 : vector<1x10xf32>
    %1274 = vector.shape_cast %1273 : vector<1x10xf32> to vector<1x1x10xf32>
    %cst_494 = arith.constant dense<0.000000e+00> : vector<1xf32>
    %1275 = vector.multi_reduction <add>, %1274, %cst_494 [1, 2] : vector<1x1x10xf32> to vector<1xf32>
    %1276 = vector.shape_cast %1275 : vector<1xf32> to vector<1x1x1xf32>
    %1277 = vector.extract %1276[0, 0, 0] : f32 from vector<1x1x1xf32>
    %1278 = vector.broadcast %1277 : f32 to vector<1x1xf32>
    %1279 = math.sqrt %1278 : vector<1x1xf32>
    %1280 = arith.addf %1271, %1279 : vector<1x1xf32>
    %cst_495 = arith.constant 0.00999999977 : f32
    %1281 = vector.broadcast %cst_495 : f32 to vector<1x1xf32>
    %1282 = arith.mulf %1280, %1281 : vector<1x1xf32>
    %c0_496 = arith.constant 0 : index
    %c0_497 = arith.constant 0 : index
    %1283 = vector.load %arg20[%c0_496, %c0_497] : memref<1x1xf32, #tpu.memory_space<vmem>>, vector<1x1xf32>
    tpu.vector_store %arg20[%c0_496, %c0_497], %1282 {strides = array<i32>} : memref<1x1xf32, #tpu.memory_space<vmem>>, vector<1x1xf32>,
    return
  }
}

</mosaic_0001>

<bundles_post_ra>
// kernel: lstm_model_forward.1
= control target key start
LH: loop header
LB: loop body
LE: loop exit
PB: predicated region body
PF: predicated region fallthrough
CT: control target
= control target key end

     0   :  { %s9498_s0 = inlined_call_operand.vmem [shape: f32[8,2,16], index: 0, kind: input, shape index: {}]   ;;  %s9499_s1 = inlined_call_operand.vmem [shape: f32[16,128], index: 1, kind: input, shape index: {}]   ;;  %s9500_s2 = inlined_call_operand.vmem [shape: f32[32,128], index: 2, kind: input, shape index: {}]   ;;  %s9501_s3 = inlined_call_operand.vmem [shape: f32[1,128], index: 3, kind: input, shape index: {}]   ;;  %s9502_s4 = inlined_call_operand.vmem [shape: f32[1,128], index: 4, kind: input, shape index: {}]   ;;  %s9503_s5 = inlined_call_operand.vmem [shape: f32[32,128], index: 5, kind: input, shape index: {}]   ;;  %s9504_s6 = inlined_call_operand.vmem [shape: f32[32,128], index: 6, kind: input, shape index: {}]   ;;  %s9505_s7 = inlined_call_operand.vmem [shape: f32[1,128], index: 7, kind: input, shape index: {}]   ;;  %s9506_s8 = inlined_call_operand.vmem [shape: f32[1,128], index: 8, kind: input, shape index: {}]   ;;  %s9507_s9 = inlined_call_operand.vmem [shape: f32[32,128], index: 9, kind: input, shape index: {}]   ;;  %s9508_s10 = inlined_call_operand.vmem [shape: f32[32,128], index: 10, kind: input, shape index: {}]   ;;  %s9509_s11 = inlined_call_operand.vmem [shape: f32[1,128], index: 11, kind: input, shape index: {}]   ;;  %s9510_s12 = inlined_call_operand.vmem [shape: f32[1,128], index: 12, kind: input, shape index: {}]   ;;  %s9511_s13 = inlined_call_operand.vmem [shape: f32[32,128], index: 13, kind: input, shape index: {}]   ;;  %s9512_s14 = inlined_call_operand.vmem [shape: f32[32,128], index: 14, kind: input, shape index: {}]   ;;  %s9513_s15 = inlined_call_operand.vmem [shape: f32[1,128], index: 15, kind: input, shape index: {}]   ;;  %s9514_s16 = inlined_call_operand.vmem [shape: f32[1,128], index: 16, kind: input, shape index: {}]   ;;  %s9515_s17 = inlined_call_operand.vmem [shape: f32[32,10], index: 17, kind: input, shape index: {}]   ;;  %s9516_s18 = inlined_call_operand.vmem [shape: f32[1,10], index: 18, kind: input, shape index: {}]   ;;  %s9517_s19 = inlined_call_operand.hbm [shape: f32[2,10], index: 19, kind: output, shape index: {0}]   ;;  %s9518_s20 = inlined_call_operand.hbm [shape: f32[1,1], index: 20, kind: output, shape index: {1}]  }
   0x1   :  { %9524 = sst [smem:[#allocation10_spill]] %s9498_s0 }
   0x2   :  { %9525 = sst [smem:[#allocation11_spill]] %s9499_s1 }
   0x3   :  { %9526 = sst [smem:[#allocation12_spill]] %s9500_s2 }
   0x4   :  { %9527 = sst [smem:[#allocation13_spill]] %s9501_s3 }
   0x5   :  { %9528 = sst [smem:[#allocation14_spill]] %s9502_s4 }
   0x6   :  { %26 = vsyncpa [#allocation5], 0  ;;  %s9529_s23 = sld [smem:[#allocation11_spill]]  ;;  %v8244_v2 = vmov 0.0|0.0   ;;  %vm8245_vm0 = vmmov 0   ;;  %v8246_v4 = vmov 0.0  }
   0x7   :  { %7497 = vmatprep.subr.bf16.mxu0 %v8244_v2  ;;  %6826 = vmatprep.mubr.msk.f32.mxu0 %vm8245_vm0, %v8246_v4  ;;  %vm82_vm1 = vcmask 130048   ;;  %s9530_s26 = sld [smem:[#allocation10_spill]] }
   0x8   :  { %7491 = vmatprep.subr.bf16.mxu1 %v8244_v2  ;;  %6812 = vmatprep.mubr.msk.f32.mxu1 %vm8245_vm0, %v8246_v4 }
   0xc   :  { %v69_v0 = vld [vmem:[%s9529_s23] sm:$0xff]  ;;  %v70_v1 = vld [vmem:[%s9529_s23 + $0x8] sm:$0xff] }
   0xd   :  { %v8363_v3 = vpack.c.bf16 %v70_v1, %v69_v0  ;;  %v6401_v5 = vld [vmem:[%s9530_s26 + $0x4] sm:$0x3]  ;;  %v75_v6 = vld [vmem:[%s9530_s26] sm:$0x3] }
   0xf   :  { %7499 = vmatpush3.bf16.msra.mxu0 %v8363_v3  ;;  %7493 = vmatpush3.bf16.msra.mxu1 %v8363_v3 }
  0x10   :  { %7503 = vmatprep.subr.bf16.mxu0 %v8244_v2  ;;  %7494 = vmatprep.subr.bf16.mxu1 %v8244_v2 }
  0x11   :  { %27 = vsyncpa [#allocation7], 0  ;;  %v6405_v7 = vld [vmem:[%s9530_s26 + $0x8] sm:$0x3]  ;;  %s9531_s21 = sld [smem:[#allocation12_spill]]  ;;  %v77_v15 = vlaneseq  ;;  %s9532_s30 = sld [smem:[#allocation13_spill]] }
  0x12   :  { %6827 = vmatmul.mubr.msk.f32.vlgmr.msra.gmra.mrb[0].mxu0 %vm82_vm1, %v6401_v5  ;;  %6813 = vmatmul.mubr.msk.f32.vlgmr.msra.gmra.mrb[0].mxu1 %vm82_vm1, %v75_v6  ;;  %v6409_v10 = vld [vmem:[%s9530_s26 + $0xc] sm:$0x3]  ;;  %s9533_s22 = sld [smem:[#allocation14_spill]]  ;;  %s8247_s24 = smov 32   ;;  %v6399_v48 = vld [vmem:[%s9530_s26 + $0x2] sm:$0x3] }
  0x13   :  { %7505 = vmatpush3.bf16.msra.mxu0 %v8363_v3  ;;  %6840 = vmatprep.mubr.msk.f32.mxu0 %vm8245_vm0, %v8246_v4  ;;  %v78_v16 = vshrl.u32 %v77_v15, 7  ;;  %v6403_v49 = vld [vmem:[%s9530_s26 + $0x6] sm:$0x3]  ;;  %v6407_v50 = vld [vmem:[%s9530_s26 + $0xa] sm:$0x3]  ;;  %vm800_vm2 = vcmask 254976  }
  0x14   :  { %7509 = vmatprep.subr.bf16.mxu0 %v8244_v2  ;;  %7496 = vmatpush3.bf16.msra.mxu1 %v8363_v3  ;;  %v6411_v52 = vld [vmem:[%s9530_s26 + $0xe] sm:$0x3]  ;;  %s8248_s26 = smov 64   ;;  %vm697_vm3 = vcmask 261120   ;;  %vm5970_vm4 = vcmask 1040384   ;;  %vm6319_vm5 = vcmask 80896  }
  0x15   :  { %6819 = vmatprep.mubr.msk.f32.mxu1 %vm8245_vm0, %v8246_v4  ;;  %7500 = vmatprep.subr.bf16.mxu1 %v8244_v2  ;;  %v8437_v20 = vsub.s32 0, %v78_v16  ;;  %vm6347_vm6 = vcmask 73728  }
  0x16   :  { %6841 = vmatmul.mubr.msk.f32.vlgmr.msra.gmra.mrb[2].mxu0 %vm82_vm1, %v6405_v7 }
  0x17   :  { %v71_v8 = vld [vmem:[%s9531_s21] sm:$0xff]  ;;  %v72_v9 = vld [vmem:[%s9531_s21 + $0x8] sm:$0xff]  ;;  %7511 = vmatpush3.bf16.msra.mxu0 %v8363_v3  ;;  %6854 = vmatprep.mubr.msk.f32.mxu0 %vm8245_vm0, %v8246_v4  ;;  %v73_v12 = vld [vmem:[%s9531_s21 + $0x10] sm:$0xff] }
  0x18   :  { %v8406_v11 = vpack.c.bf16 %v72_v9, %v71_v8  ;;  %7515 = vmatprep.subr.bf16.mxu0 %v8244_v2  ;;  %v74_v13 = vld [vmem:[%s9531_s21 + $0x18] sm:$0xff]  ;;  %v66_v17 = vld [vmem:[%s9532_s30] sm:$0x1]  ;;  %6820 = vmatmul.mubr.msk.f32.vlgmr.msra.gmra.mrb[2].mxu1 %vm82_vm1, %v6399_v48 }
  0x19   :  { %v8417_v14 = vpack.c.bf16 %v74_v13, %v73_v12  ;;  %v67_v18 = vld [vmem:[%s9533_s22] sm:$0x1]  ;;  %7502 = vmatpush3.bf16.msra.mxu1 %v8363_v3  ;;  %6833 = vmatprep.mubr.msk.f32.mxu1 %vm8245_vm0, %v8246_v4 }
  0x1a   :  { %6855 = vmatmul.mubr.msk.f32.vlgmr.msra.gmra.mrb[4].mxu0 %vm82_vm1, %v6409_v10  ;;  %v68_v19 = vadd.f32 %v67_v18, %v66_v17  ;;  %7506 = vmatprep.subr.bf16.mxu1 %v8244_v2 }
  0x1b   :  { %7517 = vmatpush3.bf16.msra.mxu0 %v8406_v11  ;;  %6872 = vmatprep.mubr.msk.f32.mxu0 %vm8245_vm0, %v8246_v4 }
  0x1c   :  { %7518 = vmatprep.subr.bf16.mxu0 %v8244_v2  ;;  %v8440_v21 = vrot.slane %v68_v19, %v8437_v20  ;;  %6834 = vmatmul.mubr.msk.f32.vlgmr.msra.gmra.mrb[4].mxu1 %vm82_vm1, %v6403_v49 }
  0x1d   :  { %7508 = vmatpush3.bf16.msra.mxu1 %v8363_v3  ;;  %6847 = vmatprep.mubr.msk.f32.mxu1 %vm8245_vm0, %v8246_v4 }
  0x1e   :  { %7512 = vmatprep.subr.bf16.mxu1 %v8244_v2 }
  0x1f   :  { %7520 = vmatpush3.bf16.msra.mxu0 %v8417_v14 }
  0x20   :  { %7527 = vmatprep.subr.bf16.mxu0 %v8244_v2  ;;  %6848 = vmatmul.mubr.msk.f32.vlgmr.msra.gmra.mrb[6].mxu1 %vm82_vm1, %v6407_v50 }
  0x21   :  { %7514 = vmatpush3.bf16.msra.mxu1 %v8363_v3  ;;  %6861 = vmatprep.mubr.msk.f32.mxu1 %vm8245_vm0, %v8246_v4 }
  0x22   :  { %6873 = vmatmul.mubr.f32.vlgmr.msra.gmra.mrb[6].mxu0 %v8246_v4  ;;  %7521 = vmatprep.subr.bf16.mxu1 %v8244_v2 }
  0x23   :  { %7529 = vmatpush3.bf16.msra.mxu0 %v8406_v11  ;;  %6894 = vmatprep.mubr.msk.f32.mxu0 %vm8245_vm0, %v8246_v4 }
  0x24   :  { %7530 = vmatprep.subr.bf16.mxu0 %v8244_v2  ;;  %6862 = vmatmul.mubr.msk.f32.vlgmr.msra.gmra.mrb[8].mxu1 %vm82_vm1, %v6411_v52 }
  0x25   :  { %7523 = vmatpush3.bf16.msra.mxu1 %v8406_v11  ;;  %6883 = vmatprep.mubr.msk.f32.mxu1 %vm8245_vm0, %v8246_v4 }
  0x26   :  { %7524 = vmatprep.subr.bf16.mxu1 %v8244_v2 }
  0x27   :  { %7532 = vmatpush3.bf16.msra.mxu0 %v8417_v14 }
  0x28   :  { %7539 = vmatprep.subr.bf16.mxu0 %v8244_v2 }
  0x29   :  { %7526 = vmatpush3.bf16.msra.mxu1 %v8417_v14 }
  0x2a   :  { %7533 = vmatprep.subr.bf16.mxu1 %v8244_v2 }
  0xe5   :  { %v305_v22 = vpop.f32.mrb[0].mxu0  ;;  %v152_v23 = vpop.f32.mrb[0].mxu1 }
  0xe6   :  { %v306_v24 = vadd.f32 %v305_v22, %v8440_v21  ;;  %v6828_v25 = vpop.f32.mrb[1].mxu0  ;;  %v153_v26 = vadd.f32 %v152_v23, %v8440_v21  ;;  %v6814_v27 = vpop.f32.mrb[1].mxu1 }
  0xe8   :  { %310 = vst [vmem:[#allocation3 + $0x4] sm:$0x3] %v306_v24  ;;  %156 = vst [vmem:[#allocation3] sm:$0x3] %v153_v26 }
  0xe9   :  { %v459_v28 = vpop.f32.mrb[2].mxu0 }
  0xea   :  { %v460_v29 = vadd.f32 %v459_v28, %v8440_v21  ;;  %v6842_v30 = vpop.f32.mrb[3].mxu0 }
  0xeb   :  { %v228_v55 = vpop.f32.mrb[2].mxu1 }
  0xec   :  { %464 = vst [vmem:[#allocation3 + $0x8] sm:$0x3] %v460_v29  ;;  %v229_v56 = vadd.f32 %v228_v55, %v8440_v21  ;;  %v6821_v57 = vpop.f32.mrb[3].mxu1 }
  0xed   :  { %v613_v31 = vpop.f32.mrb[4].mxu0 }
  0xee   :  { %v614_v32 = vadd.f32 %v613_v31, %v8440_v21  ;;  %v6856_v33 = vpop.f32.mrb[5].mxu0  ;;  %233 = vst [vmem:[#allocation3 + $0x2] sm:$0x3] %v229_v56 }
  0xef   :  { %v696_v34 = vld [vmem:[#allocation3] sm:$0x3]  ;;  %v382_v58 = vpop.f32.mrb[4].mxu1  ;;  %v906_v27 = vld [vmem:[#allocation3 + $0x4] sm:$0x3] }
  0xf0   :  { %618 = vst [vmem:[#allocation3 + $0xc] sm:$0x3] %v614_v32  ;;  %v383_v59 = vadd.f32 %v382_v58, %v8440_v21  ;;  %v6835_v60 = vpop.f32.mrb[5].mxu1 }
  0xf2   :  { %387 = vst [vmem:[#allocation3 + $0x6] sm:$0x3] %v383_v59 }
  0xf3   :  { %v536_v61 = vpop.f32.mrb[6].mxu1 }
  0xf4   :  { %v537_v62 = vadd.f32 %v536_v61, %v8440_v21  ;;  %v6849_v63 = vpop.f32.mrb[7].mxu1 }
  0xf5   :  { %v767_v35 = vpop.f32.mrb[6].mxu0  ;;  %v802_v6 = vld [vmem:[#allocation3 + $0x2] sm:$0x3]  ;;  %v1114_v63 = vld [vmem:[#allocation3 + $0x8] sm:$0x3] }
  0xf6   :  { %v771_v36 = vadd.f32 %v767_v35, %v696_v34  ;;  %v6874_v37 = vpop.f32.mrb[7].mxu0  ;;  %541 = vst [vmem:[#allocation3 + $0xa] sm:$0x3] %v537_v62 }
  0xf7   :  { %v690_v0 = vpop.f32.mrb[8].mxu1 }
  0xf8   :  { %7900 = vtanh.f32 %v771_v36  ;;  %v6413_v39 = vmul.f32 -1.442695, %v771_v36  ;;  %v691_v1 = vadd.f32 %v690_v0, %v8440_v21  ;;  %v6863_v3 = vpop.f32.mrb[9].mxu1 }
  0xfa   :  { %7902 = vpow2.f32 %v6413_v39  ;;  %695 = vst [vmem:[#allocation3 + $0xe] sm:$0x3] %v691_v1 }
 0x102   :  { %v7901_v38 = vpop.eup %7900 }
 0x103   :  { %781 = vrot.lane.b32.xlu0 %v7901_v38, %s8247_s24 }
 0x104   :  { %v7903_v40 = vpop.eup %7902 }
 0x105   :  { %v775_v41 = vadd.f32 1.0, %v7903_v40 }
 0x107   :  { %7904 = vrcp.f32 %v775_v41 }
 0x111   :  { %v7905_v42 = vpop.eup %7904 }
 0x112   :  { %v779_v45 = vmul.f32 0.0, %v7905_v42 }
 0x175   :  { %v782_v43 = vpop.permute.xlu0 %781 }
 0x176   :  { %v784_v44 = vmul.f32 %v7905_v42, %v782_v43 }
 0x178   :  { %786 = vrot.lane.b32.xlu0 %v784_v44, %s8247_s24 }
 0x1ea   :  { %v787_v46 = vpop.permute.xlu0 %786 }
 0x1eb   :  { %v8448_v47 = vadd.f32 %v787_v46, %v779_v45  ;;  %v1010_v45 = vld [vmem:[#allocation3 + $0x6] sm:$0x3] }
 0x1ed   :  { %7906 = vtanh.f32 %v8448_v47 }
 0x1f7   :  { %v7907_v51 = vpop.eup %7906 }
 0x1f8   :  { %792 = vrot.lane.b32.xlu1 %v7907_v51, %s8247_s24 }
 0x26a   :  { %v793_v53 = vpop.permute.xlu1 %792 }
 0x26b   :  { %v795_v54 = vmul.f32 %v7905_v42, %v793_v53 }
 0x26d   :  { %797 = vrot.lane.b32.xlu1 %v795_v54, %s8248_s26 }
 0x2df   :  { %v798_v5 = vpop.permute.xlu1 %797 }
 0x2e0   :  { %801 = vst.msk [vmem:[#allocation2] sm:$0x3] %vm800_vm2, %v798_v5  ;;  %6884 = vmatmul.mubr.msk.f32.vlgmr.msra.gmra.mrb[10].mxu1 %vm697_vm3, %v798_v5 }
 0x2e1   :  { %7535 = vmatpush3.bf16.msra.mxu1 %v8406_v11  ;;  %6905 = vmatprep.mubr.msk.f32.mxu1 %vm8245_vm0, %v8246_v4 }
 0x2e2   :  { %7536 = vmatprep.subr.bf16.mxu1 %v8244_v2 }
 0x2e5   :  { %7538 = vmatpush3.bf16.msra.mxu1 %v8417_v14 }
 0x2e6   :  { %7545 = vmatprep.subr.bf16.mxu1 %v8244_v2 }
 0x3b3   :  { %v871_v7 = vpop.f32.mrb[10].mxu1 }
 0x3b4   :  { %v875_v8 = vadd.f32 %v871_v7, %v802_v6  ;;  %v6885_v9 = vpop.f32.mrb[11].mxu1 }
 0x3b6   :  { %7908 = vtanh.f32 %v875_v8  ;;  %v6415_v12 = vmul.f32 -1.442695, %v875_v8 }
 0x3b8   :  { %7910 = vpow2.f32 %v6415_v12 }
 0x3c0   :  { %v7909_v10 = vpop.eup %7908 }
 0x3c1   :  { %885 = vrot.lane.b32.xlu0 %v7909_v10, %s8247_s24 }
 0x3c2   :  { %v7911_v13 = vpop.eup %7910 }
 0x3c3   :  { %v879_v15 = vadd.f32 1.0, %v7911_v13 }
 0x3c5   :  { %7912 = vrcp.f32 %v879_v15 }
 0x3cf   :  { %v7913_v16 = vpop.eup %7912 }
 0x3d0   :  { %v883_v19 = vmul.f32 %v7913_v16, %v8448_v47 }
 0x433   :  { %v886_v17 = vpop.permute.xlu0 %885 }
 0x434   :  { %v888_v18 = vmul.f32 %v7913_v16, %v886_v17 }
 0x436   :  { %890 = vrot.lane.b32.xlu1 %v888_v18, %s8247_s24 }
 0x4a8   :  { %v891_v21 = vpop.permute.xlu1 %890 }
 0x4a9   :  { %v893_v22 = vadd.f32 %v891_v21, %v883_v19 }
 0x4ab   :  { %7914 = vtanh.f32 %v893_v22 }
 0x4b5   :  { %v7915_v23 = vpop.eup %7914 }
 0x4b6   :  { %896 = vrot.lane.b32.xlu0 %v7915_v23, %s8247_s24 }
 0x528   :  { %v897_v24 = vpop.permute.xlu0 %896 }
 0x529   :  { %v899_v25 = vmul.f32 %v7913_v16, %v897_v24 }
 0x52b   :  { %901 = vrot.lane.b32.xlu1 %v899_v25, %s8248_s26 }
 0x59d   :  { %v902_v26 = vpop.permute.xlu1 %901 }
 0x59e   :  { %905 = vst.msk [vmem:[#allocation2 + $0x2] sm:$0x3] %vm800_vm2, %v902_v26  ;;  %6895 = vmatmul.mubr.msk.f32.vlgmr.msra.gmra.mrb[8].mxu0 %vm697_vm3, %v902_v26 }
 0x59f   :  { %7541 = vmatpush3.bf16.msra.mxu0 %v8406_v11  ;;  %6916 = vmatprep.mubr.msk.f32.mxu0 %vm8245_vm0, %v8246_v4 }
 0x5a0   :  { %7542 = vmatprep.subr.bf16.mxu0 %v8244_v2 }
 0x5a3   :  { %7544 = vmatpush3.bf16.msra.mxu0 %v8417_v14 }
 0x5a4   :  { %7551 = vmatprep.subr.bf16.mxu0 %v8244_v2 }
 0x671   :  { %v975_v28 = vpop.f32.mrb[8].mxu0 }
 0x672   :  { %v979_v29 = vadd.f32 %v975_v28, %v906_v27  ;;  %v6896_v30 = vpop.f32.mrb[9].mxu0 }
 0x674   :  { %7916 = vtanh.f32 %v979_v29  ;;  %v6417_v32 = vmul.f32 -1.442695, %v979_v29 }
 0x676   :  { %7918 = vpow2.f32 %v6417_v32 }
 0x67e   :  { %v7917_v31 = vpop.eup %7916 }
 0x67f   :  { %989 = vrot.lane.b32.xlu0 %v7917_v31, %s8247_s24 }
 0x680   :  { %v7919_v33 = vpop.eup %7918 }
 0x681   :  { %v983_v34 = vadd.f32 1.0, %v7919_v33 }
 0x683   :  { %7920 = vrcp.f32 %v983_v34 }
 0x68d   :  { %v7921_v35 = vpop.eup %7920 }
 0x68e   :  { %v987_v38 = vmul.f32 %v7921_v35, %v893_v22  ;;  %v1218_v22 = vld [vmem:[#allocation3 + $0xa] sm:$0x3] }
 0x6f1   :  { %v990_v36 = vpop.permute.xlu0 %989 }
 0x6f2   :  { %v992_v37 = vmul.f32 %v7921_v35, %v990_v36 }
 0x6f4   :  { %994 = vrot.lane.b32.xlu1 %v992_v37, %s8247_s24  ;;  %v1533_v37 = vld [vmem:[%s9503_s5] sm:$0xff] }
 0x766   :  { %v995_v39 = vpop.permute.xlu1 %994 }
 0x767   :  { %v997_v40 = vadd.f32 %v995_v39, %v987_v38  ;;  %v1534_v38 = vld [vmem:[%s9503_s5 + $0x8] sm:$0xff] }
 0x768   :  { %v8561_v39 = vpack.c.bf16 %v1534_v38, %v1533_v37 }
 0x769   :  { %7922 = vtanh.f32 %v997_v40 }
 0x773   :  { %v7923_v41 = vpop.eup %7922 }
 0x774   :  { %1000 = vrot.lane.b32.xlu0 %v7923_v41, %s8247_s24  ;;  %v1536_v41 = vld [vmem:[%s9503_s5 + $0x18] sm:$0xff] }
 0x7e6   :  { %v1001_v42 = vpop.permute.xlu0 %1000 }
 0x7e7   :  { %v1003_v43 = vmul.f32 %v7921_v35, %v1001_v42 }
 0x7e9   :  { %1005 = vrot.lane.b32.xlu1 %v1003_v43, %s8248_s26 }
 0x85b   :  { %v1006_v44 = vpop.permute.xlu1 %1005 }
 0x85c   :  { %1009 = vst.msk [vmem:[#allocation2 + $0x4] sm:$0x3] %vm800_vm2, %v1006_v44  ;;  %6906 = vmatmul.mubr.msk.f32.vlgmr.msra.gmra.mrb[12].mxu1 %vm697_vm3, %v1006_v44  ;;  %v1541_v44 = vld [vmem:[#allocation2] sm:$0x3] }
 0x85d   :  { %7547 = vmatpush3.bf16.msra.mxu1 %v8406_v11  ;;  %6927 = vmatprep.mubr.msk.f32.mxu1 %vm8245_vm0, %v8246_v4 }
 0x85e   :  { %7548 = vmatprep.subr.bf16.mxu1 %v8244_v2 }
 0x861   :  { %7550 = vmatpush3.bf16.msra.mxu1 %v8417_v14 }
 0x862   :  { %7557 = vmatprep.subr.bf16.mxu1 %v8244_v2 }
 0x92f   :  { %v1079_v46 = vpop.f32.mrb[12].mxu1 }
 0x930   :  { %v1083_v47 = vadd.f32 %v1079_v46, %v1010_v45  ;;  %v6907_v48 = vpop.f32.mrb[13].mxu1  ;;  %v1697_v45 = vld [vmem:[#allocation2 + $0x4] sm:$0x3] }
 0x931   :  { %v1531_v48 = vld [vmem:[%s9506_s8] sm:$0x1] }
 0x932   :  { %7924 = vtanh.f32 %v1083_v47  ;;  %v6419_v50 = vmul.f32 -1.442695, %v1083_v47  ;;  %v1530_v47 = vld [vmem:[%s9505_s7] sm:$0x1] }
 0x934   :  { %7926 = vpow2.f32 %v6419_v50 }
 0x93c   :  { %v7925_v49 = vpop.eup %7924 }
 0x93d   :  { %1093 = vrot.lane.b32.xlu0 %v7925_v49, %s8247_s24  ;;  %v1322_v49 = vld [vmem:[#allocation3 + $0xc] sm:$0x3] }
 0x93e   :  { %v7927_v51 = vpop.eup %7926 }
 0x93f   :  { %v1087_v52 = vadd.f32 1.0, %v7927_v51 }
 0x941   :  { %7928 = vrcp.f32 %v1087_v52 }
 0x94b   :  { %v7929_v53 = vpop.eup %7928 }
 0x94c   :  { %v1091_v56 = vmul.f32 %v7929_v53, %v997_v40  ;;  %v1535_v40 = vld [vmem:[%s9503_s5 + $0x10] sm:$0xff] }
 0x94d   :  { %v8572_v43 = vpack.c.bf16 %v1536_v41, %v1535_v40 }
 0x9af   :  { %v1094_v54 = vpop.permute.xlu0 %1093 }
 0x9b0   :  { %v1096_v55 = vmul.f32 %v7929_v53, %v1094_v54 }
 0x9b2   :  { %1098 = vrot.lane.b32.xlu1 %v1096_v55, %s8247_s24 }
 0xa24   :  { %v1099_v57 = vpop.permute.xlu1 %1098 }
 0xa25   :  { %v1101_v58 = vadd.f32 %v1099_v57, %v1091_v56 }
 0xa27   :  { %7930 = vtanh.f32 %v1101_v58 }
 0xa31   :  { %v7931_v59 = vpop.eup %7930 }
 0xa32   :  { %1104 = vrot.lane.b32.xlu0 %v7931_v59, %s8247_s24 }
 0xaa4   :  { %v1105_v60 = vpop.permute.xlu0 %1104 }
 0xaa5   :  { %v1107_v61 = vmul.f32 %v7929_v53, %v1105_v60  ;;  %v1532_v53 = vadd.f32 %v1531_v48, %v1530_v47 }
 0xaa7   :  { %1109 = vrot.lane.b32.xlu1 %v1107_v61, %s8248_s26  ;;  %v8607_v54 = vrot.slane %v1532_v53, %v8437_v20 }
 0xb19   :  { %v1110_v62 = vpop.permute.xlu1 %1109 }
 0xb1a   :  { %1113 = vst.msk [vmem:[#allocation2 + $0x6] sm:$0x3] %vm800_vm2, %v1110_v62  ;;  %6917 = vmatmul.mubr.msk.f32.vlgmr.msra.gmra.mrb[10].mxu0 %vm697_vm3, %v1110_v62 }
 0xb1b   :  { %7553 = vmatpush3.bf16.msra.mxu0 %v8406_v11  ;;  %6938 = vmatprep.mubr.msk.f32.mxu0 %vm8245_vm0, %v8246_v4 }
 0xb1c   :  { %7554 = vmatprep.subr.bf16.mxu0 %v8244_v2 }
 0xb1f   :  { %7556 = vmatpush3.bf16.msra.mxu0 %v8417_v14 }
 0xb20   :  { %7563 = vmatprep.subr.bf16.mxu0 %v8244_v2 }
 0xbed   :  { %v1183_v0 = vpop.f32.mrb[10].mxu0 }
 0xbee   :  { %v1187_v1 = vadd.f32 %v1183_v0, %v1114_v63  ;;  %v6918_v3 = vpop.f32.mrb[11].mxu0 }
 0xbf0   :  { %7932 = vtanh.f32 %v1187_v1  ;;  %v6421_v6 = vmul.f32 -1.442695, %v1187_v1 }
 0xbf2   :  { %7934 = vpow2.f32 %v6421_v6 }
 0xbfa   :  { %v7933_v5 = vpop.eup %7932 }
 0xbfb   :  { %1197 = vrot.lane.b32.xlu0 %v7933_v5, %s8247_s24 }
 0xbfc   :  { %v7935_v7 = vpop.eup %7934 }
 0xbfd   :  { %v1191_v8 = vadd.f32 1.0, %v7935_v7 }
 0xbff   :  { %7936 = vrcp.f32 %v1191_v8 }
 0xc09   :  { %v7937_v9 = vpop.eup %7936 }
 0xc0a   :  { %v1195_v13 = vmul.f32 %v7937_v9, %v1101_v58 }
 0xc6d   :  { %v1198_v10 = vpop.permute.xlu0 %1197 }
 0xc6e   :  { %v1200_v12 = vmul.f32 %v7937_v9, %v1198_v10 }
 0xc70   :  { %1202 = vrot.lane.b32.xlu1 %v1200_v12, %s8247_s24 }
 0xce2   :  { %v1203_v15 = vpop.permute.xlu1 %1202 }
 0xce3   :  { %v1205_v16 = vadd.f32 %v1203_v15, %v1195_v13 }
 0xce5   :  { %7938 = vtanh.f32 %v1205_v16 }
 0xcef   :  { %v7939_v17 = vpop.eup %7938 }
 0xcf0   :  { %1208 = vrot.lane.b32.xlu0 %v7939_v17, %s8247_s24 }
 0xd62   :  { %v1209_v18 = vpop.permute.xlu0 %1208 }
 0xd63   :  { %v1211_v19 = vmul.f32 %v7937_v9, %v1209_v18  ;;  %v1537_v18 = vld [vmem:[%s9504_s6] sm:$0xff] }
 0xd65   :  { %1213 = vrot.lane.b32.xlu1 %v1211_v19, %s8248_s26  ;;  %v1538_v19 = vld [vmem:[%s9504_s6 + $0x8] sm:$0xff] }
 0xdd7   :  { %v1214_v21 = vpop.permute.xlu1 %1213 }
 0xdd8   :  { %1217 = vst.msk [vmem:[#allocation2 + $0x8] sm:$0x3] %vm800_vm2, %v1214_v21  ;;  %6928 = vmatmul.mubr.msk.f32.vlgmr.msra.gmra.mrb[14].mxu1 %vm697_vm3, %v1214_v21  ;;  %v8633_v21 = vpack.c.bf16 %v1538_v19, %v1537_v18 }
 0xdd9   :  { %7559 = vmatpush3.bf16.msra.mxu1 %v8406_v11  ;;  %6949 = vmatprep.mubr.msk.f32.mxu1 %vm8245_vm0, %v8246_v4 }
 0xdda   :  { %7560 = vmatprep.subr.bf16.mxu1 %v8244_v2 }
 0xddd   :  { %7562 = vmatpush3.bf16.msra.mxu1 %v8417_v14 }
 0xdde   :  { %7569 = vmatprep.subr.bf16.mxu1 %v8244_v2 }
 0xddf   :  { %v1847_v46 = vld [vmem:[#allocation2 + $0x8] sm:$0x3] }
 0xeab   :  { %v1287_v23 = vpop.f32.mrb[14].mxu1 }
 0xeac   :  { %v1291_v24 = vadd.f32 %v1287_v23, %v1218_v22  ;;  %v6929_v25 = vpop.f32.mrb[15].mxu1  ;;  %v1539_v22 = vld [vmem:[%s9504_s6 + $0x10] sm:$0xff]  ;;  %v1540_v23 = vld [vmem:[%s9504_s6 + $0x18] sm:$0xff] }
 0xeae   :  { %7940 = vtanh.f32 %v1291_v24  ;;  %v6423_v27 = vmul.f32 -1.442695, %v1291_v24  ;;  %v1622_v24 = vld [vmem:[#allocation2 + $0x2] sm:$0x3] }
 0xeb0   :  { %7942 = vpow2.f32 %v6423_v27  ;;  %v1772_v27 = vld [vmem:[#allocation2 + $0x6] sm:$0x3] }
 0xeb8   :  { %v7941_v26 = vpop.eup %7940 }
 0xeb9   :  { %1301 = vrot.lane.b32.xlu0 %v7941_v26, %s8247_s24  ;;  %v8646_v26 = vpack.c.bf16 %v1540_v23, %v1539_v22 }
 0xeba   :  { %v7943_v11 = vpop.eup %7942 }
 0xebb   :  { %v1295_v28 = vadd.f32 1.0, %v7943_v11 }
 0xebd   :  { %7944 = vrcp.f32 %v1295_v28  ;;  %v1426_v28 = vld [vmem:[#allocation3 + $0xe] sm:$0x3] }
 0xec7   :  { %v7945_v29 = vpop.eup %7944 }
 0xec8   :  { %v1299_v14 = vmul.f32 %v7945_v29, %v1205_v16 }
 0xf2b   :  { %v1302_v30 = vpop.permute.xlu0 %1301 }
 0xf2c   :  { %v1304_v31 = vmul.f32 %v7945_v29, %v1302_v30 }
 0xf2e   :  { %1306 = vrot.lane.b32.xlu1 %v1304_v31, %s8247_s24 }
 0xfa0   :  { %v1307_v32 = vpop.permute.xlu1 %1306 }
 0xfa1   :  { %v8550_v33 = vadd.f32 %v1307_v32, %v1299_v14 }
 0xfa3   :  { %7946 = vtanh.f32 %v8550_v33 }
 0xfad   :  { %v7947_v34 = vpop.eup %7946 }
 0xfae   :  { %1312 = vrot.lane.b32.xlu0 %v7947_v34, %s8247_s24 }
0x1020   :  { %v1313_v35 = vpop.permute.xlu0 %1312 }
0x1021   :  { %v1315_v36 = vmul.f32 %v7945_v29, %v1313_v35 }
0x1023   :  { %1317 = vrot.lane.b32.xlu1 %v1315_v36, %s8248_s26 }
0x1095   :  { %v1318_v42 = vpop.permute.xlu1 %1317 }
0x1096   :  { %1321 = vst.msk [vmem:[#allocation2 + $0xa] sm:$0x3] %vm800_vm2, %v1318_v42  ;;  %6939 = vmatmul.mubr.msk.f32.vlgmr.msra.gmra.mrb[12].mxu0 %vm697_vm3, %v1318_v42 }
0x1097   :  { %7565 = vmatpush3.bf16.msra.mxu0 %v8561_v39  ;;  %6960 = vmatprep.mubr.msk.f32.mxu0 %vm8245_vm0, %v8246_v4 }
0x1098   :  { %7566 = vmatprep.subr.bf16.mxu0 %v8244_v2 }
0x109b   :  { %7568 = vmatpush3.bf16.msra.mxu0 %v8572_v43 }
0x109c   :  { %7575 = vmatprep.subr.bf16.mxu0 %v8244_v2 }
0x109d   :  { %v1922_v11 = vld [vmem:[#allocation2 + $0xa] sm:$0x3] }
0x109e   :  { %6961 = vmatmul.mubr.msk.f32.vlgmr.msra.gmra.mrb[14].mxu0 %vm697_vm3, %v1541_v44 }
0x109f   :  { %7577 = vmatpush3.bf16.msra.mxu0 %v8561_v39  ;;  %6982 = vmatprep.mubr.msk.f32.mxu0 %vm8245_vm0, %v8246_v4 }
0x10a0   :  { %7578 = vmatprep.subr.bf16.mxu0 %v8244_v2 }
0x10a3   :  { %7580 = vmatpush3.bf16.msra.mxu0 %v8572_v43 }
0x10a4   :  { %7587 = vmatprep.subr.bf16.mxu0 %v8244_v2 }
0x10a6   :  { %6983 = vmatmul.mubr.msk.f32.vlgmr.msra.gmra.mrb[16].mxu0 %vm697_vm3, %v1697_v45 }
0x10a7   :  { %7589 = vmatpush3.bf16.msra.mxu0 %v8561_v39  ;;  %7004 = vmatprep.mubr.msk.f32.mxu0 %vm8245_vm0, %v8246_v4 }
0x10a8   :  { %7590 = vmatprep.subr.bf16.mxu0 %v8244_v2 }
0x10ab   :  { %7592 = vmatpush3.bf16.msra.mxu0 %v8572_v43 }
0x10ac   :  { %7599 = vmatprep.subr.bf16.mxu0 %v8244_v2 }
0x10ae   :  { %7005 = vmatmul.mubr.msk.f32.vlgmr.msra.gmra.mrb[18].mxu0 %vm697_vm3, %v1847_v46 }
0x10af   :  { %7601 = vmatpush3.bf16.msra.mxu0 %v8561_v39  ;;  %7026 = vmatprep.mubr.msk.f32.mxu0 %vm8245_vm0, %v8246_v4 }
0x10b0   :  { %7602 = vmatprep.subr.bf16.mxu0 %v8244_v2 }
0x10b3   :  { %7604 = vmatpush3.bf16.msra.mxu0 %v8572_v43 }
0x10b4   :  { %7611 = vmatprep.subr.bf16.mxu0 %v8244_v2 }
0x1169   :  { %v1391_v50 = vpop.f32.mrb[12].mxu0 }
0x116a   :  { %v1395_v51 = vadd.f32 %v1391_v50, %v1322_v49  ;;  %v6940_v52 = vpop.f32.mrb[13].mxu0 }
0x116c   :  { %7948 = vtanh.f32 %v1395_v51  ;;  %v6425_v1 = vmul.f32 -1.442695, %v1395_v51 }
0x116e   :  { %7950 = vpow2.f32 %v6425_v1 }
0x1171   :  { %v1617_v55 = vpop.f32.mrb[14].mxu0 }
0x1172   :  { %v1618_v56 = vadd.f32 %v1617_v55, %v8607_v54  ;;  %v6962_v57 = vpop.f32.mrb[15].mxu0 }
0x1174   :  { %1621 = vst [vmem:[#allocation3] sm:$0x3] %v1618_v56 }
0x1176   :  { %v7949_v58 = vpop.eup %7948 }
0x1177   :  { %1405 = vrot.lane.b32.xlu0 %v7949_v58, %s8247_s24 }
0x1178   :  { %v7951_v3 = vpop.eup %7950 }
0x1179   :  { %v1767_v59 = vpop.f32.mrb[16].mxu0  ;;  %v1399_v5 = vadd.f32 1.0, %v7951_v3 }
0x117a   :  { %v1768_v60 = vadd.f32 %v1767_v59, %v8607_v54  ;;  %v6984_v61 = vpop.f32.mrb[17].mxu0 }
0x117b   :  { %7952 = vrcp.f32 %v1399_v5 }
0x117c   :  { %1771 = vst [vmem:[#allocation3 + $0x4] sm:$0x3] %v1768_v60 }
0x1181   :  { %v1917_v62 = vpop.f32.mrb[18].mxu0 }
0x1182   :  { %v1918_v63 = vadd.f32 %v1917_v62, %v8607_v54  ;;  %v7006_v0 = vpop.f32.mrb[19].mxu0 }
0x1184   :  { %1921 = vst [vmem:[#allocation3 + $0x8] sm:$0x3] %v1918_v63 }
0x1185   :  { %v7953_v6 = vpop.eup %7952 }
0x1186   :  { %v1403_v9 = vmul.f32 %v7953_v6, %v8550_v33 }
0x11e9   :  { %v1406_v7 = vpop.permute.xlu0 %1405 }
0x11ea   :  { %v1408_v8 = vmul.f32 %v7953_v6, %v1406_v7 }
0x11ec   :  { %1410 = vrot.lane.b32.xlu1 %v1408_v8, %s8247_s24 }
0x125e   :  { %v1411_v10 = vpop.permute.xlu1 %1410 }
0x125f   :  { %v8615_v12 = vadd.f32 %v1411_v10, %v1403_v9 }
0x1261   :  { %7954 = vtanh.f32 %v8615_v12 }
0x126b   :  { %v7955_v13 = vpop.eup %7954 }
0x126c   :  { %1416 = vrot.lane.b32.xlu0 %v7955_v13, %s8247_s24 }
0x12de   :  { %v1417_v15 = vpop.permute.xlu0 %1416 }
0x12df   :  { %v1419_v16 = vmul.f32 %v7953_v6, %v1417_v15 }
0x12e1   :  { %1421 = vrot.lane.b32.xlu1 %v1419_v16, %s8248_s26 }
0x1353   :  { %v1422_v17 = vpop.permute.xlu1 %1421 }
0x1354   :  { %1425 = vst.msk [vmem:[#allocation2 + $0xc] sm:$0x3] %vm800_vm2, %v1422_v17  ;;  %6950 = vmatmul.mubr.msk.f32.vlgmr.msra.gmra.mrb[16].mxu1 %vm697_vm3, %v1422_v17 }
0x1355   :  { %7571 = vmatpush3.bf16.msra.mxu1 %v8561_v39  ;;  %6971 = vmatprep.mubr.msk.f32.mxu1 %vm8245_vm0, %v8246_v4 }
0x1356   :  { %7572 = vmatprep.subr.bf16.mxu1 %v8244_v2 }
0x1359   :  { %7574 = vmatpush3.bf16.msra.mxu1 %v8572_v43 }
0x135a   :  { %7581 = vmatprep.subr.bf16.mxu1 %v8244_v2 }
0x135b   :  { %v1997_v25 = vld [vmem:[#allocation2 + $0xc] sm:$0x3] }
0x135c   :  { %6972 = vmatmul.mubr.msk.f32.vlgmr.msra.gmra.mrb[18].mxu1 %vm697_vm3, %v1622_v24  ;;  %7027 = vmatmul.mubr.msk.f32.vlgmr.msra.gmra.mrb[20].mxu0 %vm697_vm3, %v1997_v25 }
0x135d   :  { %7583 = vmatpush3.bf16.msra.mxu1 %v8561_v39  ;;  %7613 = vmatpush3.bf16.msra.mxu0 %v8633_v21 }
0x135e   :  { %7584 = vmatprep.subr.bf16.mxu1 %v8244_v2  ;;  %7614 = vmatprep.subr.bf16.mxu0 %v8244_v2 }
0x135f   :  { %6993 = vmatprep.mubr.msk.f32.mxu1 %vm8245_vm0, %v8246_v4  ;;  %7048 = vmatprep.mubr.msk.f32.mxu0 %vm8245_vm0, %v8246_v4 }
0x1361   :  { %7586 = vmatpush3.bf16.msra.mxu1 %v8572_v43  ;;  %7616 = vmatpush3.bf16.msra.mxu0 %v8646_v26 }
0x1362   :  { %7593 = vmatprep.subr.bf16.mxu1 %v8244_v2  ;;  %7623 = vmatprep.subr.bf16.mxu0 %v8244_v2 }
0x1364   :  { %6994 = vmatmul.mubr.msk.f32.vlgmr.msra.gmra.mrb[20].mxu1 %vm697_vm3, %v1772_v27  ;;  %7049 = vmatmul.mubr.f32.vlgmr.msra.gmra.mrb[22].mxu0 %v8246_v4 }
0x1365   :  { %7595 = vmatpush3.bf16.msra.mxu1 %v8561_v39  ;;  %7015 = vmatprep.mubr.msk.f32.mxu1 %vm8245_vm0, %v8246_v4 }
0x1366   :  { %7596 = vmatprep.subr.bf16.mxu1 %v8244_v2  ;;  %7625 = vmatpush3.bf16.msra.mxu0 %v8633_v21 }
0x1367   :  { %7626 = vmatprep.subr.bf16.mxu0 %v8244_v2  ;;  %7070 = vmatprep.mubr.msk.f32.mxu0 %vm8245_vm0, %v8246_v4 }
0x1369   :  { %7598 = vmatpush3.bf16.msra.mxu1 %v8572_v43 }
0x136a   :  { %7605 = vmatprep.subr.bf16.mxu1 %v8244_v2  ;;  %7628 = vmatpush3.bf16.msra.mxu0 %v8646_v26 }
0x136b   :  { %7635 = vmatprep.subr.bf16.mxu0 %v8244_v2 }
0x136c   :  { %7016 = vmatmul.mubr.msk.f32.vlgmr.msra.gmra.mrb[22].mxu1 %vm697_vm3, %v1922_v11 }
0x136d   :  { %7607 = vmatpush3.bf16.msra.mxu1 %v8561_v39  ;;  %7037 = vmatprep.mubr.msk.f32.mxu1 %vm8245_vm0, %v8246_v4  ;;  %v2147_v39 = vld [vmem:[#allocation3] sm:$0x3] }
0x136e   :  { %7608 = vmatprep.subr.bf16.mxu1 %v8244_v2 }
0x1371   :  { %7610 = vmatpush3.bf16.msra.mxu1 %v8572_v43 }
0x1372   :  { %7617 = vmatprep.subr.bf16.mxu1 %v8244_v2 }
0x1427   :  { %v1495_v29 = vpop.f32.mrb[16].mxu1 }
0x1428   :  { %v1499_v30 = vadd.f32 %v1495_v29, %v1426_v28  ;;  %v6951_v31 = vpop.f32.mrb[17].mxu1 }
0x142a   :  { %7956 = vtanh.f32 %v1499_v30  ;;  %v6427_v49 = vmul.f32 -1.442695, %v1499_v30 }
0x142f   :  { %v1692_v14 = vpop.f32.mrb[18].mxu1  ;;  %v2067_v32 = vpop.f32.mrb[20].mxu0 }
0x1430   :  { %v1693_v33 = vadd.f32 %v1692_v14, %v8607_v54  ;;  %v6973_v34 = vpop.f32.mrb[19].mxu1  ;;  %v2068_v35 = vadd.f32 %v2067_v32, %v8607_v54  ;;  %v7028_v36 = vpop.f32.mrb[21].mxu0 }
0x1432   :  { %1696 = vst [vmem:[#allocation3 + $0x2] sm:$0x3] %v1693_v33  ;;  %2071 = vst [vmem:[#allocation3 + $0xc] sm:$0x3] %v2068_v35 }
0x1434   :  { %v7957_v37 = vpop.eup %7956 }
0x1435   :  { %1509 = vrot.lane.b32.xlu0 %v7957_v37, %s8247_s24 }
0x1437   :  { %v1842_v38 = vpop.f32.mrb[20].mxu1  ;;  %v2214_v40 = vpop.f32.mrb[22].mxu0 }
0x1438   :  { %v1843_v41 = vadd.f32 %v1842_v38, %v8607_v54  ;;  %v2218_v42 = vadd.f32 %v2214_v40, %v2147_v39  ;;  %v6995_v43 = vpop.f32.mrb[21].mxu1  ;;  %v7050_v44 = vpop.f32.mrb[23].mxu0  ;;  %v2351_v38 = vld [vmem:[#allocation3 + $0x4] sm:$0x3] }
0x1439   :  { %v2248_v22 = vld [vmem:[#allocation3 + $0x2] sm:$0x3] }
0x143a   :  { %1846 = vst [vmem:[#allocation3 + $0x6] sm:$0x3] %v1843_v41  ;;  %7958 = vtanh.f32 %v2218_v42  ;;  %v6436_v51 = vmul.f32 -1.442695, %v2218_v42 }
0x143b   :  { %7960 = vpow2.f32 %v6427_v49 }
0x143c   :  { %7962 = vpow2.f32 %v6436_v51 }
0x143f   :  { %v1992_v45 = vpop.f32.mrb[22].mxu1 }
0x1440   :  { %v1993_v46 = vadd.f32 %v1992_v45, %v8607_v54  ;;  %v7017_v47 = vpop.f32.mrb[23].mxu1 }
0x1442   :  { %1996 = vst [vmem:[#allocation3 + $0xa] sm:$0x3] %v1993_v46 }
0x1444   :  { %v7959_v48 = vpop.eup %7958 }
0x1445   :  { %2228 = vrot.lane.b32.xlu1 %v7959_v48, %s8247_s24  ;;  %v7961_v50 = vpop.eup %7960 }
0x1446   :  { %v1503_v52 = vadd.f32 1.0, %v7961_v50  ;;  %v7963_v53 = vpop.eup %7962 }
0x1447   :  { %v2222_v58 = vadd.f32 1.0, %v7963_v53 }
0x1448   :  { %7964 = vrcp.f32 %v1503_v52 }
0x1449   :  { %7966 = vrcp.f32 %v2222_v58 }
0x1452   :  { %v7965_v55 = vpop.eup %7964 }
0x1453   :  { %v7967_v59 = vpop.eup %7966  ;;  %v1507_v62 = vmul.f32 %v7965_v55, %v8615_v12 }
0x1454   :  { %v2226_v3 = vmul.f32 0.0, %v7967_v59 }
0x14a7   :  { %v1510_v56 = vpop.permute.xlu0 %1509 }
0x14a8   :  { %v1512_v57 = vmul.f32 %v7965_v55, %v1510_v56 }
0x14aa   :  { %1514 = vrot.lane.b32.xlu0 %v1512_v57, %s8247_s24  ;;  %v2454_v57 = vld [vmem:[#allocation3 + $0x6] sm:$0x3] }
0x14b7   :  { %v2229_v60 = vpop.permute.xlu1 %2228 }
0x14b8   :  { %v2231_v61 = vmul.f32 %v7967_v59, %v2229_v60 }
0x14ba   :  { %2233 = vrot.lane.b32.xlu1 %v2231_v61, %s8247_s24 }
0x151c   :  { %v1515_v63 = vpop.permute.xlu0 %1514 }
0x151d   :  { %v1517_v0 = vadd.f32 %v1515_v63, %v1507_v62 }
0x151f   :  { %7968 = vtanh.f32 %v1517_v0 }
0x1529   :  { %v7969_v1 = vpop.eup %7968 }
0x152a   :  { %1520 = vrot.lane.b32.xlu0 %v7969_v1, %s8247_s24 }
0x152c   :  { %v2234_v5 = vpop.permute.xlu1 %2233 }
0x152d   :  { %v2236_v6 = vadd.f32 %v2234_v5, %v2226_v3 }
0x152f   :  { %7970 = vtanh.f32 %v2236_v6 }
0x1539   :  { %v7971_v7 = vpop.eup %7970 }
0x153a   :  { %2239 = vrot.lane.b32.xlu1 %v7971_v7, %s8247_s24 }
0x159c   :  { %v1521_v8 = vpop.permute.xlu0 %1520 }
0x159d   :  { %v1523_v9 = vmul.f32 %v7965_v55, %v1521_v8 }
0x159f   :  { %1525 = vrot.lane.b32.xlu0 %v1523_v9, %s8248_s26 }
0x15ac   :  { %v2240_v10 = vpop.permute.xlu1 %2239 }
0x15ad   :  { %v2242_v13 = vmul.f32 %v7967_v59, %v2240_v10 }
0x15af   :  { %2244 = vrot.lane.b32.xlu1 %v2242_v13, %s8248_s26 }
0x1611   :  { %v1526_v12 = vpop.permute.xlu0 %1525 }
0x1612   :  { %1529 = vst.msk [vmem:[#allocation2 + $0xe] sm:$0x3] %vm800_vm2, %v1526_v12 }
0x1619   :  { %v2072_v15 = vld [vmem:[#allocation2 + $0xe] sm:$0x3] }
0x161a   :  { %7038 = vmatmul.mubr.msk.f32.vlgmr.msra.gmra.mrb[24].mxu1 %vm697_vm3, %v2072_v15  ;;  %v2557_v15 = vld [vmem:[#allocation3 + $0x8] sm:$0x3] }
0x161b   :  { %7619 = vmatpush3.bf16.msra.mxu1 %v8633_v21  ;;  %7059 = vmatprep.mubr.msk.f32.mxu1 %vm8245_vm0, %v8246_v4 }
0x161c   :  { %7620 = vmatprep.subr.bf16.mxu1 %v8244_v2 }
0x161f   :  { %7622 = vmatpush3.bf16.msra.mxu1 %v8646_v26 }
0x1620   :  { %7629 = vmatprep.subr.bf16.mxu1 %v8244_v2 }
0x1621   :  { %v2245_v16 = vpop.permute.xlu1 %2244 }
0x1622   :  { %2247 = vst.msk [vmem:[#allocation2] sm:$0x3] %vm800_vm2, %v2245_v16  ;;  %7060 = vmatmul.mubr.msk.f32.vlgmr.msra.gmra.mrb[26].mxu1 %vm697_vm3, %v2245_v16 }
0x1623   :  { %7631 = vmatpush3.bf16.msra.mxu1 %v8633_v21  ;;  %7081 = vmatprep.mubr.msk.f32.mxu1 %vm8245_vm0, %v8246_v4 }
0x1624   :  { %7632 = vmatprep.subr.bf16.mxu1 %v8244_v2 }
0x1627   :  { %7634 = vmatpush3.bf16.msra.mxu1 %v8646_v26 }
0x1628   :  { %7641 = vmatprep.subr.bf16.mxu1 %v8244_v2 }
0x16ed   :  { %v2142_v17 = vpop.f32.mrb[24].mxu1 }
0x16ee   :  { %v2143_v18 = vadd.f32 %v2142_v17, %v8607_v54  ;;  %v7039_v19 = vpop.f32.mrb[25].mxu1 }
0x16f0   :  { %2146 = vst [vmem:[#allocation3 + $0xe] sm:$0x3] %v2143_v18 }
0x16f5   :  { %v2317_v23 = vpop.f32.mrb[26].mxu1 }
0x16f6   :  { %v2321_v24 = vadd.f32 %v2317_v23, %v2248_v22  ;;  %v7061_v25 = vpop.f32.mrb[27].mxu1 }
0x16f8   :  { %7972 = vtanh.f32 %v2321_v24  ;;  %v6438_v11 = vmul.f32 -1.442695, %v2321_v24 }
0x16fa   :  { %7974 = vpow2.f32 %v6438_v11 }
0x1702   :  { %v7973_v27 = vpop.eup %7972 }
0x1703   :  { %2331 = vrot.lane.b32.xlu0 %v7973_v27, %s8247_s24 }
0x1704   :  { %v7975_v28 = vpop.eup %7974 }
0x1705   :  { %v2325_v29 = vadd.f32 1.0, %v7975_v28 }
0x1707   :  { %7976 = vrcp.f32 %v2325_v29 }
0x1711   :  { %v7977_v30 = vpop.eup %7976 }
0x1712   :  { %v2329_v54 = vmul.f32 %v7977_v30, %v2236_v6 }
0x1775   :  { %v2332_v31 = vpop.permute.xlu0 %2331 }
0x1776   :  { %v2334_v14 = vmul.f32 %v7977_v30, %v2332_v31 }
0x1778   :  { %2336 = vrot.lane.b32.xlu1 %v2334_v14, %s8247_s24 }
0x17ea   :  { %v2337_v32 = vpop.permute.xlu1 %2336 }
0x17eb   :  { %v2339_v33 = vadd.f32 %v2337_v32, %v2329_v54 }
0x17ed   :  { %7978 = vtanh.f32 %v2339_v33 }
0x17f7   :  { %v7979_v34 = vpop.eup %7978 }
0x17f8   :  { %2342 = vrot.lane.b32.xlu0 %v7979_v34, %s8247_s24 }
0x186a   :  { %v2343_v35 = vpop.permute.xlu0 %2342 }
0x186b   :  { %v2345_v36 = vmul.f32 %v7977_v30, %v2343_v35 }
0x186d   :  { %2347 = vrot.lane.b32.xlu1 %v2345_v36, %s8248_s26 }
0x18df   :  { %v2348_v37 = vpop.permute.xlu1 %2347 }
0x18e0   :  { %2350 = vst.msk [vmem:[#allocation2 + $0x2] sm:$0x3] %vm800_vm2, %v2348_v37  ;;  %7071 = vmatmul.mubr.msk.f32.vlgmr.msra.gmra.mrb[24].mxu0 %vm697_vm3, %v2348_v37 }
0x18e1   :  { %7637 = vmatpush3.bf16.msra.mxu0 %v8633_v21  ;;  %7092 = vmatprep.mubr.msk.f32.mxu0 %vm8245_vm0, %v8246_v4 }
0x18e2   :  { %7638 = vmatprep.subr.bf16.mxu0 %v8244_v2 }
0x18e5   :  { %7640 = vmatpush3.bf16.msra.mxu0 %v8646_v26 }
0x18e6   :  { %7647 = vmatprep.subr.bf16.mxu0 %v8244_v2 }
0x19b3   :  { %v2420_v39 = vpop.f32.mrb[24].mxu0 }
0x19b4   :  { %v2424_v40 = vadd.f32 %v2420_v39, %v2351_v38  ;;  %v7072_v41 = vpop.f32.mrb[25].mxu0 }
0x19b6   :  { %7980 = vtanh.f32 %v2424_v40  ;;  %v6440_v43 = vmul.f32 -1.442695, %v2424_v40 }
0x19b8   :  { %7982 = vpow2.f32 %v6440_v43 }
0x19c0   :  { %v7981_v42 = vpop.eup %7980 }
0x19c1   :  { %2434 = vrot.lane.b32.xlu0 %v7981_v42, %s8247_s24 }
0x19c2   :  { %v7983_v44 = vpop.eup %7982 }
0x19c3   :  { %v2428_v45 = vadd.f32 1.0, %v7983_v44 }
0x19c5   :  { %7984 = vrcp.f32 %v2428_v45 }
0x19cf   :  { %v7985_v46 = vpop.eup %7984 }
0x19d0   :  { %v2432_v49 = vmul.f32 %v7985_v46, %v2339_v33  ;;  %v2660_v33 = vld [vmem:[#allocation3 + $0xa] sm:$0x3] }
0x1a33   :  { %v2435_v47 = vpop.permute.xlu0 %2434 }
0x1a34   :  { %v2437_v48 = vmul.f32 %v7985_v46, %v2435_v47 }
0x1a36   :  { %2439 = vrot.lane.b32.xlu1 %v2437_v48, %s8247_s24  ;;  %v2972_v48 = vld [vmem:[%s9507_s9] sm:$0xff] }
0x1aa8   :  { %v2440_v50 = vpop.permute.xlu1 %2439 }
0x1aa9   :  { %v2442_v51 = vadd.f32 %v2440_v50, %v2432_v49  ;;  %v2973_v49 = vld [vmem:[%s9507_s9 + $0x8] sm:$0xff] }
0x1aaa   :  { %v8770_v50 = vpack.c.bf16 %v2973_v49, %v2972_v48 }
0x1aab   :  { %7986 = vtanh.f32 %v2442_v51 }
0x1ab5   :  { %v7987_v52 = vpop.eup %7986 }
0x1ab6   :  { %2445 = vrot.lane.b32.xlu0 %v7987_v52, %s8247_s24  ;;  %v2975_v52 = vld [vmem:[%s9507_s9 + $0x18] sm:$0xff] }
0x1b28   :  { %v2446_v53 = vpop.permute.xlu0 %2445 }
0x1b29   :  { %v2448_v55 = vmul.f32 %v7985_v46, %v2446_v53 }
0x1b2b   :  { %2450 = vrot.lane.b32.xlu1 %v2448_v55, %s8248_s26 }
0x1b9d   :  { %v2451_v56 = vpop.permute.xlu1 %2450 }
0x1b9e   :  { %2453 = vst.msk [vmem:[#allocation2 + $0x4] sm:$0x3] %vm800_vm2, %v2451_v56  ;;  %7082 = vmatmul.mubr.msk.f32.vlgmr.msra.gmra.mrb[28].mxu1 %vm697_vm3, %v2451_v56  ;;  %v2980_v56 = vld [vmem:[#allocation2] sm:$0x3] }
0x1b9f   :  { %7643 = vmatpush3.bf16.msra.mxu1 %v8633_v21  ;;  %7103 = vmatprep.mubr.msk.f32.mxu1 %vm8245_vm0, %v8246_v4 }
0x1ba0   :  { %7644 = vmatprep.subr.bf16.mxu1 %v8244_v2 }
0x1ba3   :  { %7646 = vmatpush3.bf16.msra.mxu1 %v8646_v26 }
0x1ba4   :  { %7653 = vmatprep.subr.bf16.mxu1 %v8244_v2 }
0x1c71   :  { %v2523_v58 = vpop.f32.mrb[28].mxu1 }
0x1c72   :  { %v2527_v59 = vadd.f32 %v2523_v58, %v2454_v57  ;;  %v7083_v60 = vpop.f32.mrb[29].mxu1  ;;  %v3136_v57 = vld [vmem:[#allocation2 + $0x4] sm:$0x3] }
0x1c73   :  { %v2970_v60 = vld [vmem:[%s9510_s12] sm:$0x1] }
0x1c74   :  { %7988 = vtanh.f32 %v2527_v59  ;;  %v6442_v62 = vmul.f32 -1.442695, %v2527_v59  ;;  %v2969_v59 = vld [vmem:[%s9509_s11] sm:$0x1] }
0x1c76   :  { %7990 = vpow2.f32 %v6442_v62 }
0x1c7e   :  { %v7989_v61 = vpop.eup %7988 }
0x1c7f   :  { %2537 = vrot.lane.b32.xlu0 %v7989_v61, %s8247_s24  ;;  %v2763_v61 = vld [vmem:[#allocation3 + $0xc] sm:$0x3] }
0x1c80   :  { %v7991_v63 = vpop.eup %7990 }
0x1c81   :  { %v2531_v0 = vadd.f32 1.0, %v7991_v63 }
0x1c83   :  { %7992 = vrcp.f32 %v2531_v0 }
0x1c8d   :  { %v7993_v1 = vpop.eup %7992 }
0x1c8e   :  { %v2535_v6 = vmul.f32 %v7993_v1, %v2442_v51  ;;  %v2974_v51 = vld [vmem:[%s9507_s9 + $0x10] sm:$0xff] }
0x1c8f   :  { %v8781_v55 = vpack.c.bf16 %v2975_v52, %v2974_v51 }
0x1cf1   :  { %v2538_v3 = vpop.permute.xlu0 %2537 }
0x1cf2   :  { %v2540_v5 = vmul.f32 %v7993_v1, %v2538_v3 }
0x1cf4   :  { %2542 = vrot.lane.b32.xlu1 %v2540_v5, %s8247_s24 }
0x1d66   :  { %v2543_v7 = vpop.permute.xlu1 %2542 }
0x1d67   :  { %v2545_v8 = vadd.f32 %v2543_v7, %v2535_v6 }
0x1d69   :  { %7994 = vtanh.f32 %v2545_v8 }
0x1d73   :  { %v7995_v9 = vpop.eup %7994 }
0x1d74   :  { %2548 = vrot.lane.b32.xlu0 %v7995_v9, %s8247_s24 }
0x1de6   :  { %v2549_v10 = vpop.permute.xlu0 %2548 }
0x1de7   :  { %v2551_v13 = vmul.f32 %v7993_v1, %v2549_v10  ;;  %v2971_v1 = vadd.f32 %v2970_v60, %v2969_v59 }
0x1de9   :  { %2553 = vrot.lane.b32.xlu1 %v2551_v13, %s8248_s26  ;;  %v8816_v3 = vrot.slane %v2971_v1, %v8437_v20 }
0x1e5b   :  { %v2554_v12 = vpop.permute.xlu1 %2553 }
0x1e5c   :  { %2556 = vst.msk [vmem:[#allocation2 + $0x6] sm:$0x3] %vm800_vm2, %v2554_v12  ;;  %7093 = vmatmul.mubr.msk.f32.vlgmr.msra.gmra.mrb[26].mxu0 %vm697_vm3, %v2554_v12 }
0x1e5d   :  { %7649 = vmatpush3.bf16.msra.mxu0 %v8633_v21  ;;  %7114 = vmatprep.mubr.msk.f32.mxu0 %vm8245_vm0, %v8246_v4 }
0x1e5e   :  { %7650 = vmatprep.subr.bf16.mxu0 %v8244_v2 }
0x1e61   :  { %7652 = vmatpush3.bf16.msra.mxu0 %v8646_v26 }
0x1e62   :  { %7659 = vmatprep.subr.bf16.mxu0 %v8244_v2 }
0x1f2f   :  { %v2626_v16 = vpop.f32.mrb[26].mxu0 }
0x1f30   :  { %v2630_v17 = vadd.f32 %v2626_v16, %v2557_v15  ;;  %v7094_v18 = vpop.f32.mrb[27].mxu0 }
0x1f32   :  { %7996 = vtanh.f32 %v2630_v17  ;;  %v6444_v22 = vmul.f32 -1.442695, %v2630_v17 }
0x1f34   :  { %7998 = vpow2.f32 %v6444_v22 }
0x1f3c   :  { %v7997_v19 = vpop.eup %7996 }
0x1f3d   :  { %2640 = vrot.lane.b32.xlu0 %v7997_v19, %s8247_s24 }
0x1f3e   :  { %v7999_v23 = vpop.eup %7998 }
0x1f3f   :  { %v2634_v24 = vadd.f32 1.0, %v7999_v23 }
0x1f41   :  { %8000 = vrcp.f32 %v2634_v24 }
0x1f4b   :  { %v8001_v25 = vpop.eup %8000 }
0x1f4c   :  { %v2638_v28 = vmul.f32 %v8001_v25, %v2545_v8 }
0x1faf   :  { %v2641_v27 = vpop.permute.xlu0 %2640 }
0x1fb0   :  { %v2643_v11 = vmul.f32 %v8001_v25, %v2641_v27 }
0x1fb2   :  { %2645 = vrot.lane.b32.xlu1 %v2643_v11, %s8247_s24 }
0x2024   :  { %v2646_v29 = vpop.permute.xlu1 %2645 }
0x2025   :  { %v2648_v30 = vadd.f32 %v2646_v29, %v2638_v28 }
0x2027   :  { %8002 = vtanh.f32 %v2648_v30 }
0x2031   :  { %v8003_v31 = vpop.eup %8002 }
0x2032   :  { %2651 = vrot.lane.b32.xlu0 %v8003_v31, %s8247_s24 }
0x20a4   :  { %v2652_v14 = vpop.permute.xlu0 %2651 }
0x20a5   :  { %v2654_v54 = vmul.f32 %v8001_v25, %v2652_v14  ;;  %v2976_v14 = vld [vmem:[%s9508_s10] sm:$0xff] }
0x20a7   :  { %2656 = vrot.lane.b32.xlu1 %v2654_v54, %s8248_s26  ;;  %v2977_v54 = vld [vmem:[%s9508_s10 + $0x8] sm:$0xff] }
0x2119   :  { %v2657_v32 = vpop.permute.xlu1 %2656 }
0x211a   :  { %2659 = vst.msk [vmem:[#allocation2 + $0x8] sm:$0x3] %vm800_vm2, %v2657_v32  ;;  %7104 = vmatmul.mubr.msk.f32.vlgmr.msra.gmra.mrb[30].mxu1 %vm697_vm3, %v2657_v32  ;;  %v8842_v32 = vpack.c.bf16 %v2977_v54, %v2976_v14 }
0x211b   :  { %7655 = vmatpush3.bf16.msra.mxu1 %v8633_v21  ;;  %7125 = vmatprep.mubr.msk.f32.mxu1 %vm8245_vm0, %v8246_v4 }
0x211c   :  { %7656 = vmatprep.subr.bf16.mxu1 %v8244_v2 }
0x211f   :  { %7658 = vmatpush3.bf16.msra.mxu1 %v8646_v26 }
0x2120   :  { %7665 = vmatprep.subr.bf16.mxu1 %v8244_v2 }
0x2121   :  { %v3286_v58 = vld [vmem:[#allocation2 + $0x8] sm:$0x3] }
0x21ed   :  { %v2729_v34 = vpop.f32.mrb[30].mxu1 }
0x21ee   :  { %v2733_v35 = vadd.f32 %v2729_v34, %v2660_v33  ;;  %v7105_v36 = vpop.f32.mrb[31].mxu1  ;;  %v2978_v33 = vld [vmem:[%s9508_s10 + $0x10] sm:$0xff]  ;;  %v2979_v34 = vld [vmem:[%s9508_s10 + $0x18] sm:$0xff] }
0x21f0   :  { %8004 = vtanh.f32 %v2733_v35  ;;  %v6446_v38 = vmul.f32 -1.442695, %v2733_v35  ;;  %v3061_v35 = vld [vmem:[#allocation2 + $0x2] sm:$0x3] }
0x21f2   :  { %8006 = vpow2.f32 %v6446_v38  ;;  %v3211_v38 = vld [vmem:[#allocation2 + $0x6] sm:$0x3] }
0x21fa   :  { %v8005_v37 = vpop.eup %8004 }
0x21fb   :  { %2743 = vrot.lane.b32.xlu0 %v8005_v37, %s8247_s24  ;;  %v8855_v37 = vpack.c.bf16 %v2979_v34, %v2978_v33 }
0x21fc   :  { %v8007_v21 = vpop.eup %8006 }
0x21fd   :  { %v2737_v39 = vadd.f32 1.0, %v8007_v21 }
0x21ff   :  { %8008 = vrcp.f32 %v2737_v39  ;;  %v2866_v39 = vld [vmem:[#allocation3 + $0xe] sm:$0x3] }
0x2209   :  { %v8009_v40 = vpop.eup %8008 }
0x220a   :  { %v2741_v26 = vmul.f32 %v8009_v40, %v2648_v30 }
0x226d   :  { %v2744_v41 = vpop.permute.xlu0 %2743 }
0x226e   :  { %v2746_v42 = vmul.f32 %v8009_v40, %v2744_v41 }
0x2270   :  { %2748 = vrot.lane.b32.xlu1 %v2746_v42, %s8247_s24 }
0x22e2   :  { %v2749_v43 = vpop.permute.xlu1 %2748 }
0x22e3   :  { %v8759_v44 = vadd.f32 %v2749_v43, %v2741_v26 }
0x22e5   :  { %8010 = vtanh.f32 %v8759_v44 }
0x22ef   :  { %v8011_v45 = vpop.eup %8010 }
0x22f0   :  { %2754 = vrot.lane.b32.xlu0 %v8011_v45, %s8247_s24 }
0x2362   :  { %v2755_v46 = vpop.permute.xlu0 %2754 }
0x2363   :  { %v2757_v47 = vmul.f32 %v8009_v40, %v2755_v46 }
0x2365   :  { %2759 = vrot.lane.b32.xlu1 %v2757_v47, %s8248_s26 }
0x23d7   :  { %v2760_v53 = vpop.permute.xlu1 %2759 }
0x23d8   :  { %2762 = vst.msk [vmem:[#allocation2 + $0xa] sm:$0x3] %vm800_vm2, %v2760_v53  ;;  %7115 = vmatmul.mubr.msk.f32.vlgmr.msra.gmra.mrb[28].mxu0 %vm697_vm3, %v2760_v53 }
0x23d9   :  { %7661 = vmatpush3.bf16.msra.mxu0 %v8770_v50  ;;  %7136 = vmatprep.mubr.msk.f32.mxu0 %vm8245_vm0, %v8246_v4 }
0x23da   :  { %7662 = vmatprep.subr.bf16.mxu0 %v8244_v2 }
0x23dd   :  { %7664 = vmatpush3.bf16.msra.mxu0 %v8781_v55 }
0x23de   :  { %7671 = vmatprep.subr.bf16.mxu0 %v8244_v2 }
0x23df   :  { %v3361_v21 = vld [vmem:[#allocation2 + $0xa] sm:$0x3] }
0x23e0   :  { %7137 = vmatmul.mubr.msk.f32.vlgmr.msra.gmra.mrb[30].mxu0 %vm697_vm3, %v2980_v56 }
0x23e1   :  { %7673 = vmatpush3.bf16.msra.mxu0 %v8770_v50  ;;  %7158 = vmatprep.mubr.msk.f32.mxu0 %vm8245_vm0, %v8246_v4 }
0x23e2   :  { %7674 = vmatprep.subr.bf16.mxu0 %v8244_v2 }
0x23e5   :  { %7676 = vmatpush3.bf16.msra.mxu0 %v8781_v55 }
0x23e6   :  { %7683 = vmatprep.subr.bf16.mxu0 %v8244_v2 }
0x23e8   :  { %7159 = vmatmul.mubr.msk.f32.vlgmr.msra.gmra.mrb[32].mxu0 %vm697_vm3, %v3136_v57 }
0x23e9   :  { %7685 = vmatpush3.bf16.msra.mxu0 %v8770_v50  ;;  %7180 = vmatprep.mubr.msk.f32.mxu0 %vm8245_vm0, %v8246_v4 }
0x23ea   :  { %7686 = vmatprep.subr.bf16.mxu0 %v8244_v2 }
0x23ed   :  { %7688 = vmatpush3.bf16.msra.mxu0 %v8781_v55 }
0x23ee   :  { %7695 = vmatprep.subr.bf16.mxu0 %v8244_v2 }
0x23f0   :  { %7181 = vmatmul.mubr.msk.f32.vlgmr.msra.gmra.mrb[34].mxu0 %vm697_vm3, %v3286_v58 }
0x23f1   :  { %7697 = vmatpush3.bf16.msra.mxu0 %v8770_v50  ;;  %7202 = vmatprep.mubr.msk.f32.mxu0 %vm8245_vm0, %v8246_v4 }
0x23f2   :  { %7698 = vmatprep.subr.bf16.mxu0 %v8244_v2 }
0x23f5   :  { %7700 = vmatpush3.bf16.msra.mxu0 %v8781_v55 }
0x23f6   :  { %7707 = vmatprep.subr.bf16.mxu0 %v8244_v2 }
0x24ab   :  { %v2832_v62 = vpop.f32.mrb[28].mxu0 }
0x24ac   :  { %v2836_v63 = vadd.f32 %v2832_v62, %v2763_v61  ;;  %v7116_v0 = vpop.f32.mrb[29].mxu0 }
0x24ae   :  { %8012 = vtanh.f32 %v2836_v63  ;;  %v6448_v17 = vmul.f32 -1.442695, %v2836_v63 }
0x24b0   :  { %8014 = vpow2.f32 %v6448_v17 }
0x24b3   :  { %v3056_v5 = vpop.f32.mrb[30].mxu0 }
0x24b4   :  { %v3057_v6 = vadd.f32 %v3056_v5, %v8816_v3  ;;  %v7138_v7 = vpop.f32.mrb[31].mxu0 }
0x24b6   :  { %3060 = vst [vmem:[#allocation3] sm:$0x3] %v3057_v6 }
0x24b8   :  { %v8013_v8 = vpop.eup %8012 }
0x24b9   :  { %2846 = vrot.lane.b32.xlu0 %v8013_v8, %s8247_s24 }
0x24ba   :  { %v8015_v18 = vpop.eup %8014 }
0x24bb   :  { %v3206_v9 = vpop.f32.mrb[32].mxu0  ;;  %v2840_v19 = vadd.f32 1.0, %v8015_v18 }
0x24bc   :  { %v3207_v10 = vadd.f32 %v3206_v9, %v8816_v3  ;;  %v7160_v13 = vpop.f32.mrb[33].mxu0 }
0x24bd   :  { %8016 = vrcp.f32 %v2840_v19 }
0x24be   :  { %3210 = vst [vmem:[#allocation3 + $0x4] sm:$0x3] %v3207_v10 }
0x24c3   :  { %v3356_v12 = vpop.f32.mrb[34].mxu0 }
0x24c4   :  { %v3357_v15 = vadd.f32 %v3356_v12, %v8816_v3  ;;  %v7182_v16 = vpop.f32.mrb[35].mxu0 }
0x24c6   :  { %3360 = vst [vmem:[#allocation3 + $0x8] sm:$0x3] %v3357_v15 }
0x24c7   :  { %v8017_v22 = vpop.eup %8016 }
0x24c8   :  { %v2844_v25 = vmul.f32 %v8017_v22, %v8759_v44 }
0x252b   :  { %v2847_v23 = vpop.permute.xlu0 %2846 }
0x252c   :  { %v2849_v24 = vmul.f32 %v8017_v22, %v2847_v23 }
0x252e   :  { %2851 = vrot.lane.b32.xlu1 %v2849_v24, %s8247_s24 }
0x25a0   :  { %v2852_v27 = vpop.permute.xlu1 %2851 }
0x25a1   :  { %v8824_v11 = vadd.f32 %v2852_v27, %v2844_v25 }
0x25a3   :  { %8018 = vtanh.f32 %v8824_v11 }
0x25ad   :  { %v8019_v28 = vpop.eup %8018 }
0x25ae   :  { %2857 = vrot.lane.b32.xlu0 %v8019_v28, %s8247_s24 }
0x2620   :  { %v2858_v29 = vpop.permute.xlu0 %2857 }
0x2621   :  { %v2860_v30 = vmul.f32 %v8017_v22, %v2858_v29 }
0x2623   :  { %2862 = vrot.lane.b32.xlu1 %v2860_v30, %s8248_s26 }
0x2695   :  { %v2863_v31 = vpop.permute.xlu1 %2862 }
0x2696   :  { %2865 = vst.msk [vmem:[#allocation2 + $0xc] sm:$0x3] %vm800_vm2, %v2863_v31  ;;  %7126 = vmatmul.mubr.msk.f32.vlgmr.msra.gmra.mrb[32].mxu1 %vm697_vm3, %v2863_v31 }
0x2697   :  { %7667 = vmatpush3.bf16.msra.mxu1 %v8770_v50  ;;  %7147 = vmatprep.mubr.msk.f32.mxu1 %vm8245_vm0, %v8246_v4 }
0x2698   :  { %7668 = vmatprep.subr.bf16.mxu1 %v8244_v2 }
0x269b   :  { %7670 = vmatpush3.bf16.msra.mxu1 %v8781_v55 }
0x269c   :  { %7677 = vmatprep.subr.bf16.mxu1 %v8244_v2 }
0x269d   :  { %v3436_v36 = vld [vmem:[#allocation2 + $0xc] sm:$0x3] }
0x269e   :  { %7148 = vmatmul.mubr.msk.f32.vlgmr.msra.gmra.mrb[34].mxu1 %vm697_vm3, %v3061_v35  ;;  %7203 = vmatmul.mubr.msk.f32.vlgmr.msra.gmra.mrb[36].mxu0 %vm697_vm3, %v3436_v36 }
0x269f   :  { %7679 = vmatpush3.bf16.msra.mxu1 %v8770_v50  ;;  %7709 = vmatpush3.bf16.msra.mxu0 %v8842_v32 }
0x26a0   :  { %7680 = vmatprep.subr.bf16.mxu1 %v8244_v2  ;;  %7710 = vmatprep.subr.bf16.mxu0 %v8244_v2 }
0x26a1   :  { %7169 = vmatprep.mubr.msk.f32.mxu1 %vm8245_vm0, %v8246_v4  ;;  %7224 = vmatprep.mubr.msk.f32.mxu0 %vm8245_vm0, %v8246_v4 }
0x26a3   :  { %7682 = vmatpush3.bf16.msra.mxu1 %v8781_v55  ;;  %7712 = vmatpush3.bf16.msra.mxu0 %v8855_v37 }
0x26a4   :  { %7689 = vmatprep.subr.bf16.mxu1 %v8244_v2  ;;  %7719 = vmatprep.subr.bf16.mxu0 %v8244_v2 }
0x26a6   :  { %7170 = vmatmul.mubr.msk.f32.vlgmr.msra.gmra.mrb[36].mxu1 %vm697_vm3, %v3211_v38  ;;  %7225 = vmatmul.mubr.f32.vlgmr.msra.gmra.mrb[38].mxu0 %v8246_v4 }
0x26a7   :  { %7691 = vmatpush3.bf16.msra.mxu1 %v8770_v50  ;;  %7191 = vmatprep.mubr.msk.f32.mxu1 %vm8245_vm0, %v8246_v4 }
0x26a8   :  { %7692 = vmatprep.subr.bf16.mxu1 %v8244_v2  ;;  %7721 = vmatpush3.bf16.msra.mxu0 %v8842_v32 }
0x26a9   :  { %7722 = vmatprep.subr.bf16.mxu0 %v8244_v2  ;;  %7246 = vmatprep.mubr.msk.f32.mxu0 %vm8245_vm0, %v8246_v4 }
0x26ab   :  { %7694 = vmatpush3.bf16.msra.mxu1 %v8781_v55 }
0x26ac   :  { %7701 = vmatprep.subr.bf16.mxu1 %v8244_v2  ;;  %7724 = vmatpush3.bf16.msra.mxu0 %v8855_v37 }
0x26ad   :  { %7731 = vmatprep.subr.bf16.mxu0 %v8244_v2 }
0x26ae   :  { %7192 = vmatmul.mubr.msk.f32.vlgmr.msra.gmra.mrb[38].mxu1 %vm697_vm3, %v3361_v21 }
0x26af   :  { %7703 = vmatpush3.bf16.msra.mxu1 %v8770_v50  ;;  %7213 = vmatprep.mubr.msk.f32.mxu1 %vm8245_vm0, %v8246_v4  ;;  %v3586_v50 = vld [vmem:[#allocation3] sm:$0x3] }
0x26b0   :  { %7704 = vmatprep.subr.bf16.mxu1 %v8244_v2 }
0x26b3   :  { %7706 = vmatpush3.bf16.msra.mxu1 %v8781_v55 }
0x26b4   :  { %7713 = vmatprep.subr.bf16.mxu1 %v8244_v2 }
0x2769   :  { %v2935_v40 = vpop.f32.mrb[32].mxu1 }
0x276a   :  { %v2939_v41 = vadd.f32 %v2935_v40, %v2866_v39  ;;  %v7127_v42 = vpop.f32.mrb[33].mxu1 }
0x276c   :  { %8020 = vtanh.f32 %v2939_v41  ;;  %v6450_v61 = vmul.f32 -1.442695, %v2939_v41 }
0x2771   :  { %v3131_v26 = vpop.f32.mrb[34].mxu1  ;;  %v3506_v43 = vpop.f32.mrb[36].mxu0 }
0x2772   :  { %v3132_v44 = vadd.f32 %v3131_v26, %v8816_v3  ;;  %v7149_v45 = vpop.f32.mrb[35].mxu1  ;;  %v3507_v46 = vadd.f32 %v3506_v43, %v8816_v3  ;;  %v7204_v47 = vpop.f32.mrb[37].mxu0 }
0x2774   :  { %3135 = vst [vmem:[#allocation3 + $0x2] sm:$0x3] %v3132_v44  ;;  %3510 = vst [vmem:[#allocation3 + $0xc] sm:$0x3] %v3507_v46 }
0x2776   :  { %v8021_v48 = vpop.eup %8020 }
0x2777   :  { %2949 = vrot.lane.b32.xlu0 %v8021_v48, %s8247_s24 }
0x2779   :  { %v3281_v49 = vpop.f32.mrb[36].mxu1  ;;  %v3653_v51 = vpop.f32.mrb[38].mxu0 }
0x277a   :  { %v3282_v52 = vadd.f32 %v3281_v49, %v8816_v3  ;;  %v3657_v53 = vadd.f32 %v3653_v51, %v3586_v50  ;;  %v7171_v55 = vpop.f32.mrb[37].mxu1  ;;  %v7226_v56 = vpop.f32.mrb[39].mxu0  ;;  %v3790_v49 = vld [vmem:[#allocation3 + $0x4] sm:$0x3] }
0x277b   :  { %v3687_v33 = vld [vmem:[#allocation3 + $0x2] sm:$0x3] }
0x277c   :  { %3285 = vst [vmem:[#allocation3 + $0x6] sm:$0x3] %v3282_v52  ;;  %8022 = vtanh.f32 %v3657_v53  ;;  %v6459_v63 = vmul.f32 -1.442695, %v3657_v53 }
0x277d   :  { %8024 = vpow2.f32 %v6450_v61 }
0x277e   :  { %8026 = vpow2.f32 %v6459_v63 }
0x2781   :  { %v3431_v57 = vpop.f32.mrb[38].mxu1 }
0x2782   :  { %v3432_v58 = vadd.f32 %v3431_v57, %v8816_v3  ;;  %v7193_v59 = vpop.f32.mrb[39].mxu1 }
0x2784   :  { %3435 = vst [vmem:[#allocation3 + $0xa] sm:$0x3] %v3432_v58 }
0x2786   :  { %v8023_v60 = vpop.eup %8022 }
0x2787   :  { %3667 = vrot.lane.b32.xlu1 %v8023_v60, %s8247_s24  ;;  %v8025_v62 = vpop.eup %8024 }
0x2788   :  { %v2943_v0 = vadd.f32 1.0, %v8025_v62  ;;  %v8027_v1 = vpop.eup %8026 }
0x2789   :  { %v3661_v8 = vadd.f32 1.0, %v8027_v1 }
0x278a   :  { %8028 = vrcp.f32 %v2943_v0 }
0x278b   :  { %8030 = vrcp.f32 %v3661_v8 }
0x2794   :  { %v8029_v5 = vpop.eup %8028 }
0x2795   :  { %v8031_v9 = vpop.eup %8030  ;;  %v2947_v12 = vmul.f32 %v8029_v5, %v8824_v11 }
0x2796   :  { %v3665_v18 = vmul.f32 0.0, %v8031_v9 }
0x27e9   :  { %v2950_v6 = vpop.permute.xlu0 %2949 }
0x27ea   :  { %v2952_v7 = vmul.f32 %v8029_v5, %v2950_v6 }
0x27ec   :  { %2954 = vrot.lane.b32.xlu0 %v2952_v7, %s8247_s24  ;;  %v3893_v7 = vld [vmem:[#allocation3 + $0x6] sm:$0x3] }
0x27f9   :  { %v3668_v10 = vpop.permute.xlu1 %3667 }
0x27fa   :  { %v3670_v13 = vmul.f32 %v8031_v9, %v3668_v10 }
0x27fc   :  { %3672 = vrot.lane.b32.xlu1 %v3670_v13, %s8247_s24 }
0x285e   :  { %v2955_v15 = vpop.permute.xlu0 %2954 }
0x285f   :  { %v2957_v16 = vadd.f32 %v2955_v15, %v2947_v12 }
0x2861   :  { %8032 = vtanh.f32 %v2957_v16 }
0x286b   :  { %v8033_v17 = vpop.eup %8032 }
0x286c   :  { %2960 = vrot.lane.b32.xlu0 %v8033_v17, %s8247_s24 }
0x286e   :  { %v3673_v19 = vpop.permute.xlu1 %3672 }
0x286f   :  { %v3675_v22 = vadd.f32 %v3673_v19, %v3665_v18 }
0x2871   :  { %8034 = vtanh.f32 %v3675_v22 }
0x287b   :  { %v8035_v23 = vpop.eup %8034 }
0x287c   :  { %3678 = vrot.lane.b32.xlu1 %v8035_v23, %s8247_s24 }
0x28de   :  { %v2961_v24 = vpop.permute.xlu0 %2960 }
0x28df   :  { %v2963_v25 = vmul.f32 %v8029_v5, %v2961_v24 }
0x28e1   :  { %2965 = vrot.lane.b32.xlu0 %v2963_v25, %s8248_s26 }
0x28ee   :  { %v3679_v27 = vpop.permute.xlu1 %3678 }
0x28ef   :  { %v3681_v28 = vmul.f32 %v8031_v9, %v3679_v27 }
0x28f1   :  { %3683 = vrot.lane.b32.xlu1 %v3681_v28, %s8248_s26 }
0x2953   :  { %v2966_v11 = vpop.permute.xlu0 %2965 }
0x2954   :  { %2968 = vst.msk [vmem:[#allocation2 + $0xe] sm:$0x3] %vm800_vm2, %v2966_v11 }
0x295b   :  { %v3511_v29 = vld [vmem:[#allocation2 + $0xe] sm:$0x3] }
0x295c   :  { %7214 = vmatmul.mubr.msk.f32.vlgmr.msra.gmra.mrb[40].mxu1 %vm697_vm3, %v3511_v29  ;;  %v3996_v29 = vld [vmem:[#allocation3 + $0x8] sm:$0x3] }
0x295d   :  { %7715 = vmatpush3.bf16.msra.mxu1 %v8842_v32  ;;  %7235 = vmatprep.mubr.msk.f32.mxu1 %vm8245_vm0, %v8246_v4 }
0x295e   :  { %7716 = vmatprep.subr.bf16.mxu1 %v8244_v2 }
0x2961   :  { %7718 = vmatpush3.bf16.msra.mxu1 %v8855_v37 }
0x2962   :  { %7725 = vmatprep.subr.bf16.mxu1 %v8244_v2 }
0x2963   :  { %v3684_v30 = vpop.permute.xlu1 %3683 }
0x2964   :  { %3686 = vst.msk [vmem:[#allocation2] sm:$0x3] %vm800_vm2, %v3684_v30  ;;  %7236 = vmatmul.mubr.msk.f32.vlgmr.msra.gmra.mrb[42].mxu1 %vm697_vm3, %v3684_v30 }
0x2965   :  { %7727 = vmatpush3.bf16.msra.mxu1 %v8842_v32  ;;  %7257 = vmatprep.mubr.msk.f32.mxu1 %vm8245_vm0, %v8246_v4 }
0x2966   :  { %7728 = vmatprep.subr.bf16.mxu1 %v8244_v2 }
0x2969   :  { %7730 = vmatpush3.bf16.msra.mxu1 %v8855_v37 }
0x296a   :  { %7737 = vmatprep.subr.bf16.mxu1 %v8244_v2 }
0x2a2f   :  { %v3581_v31 = vpop.f32.mrb[40].mxu1 }
0x2a30   :  { %v3582_v14 = vadd.f32 %v3581_v31, %v8816_v3  ;;  %v7215_v54 = vpop.f32.mrb[41].mxu1 }
0x2a32   :  { %3585 = vst [vmem:[#allocation3 + $0xe] sm:$0x3] %v3582_v14 }
0x2a37   :  { %v3756_v34 = vpop.f32.mrb[42].mxu1 }
0x2a38   :  { %v3760_v35 = vadd.f32 %v3756_v34, %v3687_v33  ;;  %v7237_v36 = vpop.f32.mrb[43].mxu1 }
0x2a3a   :  { %8036 = vtanh.f32 %v3760_v35  ;;  %v6461_v21 = vmul.f32 -1.442695, %v3760_v35 }
0x2a3c   :  { %8038 = vpow2.f32 %v6461_v21 }
0x2a44   :  { %v8037_v38 = vpop.eup %8036 }
0x2a45   :  { %3770 = vrot.lane.b32.xlu0 %v8037_v38, %s8247_s24 }
0x2a46   :  { %v8039_v39 = vpop.eup %8038 }
0x2a47   :  { %v3764_v40 = vadd.f32 1.0, %v8039_v39 }
0x2a49   :  { %8040 = vrcp.f32 %v3764_v40 }
0x2a53   :  { %v8041_v41 = vpop.eup %8040 }
0x2a54   :  { %v3768_v3 = vmul.f32 %v8041_v41, %v3675_v22 }
0x2ab7   :  { %v3771_v42 = vpop.permute.xlu0 %3770 }
0x2ab8   :  { %v3773_v26 = vmul.f32 %v8041_v41, %v3771_v42 }
0x2aba   :  { %3775 = vrot.lane.b32.xlu1 %v3773_v26, %s8247_s24 }
0x2b2c   :  { %v3776_v43 = vpop.permute.xlu1 %3775 }
0x2b2d   :  { %v3778_v44 = vadd.f32 %v3776_v43, %v3768_v3 }
0x2b2f   :  { %8042 = vtanh.f32 %v3778_v44 }
0x2b39   :  { %v8043_v45 = vpop.eup %8042 }
0x2b3a   :  { %3781 = vrot.lane.b32.xlu0 %v8043_v45, %s8247_s24 }
0x2bac   :  { %v3782_v46 = vpop.permute.xlu0 %3781 }
0x2bad   :  { %v3784_v47 = vmul.f32 %v8041_v41, %v3782_v46 }
0x2baf   :  { %3786 = vrot.lane.b32.xlu1 %v3784_v47, %s8248_s26 }
0x2c21   :  { %v3787_v48 = vpop.permute.xlu1 %3786 }
0x2c22   :  { %3789 = vst.msk [vmem:[#allocation2 + $0x2] sm:$0x3] %vm800_vm2, %v3787_v48  ;;  %7247 = vmatmul.mubr.msk.f32.vlgmr.msra.gmra.mrb[40].mxu0 %vm697_vm3, %v3787_v48 }
0x2c23   :  { %7733 = vmatpush3.bf16.msra.mxu0 %v8842_v32  ;;  %7268 = vmatprep.mubr.msk.f32.mxu0 %vm8245_vm0, %v8246_v4 }
0x2c24   :  { %7734 = vmatprep.subr.bf16.mxu0 %v8244_v2 }
0x2c27   :  { %7736 = vmatpush3.bf16.msra.mxu0 %v8855_v37 }
0x2c28   :  { %7743 = vmatprep.subr.bf16.mxu0 %v8244_v2 }
0x2cf5   :  { %v3859_v50 = vpop.f32.mrb[40].mxu0 }
0x2cf6   :  { %v3863_v51 = vadd.f32 %v3859_v50, %v3790_v49  ;;  %v7248_v52 = vpop.f32.mrb[41].mxu0 }
0x2cf8   :  { %8044 = vtanh.f32 %v3863_v51  ;;  %v6463_v55 = vmul.f32 -1.442695, %v3863_v51 }
0x2cfa   :  { %8046 = vpow2.f32 %v6463_v55 }
0x2d02   :  { %v8045_v53 = vpop.eup %8044 }
0x2d03   :  { %3873 = vrot.lane.b32.xlu0 %v8045_v53, %s8247_s24 }
0x2d04   :  { %v8047_v56 = vpop.eup %8046 }
0x2d05   :  { %v3867_v57 = vadd.f32 1.0, %v8047_v56 }
0x2d07   :  { %8048 = vrcp.f32 %v3867_v57 }
0x2d11   :  { %v8049_v58 = vpop.eup %8048 }
0x2d12   :  { %v3871_v61 = vmul.f32 %v8049_v58, %v3778_v44  ;;  %v4099_v44 = vld [vmem:[#allocation3 + $0xa] sm:$0x3] }
0x2d75   :  { %v3874_v59 = vpop.permute.xlu0 %3873 }
0x2d76   :  { %v3876_v60 = vmul.f32 %v8049_v58, %v3874_v59 }
0x2d78   :  { %3878 = vrot.lane.b32.xlu1 %v3876_v60, %s8247_s24  ;;  %v4411_v60 = vld [vmem:[%s9511_s13] sm:$0xff] }
0x2dea   :  { %v3879_v62 = vpop.permute.xlu1 %3878 }
0x2deb   :  { %v3881_v63 = vadd.f32 %v3879_v62, %v3871_v61  ;;  %v4412_v61 = vld [vmem:[%s9511_s13 + $0x8] sm:$0xff] }
0x2dec   :  { %v8979_v62 = vpack.c.bf16 %v4412_v61, %v4411_v60 }
0x2ded   :  { %8050 = vtanh.f32 %v3881_v63 }
0x2df7   :  { %v8051_v0 = vpop.eup %8050 }
0x2df8   :  { %3884 = vrot.lane.b32.xlu0 %v8051_v0, %s8247_s24  ;;  %v4414_v0 = vld [vmem:[%s9511_s13 + $0x18] sm:$0xff] }
0x2e6a   :  { %v3885_v1 = vpop.permute.xlu0 %3884 }
0x2e6b   :  { %v3887_v5 = vmul.f32 %v8049_v58, %v3885_v1 }
0x2e6d   :  { %3889 = vrot.lane.b32.xlu1 %v3887_v5, %s8248_s26 }
0x2edf   :  { %v3890_v6 = vpop.permute.xlu1 %3889 }
0x2ee0   :  { %3892 = vst.msk [vmem:[#allocation2 + $0x4] sm:$0x3] %vm800_vm2, %v3890_v6  ;;  %7258 = vmatmul.mubr.msk.f32.vlgmr.msra.gmra.mrb[44].mxu1 %vm697_vm3, %v3890_v6  ;;  %v4419_v6 = vld [vmem:[#allocation2] sm:$0x3] }
0x2ee1   :  { %7739 = vmatpush3.bf16.msra.mxu1 %v8842_v32  ;;  %7279 = vmatprep.mubr.msk.f32.mxu1 %vm8245_vm0, %v8246_v4 }
0x2ee2   :  { %7740 = vmatprep.subr.bf16.mxu1 %v8244_v2 }
0x2ee5   :  { %7742 = vmatpush3.bf16.msra.mxu1 %v8855_v37 }
0x2ee6   :  { %7749 = vmatprep.subr.bf16.mxu1 %v8244_v2 }
0x2fb3   :  { %v3962_v8 = vpop.f32.mrb[44].mxu1 }
0x2fb4   :  { %v3966_v9 = vadd.f32 %v3962_v8, %v3893_v7  ;;  %v7259_v10 = vpop.f32.mrb[45].mxu1  ;;  %v4575_v7 = vld [vmem:[#allocation2 + $0x4] sm:$0x3] }
0x2fb5   :  { %v4409_v10 = vld [vmem:[%s9514_s16] sm:$0x1] }
0x2fb6   :  { %8052 = vtanh.f32 %v3966_v9  ;;  %v6465_v12 = vmul.f32 -1.442695, %v3966_v9  ;;  %v4408_v9 = vld [vmem:[%s9513_s15] sm:$0x1] }
0x2fb8   :  { %8054 = vpow2.f32 %v6465_v12 }
0x2fc0   :  { %v8053_v13 = vpop.eup %8052 }
0x2fc1   :  { %3976 = vrot.lane.b32.xlu0 %v8053_v13, %s8247_s24  ;;  %v4202_v13 = vld [vmem:[#allocation3 + $0xc] sm:$0x3] }
0x2fc2   :  { %v8055_v15 = vpop.eup %8054 }
0x2fc3   :  { %v3970_v16 = vadd.f32 1.0, %v8055_v15 }
0x2fc5   :  { %8056 = vrcp.f32 %v3970_v16 }
0x2fcf   :  { %v8057_v17 = vpop.eup %8056 }
0x2fd0   :  { %v3974_v22 = vmul.f32 %v8057_v17, %v3881_v63  ;;  %v4413_v63 = vld [vmem:[%s9511_s13 + $0x10] sm:$0xff] }
0x2fd1   :  { %v8990_v5 = vpack.c.bf16 %v4414_v0, %v4413_v63 }
0x3033   :  { %v3977_v18 = vpop.permute.xlu0 %3976 }
0x3034   :  { %v3979_v19 = vmul.f32 %v8057_v17, %v3977_v18 }
0x3036   :  { %3981 = vrot.lane.b32.xlu1 %v3979_v19, %s8247_s24 }
0x30a8   :  { %v3982_v23 = vpop.permute.xlu1 %3981 }
0x30a9   :  { %v3984_v24 = vadd.f32 %v3982_v23, %v3974_v22 }
0x30ab   :  { %8058 = vtanh.f32 %v3984_v24 }
0x30b5   :  { %v8059_v25 = vpop.eup %8058 }
0x30b6   :  { %3987 = vrot.lane.b32.xlu0 %v8059_v25, %s8247_s24 }
0x3128   :  { %v3988_v27 = vpop.permute.xlu0 %3987 }
0x3129   :  { %v3990_v28 = vmul.f32 %v8057_v17, %v3988_v27  ;;  %v4410_v17 = vadd.f32 %v4409_v10, %v4408_v9 }
0x312b   :  { %3992 = vrot.lane.b32.xlu1 %v3990_v28, %s8248_s26  ;;  %v9025_v18 = vrot.slane %v4410_v17, %v8437_v20 }
0x319d   :  { %v3993_v11 = vpop.permute.xlu1 %3992 }
0x319e   :  { %3995 = vst.msk [vmem:[#allocation2 + $0x6] sm:$0x3] %vm800_vm2, %v3993_v11  ;;  %7269 = vmatmul.mubr.msk.f32.vlgmr.msra.gmra.mrb[42].mxu0 %vm697_vm3, %v3993_v11 }
0x319f   :  { %7745 = vmatpush3.bf16.msra.mxu0 %v8842_v32  ;;  %7290 = vmatprep.mubr.msk.f32.mxu0 %vm8245_vm0, %v8246_v4 }
0x31a0   :  { %7746 = vmatprep.subr.bf16.mxu0 %v8244_v2 }
0x31a3   :  { %7748 = vmatpush3.bf16.msra.mxu0 %v8855_v37 }
0x31a4   :  { %7755 = vmatprep.subr.bf16.mxu0 %v8244_v2 }
0x3271   :  { %v4065_v30 = vpop.f32.mrb[42].mxu0 }
0x3272   :  { %v4069_v31 = vadd.f32 %v4065_v30, %v3996_v29  ;;  %v7270_v14 = vpop.f32.mrb[43].mxu0 }
0x3274   :  { %8060 = vtanh.f32 %v4069_v31  ;;  %v6467_v33 = vmul.f32 -1.442695, %v4069_v31 }
0x3276   :  { %8062 = vpow2.f32 %v6467_v33 }
0x327e   :  { %v8061_v54 = vpop.eup %8060 }
0x327f   :  { %4079 = vrot.lane.b32.xlu0 %v8061_v54, %s8247_s24 }
0x3280   :  { %v8063_v34 = vpop.eup %8062 }
0x3281   :  { %v4073_v35 = vadd.f32 1.0, %v8063_v34 }
0x3283   :  { %8064 = vrcp.f32 %v4073_v35 }
0x328d   :  { %v8065_v36 = vpop.eup %8064 }
0x328e   :  { %v4077_v39 = vmul.f32 %v8065_v36, %v3984_v24 }
0x32f1   :  { %v4080_v38 = vpop.permute.xlu0 %4079 }
0x32f2   :  { %v4082_v21 = vmul.f32 %v8065_v36, %v4080_v38 }
0x32f4   :  { %4084 = vrot.lane.b32.xlu1 %v4082_v21, %s8247_s24 }
0x3366   :  { %v4085_v40 = vpop.permute.xlu1 %4084 }
0x3367   :  { %v4087_v41 = vadd.f32 %v4085_v40, %v4077_v39 }
0x3369   :  { %8066 = vtanh.f32 %v4087_v41 }
0x3373   :  { %v8067_v42 = vpop.eup %8066 }
0x3374   :  { %4090 = vrot.lane.b32.xlu0 %v8067_v42, %s8247_s24  ;;  %v9047_v42 = vld [vmem:[%s9512_s14] sm:$0xff] }
0x33e6   :  { %v4091_v26 = vpop.permute.xlu0 %4090 }
0x33e7   :  { %v4093_v3 = vmul.f32 %v8065_v36, %v4091_v26  ;;  %v9052_v26 = vld [vmem:[%s9512_s14 + $0x8] sm:$0xff] }
0x33e9   :  { %4095 = vrot.lane.b32.xlu1 %v4093_v3, %s8248_s26  ;;  %v9057_v3 = vpack.c.bf16 %v9052_v26, %v9047_v42 }
0x345b   :  { %v4096_v43 = vpop.permute.xlu1 %4095 }
0x345c   :  { %4098 = vst.msk [vmem:[#allocation2 + $0x8] sm:$0x3] %vm800_vm2, %v4096_v43  ;;  %7280 = vmatmul.mubr.msk.f32.vlgmr.msra.gmra.mrb[46].mxu1 %vm697_vm3, %v4096_v43  ;;  %v9063_v43 = vld [vmem:[%s9512_s14 + $0x10] sm:$0xff] }
0x345d   :  { %7751 = vmatpush3.bf16.msra.mxu1 %v8842_v32  ;;  %7301 = vmatprep.mubr.msk.f32.mxu1 %vm8245_vm0, %v8246_v4 }
0x345e   :  { %7752 = vmatprep.subr.bf16.mxu1 %v8244_v2 }
0x3461   :  { %7754 = vmatpush3.bf16.msra.mxu1 %v8855_v37 }
0x3462   :  { %7761 = vmatprep.subr.bf16.mxu1 %v8244_v2 }
0x3463   :  { %v4725_v8 = vld [vmem:[#allocation2 + $0x8] sm:$0x3] }
0x352f   :  { %v4168_v45 = vpop.f32.mrb[46].mxu1 }
0x3530   :  { %v4172_v46 = vadd.f32 %v4168_v45, %v4099_v44  ;;  %v7281_v47 = vpop.f32.mrb[47].mxu1  ;;  %v9068_v44 = vld [vmem:[%s9512_s14 + $0x18] sm:$0xff]  ;;  %v4500_v45 = vld [vmem:[#allocation2 + $0x2] sm:$0x3] }
0x3531   :  { %v9076_v47 = vpack.c.bf16 %v9068_v44, %v9063_v43 }
0x3532   :  { %8068 = vtanh.f32 %v4172_v46  ;;  %v6469_v49 = vmul.f32 -1.442695, %v4172_v46 }
0x3534   :  { %8070 = vpow2.f32 %v6469_v49 }
0x353c   :  { %v8069_v48 = vpop.eup %8068 }
0x353d   :  { %4182 = vrot.lane.b32.xlu0 %v8069_v48, %s8247_s24  ;;  %v4650_v48 = vld [vmem:[#allocation2 + $0x6] sm:$0x3] }
0x353e   :  { %v8071_v32 = vpop.eup %8070 }
0x353f   :  { %v4176_v50 = vadd.f32 1.0, %v8071_v32  ;;  %v4305_v32 = vld [vmem:[#allocation3 + $0xe] sm:$0x3] }
0x3541   :  { %8072 = vrcp.f32 %v4176_v50 }
0x354b   :  { %v8073_v51 = vpop.eup %8072 }
0x354c   :  { %v4180_v37 = vmul.f32 %v8073_v51, %v4087_v41 }
0x35af   :  { %v4183_v52 = vpop.permute.xlu0 %4182 }
0x35b0   :  { %v4185_v53 = vmul.f32 %v8073_v51, %v4183_v52 }
0x35b2   :  { %4187 = vrot.lane.b32.xlu1 %v4185_v53, %s8247_s24 }
0x3624   :  { %v4188_v55 = vpop.permute.xlu1 %4187 }
0x3625   :  { %v8968_v56 = vadd.f32 %v4188_v55, %v4180_v37 }
0x3627   :  { %8074 = vtanh.f32 %v8968_v56 }
0x3631   :  { %v8075_v57 = vpop.eup %8074 }
0x3632   :  { %4193 = vrot.lane.b32.xlu0 %v8075_v57, %s8247_s24 }
0x36a4   :  { %v4194_v58 = vpop.permute.xlu0 %4193 }
0x36a5   :  { %v4196_v59 = vmul.f32 %v8073_v51, %v4194_v58 }
0x36a7   :  { %4198 = vrot.lane.b32.xlu1 %v4196_v59, %s8248_s26 }
0x3719   :  { %v4199_v1 = vpop.permute.xlu1 %4198 }
0x371a   :  { %4201 = vst.msk [vmem:[#allocation2 + $0xa] sm:$0x3] %vm800_vm2, %v4199_v1  ;;  %7291 = vmatmul.mubr.msk.f32.vlgmr.msra.gmra.mrb[44].mxu0 %vm697_vm3, %v4199_v1 }
0x371b   :  { %7757 = vmatpush3.bf16.msra.mxu0 %v8979_v62  ;;  %7312 = vmatprep.mubr.msk.f32.mxu0 %vm8245_vm0, %v8246_v4 }
0x371c   :  { %7758 = vmatprep.subr.bf16.mxu0 %v8244_v2 }
0x371f   :  { %7760 = vmatpush3.bf16.msra.mxu0 %v8990_v5 }
0x3720   :  { %7767 = vmatprep.subr.bf16.mxu0 %v8244_v2 }
0x3721   :  { %v4800_v49 = vld [vmem:[#allocation2 + $0xa] sm:$0x3] }
0x3722   :  { %7313 = vmatmul.mubr.msk.f32.vlgmr.msra.gmra.mrb[46].mxu0 %vm697_vm3, %v4419_v6 }
0x3723   :  { %7769 = vmatpush3.bf16.msra.mxu0 %v8979_v62  ;;  %7334 = vmatprep.mubr.msk.f32.mxu0 %vm8245_vm0, %v8246_v4 }
0x3724   :  { %7770 = vmatprep.subr.bf16.mxu0 %v8244_v2 }
0x3727   :  { %7772 = vmatpush3.bf16.msra.mxu0 %v8990_v5 }
0x3728   :  { %7779 = vmatprep.subr.bf16.mxu0 %v8244_v2 }
0x372a   :  { %7335 = vmatmul.mubr.msk.f32.vlgmr.msra.gmra.mrb[48].mxu0 %vm697_vm3, %v4575_v7 }
0x372b   :  { %7781 = vmatpush3.bf16.msra.mxu0 %v8979_v62  ;;  %7356 = vmatprep.mubr.msk.f32.mxu0 %vm8245_vm0, %v8246_v4 }
0x372c   :  { %7782 = vmatprep.subr.bf16.mxu0 %v8244_v2 }
0x372f   :  { %7784 = vmatpush3.bf16.msra.mxu0 %v8990_v5 }
0x3730   :  { %7791 = vmatprep.subr.bf16.mxu0 %v8244_v2 }
0x3732   :  { %7357 = vmatmul.mubr.msk.f32.vlgmr.msra.gmra.mrb[50].mxu0 %vm697_vm3, %v4725_v8 }
0x3733   :  { %7793 = vmatpush3.bf16.msra.mxu0 %v8979_v62  ;;  %7378 = vmatprep.mubr.msk.f32.mxu0 %vm8245_vm0, %v8246_v4 }
0x3734   :  { %7794 = vmatprep.subr.bf16.mxu0 %v8244_v2 }
0x3737   :  { %7796 = vmatpush3.bf16.msra.mxu0 %v8990_v5 }
0x3738   :  { %7803 = vmatprep.subr.bf16.mxu0 %v8244_v2 }
0x37ed   :  { %v4271_v12 = vpop.f32.mrb[44].mxu0 }
0x37ee   :  { %v4275_v15 = vadd.f32 %v4271_v12, %v4202_v13  ;;  %v7292_v16 = vpop.f32.mrb[45].mxu0 }
0x37f0   :  { %8076 = vtanh.f32 %v4275_v15  ;;  %v6471_v20 = vmul.f32 -1.442695, %v4275_v15 }
0x37f2   :  { %8078 = vpow2.f32 %v6471_v20 }
0x37f5   :  { %v4495_v19 = vpop.f32.mrb[46].mxu0 }
0x37f6   :  { %v4496_v22 = vadd.f32 %v4495_v19, %v9025_v18  ;;  %v7314_v23 = vpop.f32.mrb[47].mxu0 }
0x37f8   :  { %4499 = vst [vmem:[#allocation3] sm:$0x3] %v4496_v22 }
0x37fa   :  { %v8077_v24 = vpop.eup %8076 }
0x37fb   :  { %4285 = vrot.lane.b32.xlu0 %v8077_v24, %s8247_s24 }
0x37fc   :  { %v8079_v31 = vpop.eup %8078 }
0x37fd   :  { %v4645_v25 = vpop.f32.mrb[48].mxu0  ;;  %v4279_v14 = vadd.f32 1.0, %v8079_v31 }
0x37fe   :  { %v4646_v27 = vadd.f32 %v4645_v25, %v9025_v18  ;;  %v7336_v28 = vpop.f32.mrb[49].mxu0 }
0x37ff   :  { %8080 = vrcp.f32 %v4279_v14  ;;  %v5025_v61 = vld [vmem:[#allocation3] sm:$0x3] }
0x3800   :  { %4649 = vst [vmem:[#allocation3 + $0x4] sm:$0x3] %v4646_v27 }
0x3805   :  { %v4795_v11 = vpop.f32.mrb[50].mxu0 }
0x3806   :  { %v4796_v29 = vadd.f32 %v4795_v11, %v9025_v18  ;;  %v7358_v30 = vpop.f32.mrb[51].mxu0 }
0x3808   :  { %4799 = vst [vmem:[#allocation3 + $0x8] sm:$0x3] %v4796_v29 }
0x3809   :  { %v8081_v54 = vpop.eup %8080 }
0x380a   :  { %v4283_v35 = vmul.f32 %v8081_v54, %v8968_v56 }
0x386d   :  { %v4286_v33 = vpop.permute.xlu0 %4285 }
0x386e   :  { %v4288_v34 = vmul.f32 %v8081_v54, %v4286_v33 }
0x3870   :  { %4290 = vrot.lane.b32.xlu1 %v4288_v34, %s8247_s24 }
0x38e2   :  { %v4291_v36 = vpop.permute.xlu1 %4290 }
0x38e3   :  { %v9033_v38 = vadd.f32 %v4291_v36, %v4283_v35 }
0x38e5   :  { %8082 = vtanh.f32 %v9033_v38 }
0x38ef   :  { %v8083_v21 = vpop.eup %8082 }
0x38f0   :  { %4296 = vrot.lane.b32.xlu0 %v8083_v21, %s8247_s24 }
0x3962   :  { %v4297_v39 = vpop.permute.xlu0 %4296 }
0x3963   :  { %v4299_v40 = vmul.f32 %v8081_v54, %v4297_v39 }
0x3965   :  { %4301 = vrot.lane.b32.xlu1 %v4299_v40, %s8248_s26 }
0x39d7   :  { %v4302_v41 = vpop.permute.xlu1 %4301 }
0x39d8   :  { %4304 = vst.msk [vmem:[#allocation2 + $0xc] sm:$0x3] %vm800_vm2, %v4302_v41  ;;  %7302 = vmatmul.mubr.msk.f32.vlgmr.msra.gmra.mrb[48].mxu1 %vm697_vm3, %v4302_v41 }
0x39d9   :  { %7763 = vmatpush3.bf16.msra.mxu1 %v8979_v62  ;;  %7323 = vmatprep.mubr.msk.f32.mxu1 %vm8245_vm0, %v8246_v4 }
0x39da   :  { %7764 = vmatprep.subr.bf16.mxu1 %v8244_v2 }
0x39dd   :  { %7766 = vmatpush3.bf16.msra.mxu1 %v8990_v5 }
0x39de   :  { %7773 = vmatprep.subr.bf16.mxu1 %v8244_v2 }
0x39df   :  { %v4875_v46 = vld [vmem:[#allocation2 + $0xc] sm:$0x3] }
0x39e0   :  { %7324 = vmatmul.mubr.msk.f32.vlgmr.msra.gmra.mrb[50].mxu1 %vm697_vm3, %v4500_v45  ;;  %7379 = vmatmul.mubr.msk.f32.vlgmr.msra.gmra.mrb[52].mxu0 %vm697_vm3, %v4875_v46 }
0x39e1   :  { %7775 = vmatpush3.bf16.msra.mxu1 %v8979_v62  ;;  %7805 = vmatpush3.bf16.msra.mxu0 %v9057_v3 }
0x39e2   :  { %7776 = vmatprep.subr.bf16.mxu1 %v8244_v2  ;;  %7806 = vmatprep.subr.bf16.mxu0 %v8244_v2 }
0x39e3   :  { %7345 = vmatprep.mubr.msk.f32.mxu1 %vm8245_vm0, %v8246_v4  ;;  %7400 = vmatprep.mubr.msk.f32.mxu0 %vm8245_vm0, %v8246_v4 }
0x39e5   :  { %7778 = vmatpush3.bf16.msra.mxu1 %v8990_v5  ;;  %7808 = vmatpush3.bf16.msra.mxu0 %v9076_v47 }
0x39e6   :  { %7785 = vmatprep.subr.bf16.mxu1 %v8244_v2  ;;  %7815 = vmatprep.subr.bf16.mxu0 %v8244_v2 }
0x39e8   :  { %7346 = vmatmul.mubr.msk.f32.vlgmr.msra.gmra.mrb[52].mxu1 %vm697_vm3, %v4650_v48  ;;  %7401 = vmatmul.mubr.f32.vlgmr.msra.gmra.mrb[54].mxu0 %v8246_v4 }
0x39e9   :  { %7787 = vmatpush3.bf16.msra.mxu1 %v8979_v62  ;;  %7367 = vmatprep.mubr.msk.f32.mxu1 %vm8245_vm0, %v8246_v4 }
0x39ea   :  { %7788 = vmatprep.subr.bf16.mxu1 %v8244_v2  ;;  %7817 = vmatpush3.bf16.msra.mxu0 %v9057_v3 }
0x39eb   :  { %7818 = vmatprep.subr.bf16.mxu0 %v8244_v2  ;;  %7422 = vmatprep.mubr.msk.f32.mxu0 %vm8245_vm0, %v8246_v4 }
0x39ed   :  { %7790 = vmatpush3.bf16.msra.mxu1 %v8990_v5 }
0x39ee   :  { %7797 = vmatprep.subr.bf16.mxu1 %v8244_v2  ;;  %7820 = vmatpush3.bf16.msra.mxu0 %v9076_v47 }
0x39ef   :  { %7827 = vmatprep.subr.bf16.mxu0 %v8244_v2 }
0x39f0   :  { %7368 = vmatmul.mubr.msk.f32.vlgmr.msra.gmra.mrb[54].mxu1 %vm697_vm3, %v4800_v49 }
0x39f1   :  { %7799 = vmatpush3.bf16.msra.mxu1 %v8979_v62  ;;  %7389 = vmatprep.mubr.msk.f32.mxu1 %vm8245_vm0, %v8246_v4 }
0x39f2   :  { %7800 = vmatprep.subr.bf16.mxu1 %v8244_v2 }
0x39f5   :  { %7802 = vmatpush3.bf16.msra.mxu1 %v8990_v5 }
0x39f6   :  { %7809 = vmatprep.subr.bf16.mxu1 %v8244_v2 }
0x3aab   :  { %v4374_v50 = vpop.f32.mrb[48].mxu1 }
0x3aac   :  { %v4378_v51 = vadd.f32 %v4374_v50, %v4305_v32  ;;  %v7303_v52 = vpop.f32.mrb[49].mxu1 }
0x3aae   :  { %8084 = vtanh.f32 %v4378_v51  ;;  %v6473_v10 = vmul.f32 -1.442695, %v4378_v51 }
0x3ab3   :  { %v4570_v53 = vpop.f32.mrb[50].mxu1  ;;  %v4945_v37 = vpop.f32.mrb[52].mxu0 }
0x3ab4   :  { %v4571_v55 = vadd.f32 %v4570_v53, %v9025_v18  ;;  %v7325_v56 = vpop.f32.mrb[51].mxu1  ;;  %v4946_v57 = vadd.f32 %v4945_v37, %v9025_v18  ;;  %v7380_v58 = vpop.f32.mrb[53].mxu0 }
0x3ab6   :  { %4574 = vst [vmem:[#allocation3 + $0x2] sm:$0x3] %v4571_v55  ;;  %4949 = vst [vmem:[#allocation3 + $0xc] sm:$0x3] %v4946_v57 }
0x3ab8   :  { %v8085_v59 = vpop.eup %8084 }
0x3ab9   :  { %4388 = vrot.lane.b32.xlu0 %v8085_v59, %s8247_s24 }
0x3abb   :  { %v4720_v60 = vpop.f32.mrb[52].mxu1  ;;  %v5092_v62 = vpop.f32.mrb[54].mxu0 }
0x3abc   :  { %v4721_v63 = vadd.f32 %v4720_v60, %v9025_v18  ;;  %v5096_v0 = vadd.f32 %v5092_v62, %v5025_v61  ;;  %v7347_v1 = vpop.f32.mrb[53].mxu1  ;;  %v7402_v5 = vpop.f32.mrb[55].mxu0 }
0x3abd   :  { %v5121_v46 = vld [vmem:[#allocation3 + $0x2] sm:$0x3] }
0x3abe   :  { %4724 = vst [vmem:[#allocation3 + $0x6] sm:$0x3] %v4721_v63  ;;  %8086 = vtanh.f32 %v5096_v0  ;;  %v6482_v12 = vmul.f32 -1.442695, %v5096_v0  ;;  %v5222_v63 = vld [vmem:[#allocation3 + $0x4] sm:$0x3] }
0x3abf   :  { %8088 = vpow2.f32 %v6473_v10 }
0x3ac0   :  { %8090 = vpow2.f32 %v6482_v12 }
0x3ac3   :  { %v4870_v6 = vpop.f32.mrb[54].mxu1 }
0x3ac4   :  { %v4871_v7 = vadd.f32 %v4870_v6, %v9025_v18  ;;  %v7369_v8 = vpop.f32.mrb[55].mxu1 }
0x3ac6   :  { %4874 = vst [vmem:[#allocation3 + $0xa] sm:$0x3] %v4871_v7 }
0x3ac8   :  { %v8087_v9 = vpop.eup %8086 }
0x3ac9   :  { %5106 = vrot.lane.b32.xlu1 %v8087_v9, %s8247_s24  ;;  %v8089_v13 = vpop.eup %8088 }
0x3aca   :  { %v4382_v15 = vadd.f32 1.0, %v8089_v13  ;;  %v8091_v16 = vpop.eup %8090 }
0x3acb   :  { %v5100_v23 = vadd.f32 1.0, %v8091_v16 }
0x3acc   :  { %8092 = vrcp.f32 %v4382_v15 }
0x3acd   :  { %8094 = vrcp.f32 %v5100_v23 }
0x3ad6   :  { %v8093_v17 = vpop.eup %8092 }
0x3ad7   :  { %v8095_v24 = vpop.eup %8094  ;;  %v4386_v28 = vmul.f32 %v8093_v17, %v9033_v38 }
0x3ad8   :  { %v5104_v20 = vmul.f32 0.0, %v8095_v24 }
0x3b2b   :  { %v4389_v19 = vpop.permute.xlu0 %4388 }
0x3b2c   :  { %v4391_v22 = vmul.f32 %v8093_v17, %v4389_v19 }
0x3b2e   :  { %4393 = vrot.lane.b32.xlu0 %v4391_v22, %s8247_s24 }
0x3b3b   :  { %v5107_v25 = vpop.permute.xlu1 %5106 }
0x3b3c   :  { %v5109_v27 = vmul.f32 %v8095_v24, %v5107_v25  ;;  %v5323_v25 = vld [vmem:[#allocation3 + $0x6] sm:$0x3] }
0x3b3e   :  { %5111 = vrot.lane.b32.xlu1 %v5109_v27, %s8247_s24 }
0x3ba0   :  { %v4394_v11 = vpop.permute.xlu0 %4393 }
0x3ba1   :  { %v4396_v29 = vadd.f32 %v4394_v11, %v4386_v28 }
0x3ba3   :  { %8096 = vtanh.f32 %v4396_v29 }
0x3bad   :  { %v8097_v30 = vpop.eup %8096 }
0x3bae   :  { %4399 = vrot.lane.b32.xlu0 %v8097_v30, %s8247_s24 }
0x3bb0   :  { %v5112_v31 = vpop.permute.xlu1 %5111 }
0x3bb1   :  { %v5114_v14 = vadd.f32 %v5112_v31, %v5104_v20 }
0x3bb3   :  { %8098 = vtanh.f32 %v5114_v14 }
0x3bbd   :  { %v8099_v54 = vpop.eup %8098 }
0x3bbe   :  { %5117 = vrot.lane.b32.xlu1 %v8099_v54, %s8247_s24 }
0x3c20   :  { %v4400_v33 = vpop.permute.xlu0 %4399 }
0x3c21   :  { %v4402_v34 = vmul.f32 %v8093_v17, %v4400_v33 }
0x3c23   :  { %4404 = vrot.lane.b32.xlu0 %v4402_v34, %s8248_s26 }
0x3c30   :  { %v5118_v35 = vpop.permute.xlu1 %5117 }
0x3c31   :  { %v5120_v36 = vmul.f32 %v8095_v24, %v5118_v35 }
0x3c33   :  { %5123 = vrot.lane.b32.xlu1 %v5120_v36, %s8248_s26 }
0x3c95   :  { %v4405_v38 = vpop.permute.xlu0 %4404 }
0x3c96   :  { %4407 = vst.msk [vmem:[#allocation2 + $0xe] sm:$0x3] %vm800_vm2, %v4405_v38 }
0x3c9d   :  { %v4950_v21 = vld [vmem:[#allocation2 + $0xe] sm:$0x3] }
0x3c9e   :  { %7390 = vmatmul.mubr.msk.f32.vlgmr.msra.gmra.mrb[56].mxu1 %vm697_vm3, %v4950_v21 }
0x3c9f   :  { %7811 = vmatpush3.bf16.msra.mxu1 %v9057_v3  ;;  %7411 = vmatprep.mubr.msk.f32.mxu1 %vm8245_vm0, %v8246_v4 }
0x3ca0   :  { %7812 = vmatprep.subr.bf16.mxu1 %v8244_v2 }
0x3ca3   :  { %7814 = vmatpush3.bf16.msra.mxu1 %v9076_v47 }
0x3ca4   :  { %7821 = vmatprep.subr.bf16.mxu1 %v8244_v2 }
0x3ca5   :  { %v5124_v39 = vpop.permute.xlu1 %5123 }
0x3ca6   :  { %7412 = vmatmul.mubr.msk.f32.vlgmr.msra.gmra.mrb[58].mxu1 %vm697_vm3, %v5124_v39 }
0x3ca7   :  { %7823 = vmatpush3.bf16.msra.mxu1 %v9057_v3  ;;  %7433 = vmatprep.mubr.msk.f32.mxu1 %vm8245_vm0, %v8246_v4 }
0x3ca8   :  { %7824 = vmatprep.subr.bf16.mxu1 %v8244_v2 }
0x3cab   :  { %7826 = vmatpush3.bf16.msra.mxu1 %v9076_v47 }
0x3cac   :  { %7833 = vmatprep.subr.bf16.mxu1 %v8244_v2 }
0x3d71   :  { %v5020_v40 = vpop.f32.mrb[56].mxu1 }
0x3d72   :  { %v5021_v41 = vadd.f32 %v5020_v40, %v9025_v18  ;;  %v7391_v45 = vpop.f32.mrb[57].mxu1 }
0x3d74   :  { %5024 = vst [vmem:[#allocation3 + $0xe] sm:$0x3] %v5021_v41  ;;  %v5424_v41 = vld [vmem:[#allocation3 + $0x8] sm:$0x3] }
0x3d79   :  { %v5193_v48 = vpop.f32.mrb[58].mxu1 }
0x3d7a   :  { %v5197_v49 = vadd.f32 %v5193_v48, %v5121_v46  ;;  %v7413_v32 = vpop.f32.mrb[59].mxu1 }
0x3d7c   :  { %8100 = vtanh.f32 %v5197_v49  ;;  %v6484_v51 = vmul.f32 -1.442695, %v5197_v49 }
0x3d7e   :  { %8102 = vpow2.f32 %v6484_v51 }
0x3d86   :  { %v8101_v50 = vpop.eup %8100 }
0x3d87   :  { %5207 = vrot.lane.b32.xlu0 %v8101_v50, %s8247_s24 }
0x3d88   :  { %v8103_v52 = vpop.eup %8102 }
0x3d89   :  { %v5201_v53 = vadd.f32 1.0, %v8103_v52 }
0x3d8b   :  { %8104 = vrcp.f32 %v5201_v53 }
0x3d95   :  { %v8105_v37 = vpop.eup %8104 }
0x3d96   :  { %v5205_v18 = vmul.f32 %v8105_v37, %v5114_v14 }
0x3df9   :  { %v5208_v55 = vpop.permute.xlu0 %5207 }
0x3dfa   :  { %v5210_v56 = vmul.f32 %v8105_v37, %v5208_v55 }
0x3dfc   :  { %5212 = vrot.lane.b32.xlu1 %v5210_v56, %s8247_s24 }
0x3e6e   :  { %v5213_v57 = vpop.permute.xlu1 %5212 }
0x3e6f   :  { %v5215_v58 = vadd.f32 %v5213_v57, %v5205_v18 }
0x3e71   :  { %8106 = vtanh.f32 %v5215_v58 }
0x3e7b   :  { %v8107_v59 = vpop.eup %8106 }
0x3e7c   :  { %5218 = vrot.lane.b32.xlu0 %v8107_v59, %s8247_s24 }
0x3eee   :  { %v5219_v60 = vpop.permute.xlu0 %5218 }
0x3eef   :  { %v5221_v61 = vmul.f32 %v8105_v37, %v5219_v60 }
0x3ef1   :  { %5224 = vrot.lane.b32.xlu1 %v5221_v61, %s8248_s26  ;;  %v5525_v61 = vld [vmem:[#allocation3 + $0xa] sm:$0x3] }
0x3f63   :  { %v5225_v62 = vpop.permute.xlu1 %5224 }
0x3f64   :  { %7423 = vmatmul.mubr.msk.f32.vlgmr.msra.gmra.mrb[56].mxu0 %vm697_vm3, %v5225_v62 }
0x3f65   :  { %7829 = vmatpush3.bf16.msra.mxu0 %v9057_v3  ;;  %7444 = vmatprep.mubr.msk.f32.mxu0 %vm8245_vm0, %v8246_v4 }
0x3f66   :  { %7830 = vmatprep.subr.bf16.mxu0 %v8244_v2 }
0x3f69   :  { %7832 = vmatpush3.bf16.msra.mxu0 %v9076_v47 }
0x3f6a   :  { %7839 = vmatprep.subr.bf16.mxu0 %v8244_v2 }
0x4037   :  { %v5294_v0 = vpop.f32.mrb[56].mxu0 }
0x4038   :  { %v5298_v1 = vadd.f32 %v5294_v0, %v5222_v63  ;;  %v7424_v5 = vpop.f32.mrb[57].mxu0 }
0x403a   :  { %8108 = vtanh.f32 %v5298_v1  ;;  %v6486_v7 = vmul.f32 -1.442695, %v5298_v1 }
0x403c   :  { %8110 = vpow2.f32 %v6486_v7 }
0x4044   :  { %v8109_v6 = vpop.eup %8108 }
0x4045   :  { %5308 = vrot.lane.b32.xlu0 %v8109_v6, %s8247_s24 }
0x4046   :  { %v8111_v8 = vpop.eup %8110 }
0x4047   :  { %v5302_v9 = vadd.f32 1.0, %v8111_v8 }
0x4049   :  { %8112 = vrcp.f32 %v5302_v9 }
0x4053   :  { %v8113_v10 = vpop.eup %8112 }
0x4054   :  { %v5306_v15 = vmul.f32 %v8113_v10, %v5215_v58 }
0x40b7   :  { %v5309_v13 = vpop.permute.xlu0 %5308 }
0x40b8   :  { %v5311_v12 = vmul.f32 %v8113_v10, %v5309_v13 }
0x40ba   :  { %5313 = vrot.lane.b32.xlu1 %v5311_v12, %s8247_s24 }
0x412c   :  { %v5314_v16 = vpop.permute.xlu1 %5313 }
0x412d   :  { %v5316_v17 = vadd.f32 %v5314_v16, %v5306_v15 }
0x412f   :  { %8114 = vtanh.f32 %v5316_v17 }
0x4139   :  { %v8115_v19 = vpop.eup %8114 }
0x413a   :  { %5319 = vrot.lane.b32.xlu0 %v8115_v19, %s8247_s24  ;;  %v5626_v19 = vld [vmem:[#allocation3 + $0xc] sm:$0x3] }
0x41ac   :  { %v5320_v22 = vpop.permute.xlu0 %5319 }
0x41ad   :  { %v5322_v23 = vmul.f32 %v8113_v10, %v5320_v22 }
0x41af   :  { %5325 = vrot.lane.b32.xlu1 %v5322_v23, %s8248_s26 }
0x4221   :  { %v5326_v24 = vpop.permute.xlu1 %5325 }
0x4222   :  { %7434 = vmatmul.mubr.msk.f32.vlgmr.msra.gmra.mrb[60].mxu1 %vm697_vm3, %v5326_v24 }
0x4223   :  { %7835 = vmatpush3.bf16.msra.mxu1 %v9057_v3  ;;  %7455 = vmatprep.mubr.msk.f32.mxu1 %vm8245_vm0, %v8246_v4 }
0x4224   :  { %7836 = vmatprep.subr.bf16.mxu1 %v8244_v2 }
0x4227   :  { %7838 = vmatpush3.bf16.msra.mxu1 %v9076_v47 }
0x4228   :  { %7845 = vmatprep.subr.bf16.mxu1 %v8244_v2 }
0x42f5   :  { %v5395_v27 = vpop.f32.mrb[60].mxu1 }
0x42f6   :  { %v5399_v28 = vadd.f32 %v5395_v27, %v5323_v25  ;;  %v7435_v11 = vpop.f32.mrb[61].mxu1 }
0x42f8   :  { %8116 = vtanh.f32 %v5399_v28  ;;  %v6488_v30 = vmul.f32 -1.442695, %v5399_v28 }
0x42fa   :  { %8118 = vpow2.f32 %v6488_v30 }
0x4302   :  { %v8117_v29 = vpop.eup %8116 }
0x4303   :  { %5409 = vrot.lane.b32.xlu0 %v8117_v29, %s8247_s24 }
0x4304   :  { %v8119_v20 = vpop.eup %8118 }
0x4305   :  { %v5403_v31 = vadd.f32 1.0, %v8119_v20 }
0x4307   :  { %8120 = vrcp.f32 %v5403_v31 }
0x4311   :  { %v8121_v14 = vpop.eup %8120 }
0x4312   :  { %v5407_v34 = vmul.f32 %v8121_v14, %v5316_v17 }
0x4375   :  { %v5410_v54 = vpop.permute.xlu0 %5409 }
0x4376   :  { %v5412_v33 = vmul.f32 %v8121_v14, %v5410_v54 }
0x4378   :  { %5414 = vrot.lane.b32.xlu1 %v5412_v33, %s8247_s24 }
0x43ea   :  { %v5415_v35 = vpop.permute.xlu1 %5414 }
0x43eb   :  { %v5417_v36 = vadd.f32 %v5415_v35, %v5407_v34 }
0x43ed   :  { %8122 = vtanh.f32 %v5417_v36 }
0x43f7   :  { %v8123_v38 = vpop.eup %8122 }
0x43f8   :  { %5420 = vrot.lane.b32.xlu0 %v8123_v38, %s8247_s24 }
0x446a   :  { %v5421_v21 = vpop.permute.xlu0 %5420 }
0x446b   :  { %v5423_v39 = vmul.f32 %v8121_v14, %v5421_v21 }
0x446d   :  { %5426 = vrot.lane.b32.xlu1 %v5423_v39, %s8248_s26 }
0x44df   :  { %v5427_v40 = vpop.permute.xlu1 %5426 }
0x44e0   :  { %7445 = vmatmul.mubr.msk.f32.vlgmr.msra.gmra.mrb[58].mxu0 %vm697_vm3, %v5427_v40 }
0x44e1   :  { %7841 = vmatpush3.bf16.msra.mxu0 %v9057_v3  ;;  %7466 = vmatprep.mubr.msk.f32.mxu0 %vm8245_vm0, %v8246_v4 }
0x44e2   :  { %7842 = vmatprep.subr.bf16.mxu0 %v8244_v2 }
0x44e5   :  { %7844 = vmatpush3.bf16.msra.mxu0 %v9076_v47 }
0x44e6   :  { %7851 = vmatprep.subr.bf16.mxu0 %v8244_v2 }
0x45b3   :  { %v5496_v45 = vpop.f32.mrb[58].mxu0 }
0x45b4   :  { %v5500_v46 = vadd.f32 %v5496_v45, %v5424_v41  ;;  %v7446_v48 = vpop.f32.mrb[59].mxu0 }
0x45b6   :  { %8124 = vtanh.f32 %v5500_v46  ;;  %v6490_v32 = vmul.f32 -1.442695, %v5500_v46 }
0x45b8   :  { %8126 = vpow2.f32 %v6490_v32 }
0x45c0   :  { %v8125_v49 = vpop.eup %8124 }
0x45c1   :  { %5510 = vrot.lane.b32.xlu0 %v8125_v49, %s8247_s24 }
0x45c2   :  { %v8127_v50 = vpop.eup %8126 }
0x45c3   :  { %v5504_v51 = vadd.f32 1.0, %v8127_v50 }
0x45c5   :  { %8128 = vrcp.f32 %v5504_v51 }
0x45cf   :  { %v8129_v52 = vpop.eup %8128 }
0x45d0   :  { %v5508_v55 = vmul.f32 %v8129_v52, %v5417_v36  ;;  %v5727_v36 = vld [vmem:[#allocation3 + $0xe] sm:$0x3] }
0x4633   :  { %v5511_v53 = vpop.permute.xlu0 %5510 }
0x4634   :  { %v5513_v37 = vmul.f32 %v8129_v52, %v5511_v53 }
0x4636   :  { %5515 = vrot.lane.b32.xlu1 %v5513_v37, %s8247_s24  ;;  %v5916_v37 = vld [vmem:[%s9529_s23] sm:$0xff] }
0x46a8   :  { %v5516_v56 = vpop.permute.xlu1 %5515 }
0x46a9   :  { %v5518_v18 = vadd.f32 %v5516_v56, %v5508_v55  ;;  %v5917_v55 = vld [vmem:[%s9529_s23 + $0x8] sm:$0xff]  ;;  %v5918_v56 = vmul.f32 %v5916_v37, %v5916_v37 }
0x46ab   :  { %8130 = vtanh.f32 %v5518_v18 }
0x46b5   :  { %v8131_v57 = vpop.eup %8130 }
0x46b6   :  { %5521 = vrot.lane.b32.xlu0 %v8131_v57, %s8247_s24  ;;  %v5968_v57 = vld [vmem:[%s9532_s30] sm:$0x1] }
0x4728   :  { %v5522_v58 = vpop.permute.xlu0 %5521 }
0x4729   :  { %v5524_v59 = vmul.f32 %v8129_v52, %v5522_v58 }
0x472b   :  { %5527 = vrot.lane.b32.xlu1 %v5524_v59, %s8248_s26  ;;  %v5969_v59 = vmul.f32 %v5968_v57, %v5968_v57 }
0x479d   :  { %v5528_v60 = vpop.permute.xlu1 %5527 }
0x479e   :  { %7456 = vmatmul.mubr.msk.f32.vlgmr.msra.gmra.mrb[62].mxu1 %vm697_vm3, %v5528_v60  ;;  %v5990_v60 = vld [vmem:[%s9533_s22] sm:$0x1] }
0x479f   :  { %7847 = vmatpush3.bf16.msra.mxu1 %v9057_v3  ;;  %7477 = vmatprep.mubr.msk.f32.mxu1 %vm8245_vm0, %v8246_v4 }
0x47a0   :  { %7848 = vmatprep.subr.bf16.mxu1 %v8244_v2 }
0x47a3   :  { %7850 = vmatpush3.bf16.msra.mxu1 %v9076_v47 }
0x4871   :  { %v5597_v62 = vpop.f32.mrb[62].mxu1 }
0x4872   :  { %v5601_v63 = vadd.f32 %v5597_v62, %v5525_v61  ;;  %v7457_v0 = vpop.f32.mrb[63].mxu1  ;;  %v6040_v61 = vld [vmem:[%s9504_s6] sm:$0xff]  ;;  %v6041_v62 = vld [vmem:[%s9504_s6 + $0x8] sm:$0xff] }
0x4873   :  { %v6044_v0 = vmul.f32 %v6040_v61, %v6040_v61 }
0x4874   :  { %8132 = vtanh.f32 %v5601_v63  ;;  %v6492_v5 = vmul.f32 -1.442695, %v5601_v63  ;;  %v6042_v63 = vld [vmem:[%s9504_s6 + $0x10] sm:$0xff] }
0x4876   :  { %8134 = vpow2.f32 %v6492_v5  ;;  %v6046_v5 = vmul.f32 %v6042_v63, %v6042_v63 }
0x487e   :  { %v8133_v1 = vpop.eup %8132 }
0x487f   :  { %5611 = vrot.lane.b32.xlu0 %v8133_v1, %s8247_s24  ;;  %v6045_v1 = vmul.f32 %v6041_v62, %v6041_v62  ;;  %v5939_v62 = vld [vmem:[%s9531_s21] sm:$0xff] }
0x4880   :  { %v8135_v6 = vpop.eup %8134  ;;  %v5943_v63 = vmul.f32 %v5939_v62, %v5939_v62 }
0x4881   :  { %v5605_v7 = vadd.f32 1.0, %v8135_v6  ;;  %v5971_v6 = vsel %vm5970_vm4, %v5969_v59, 0.0 }
0x4883   :  { %8136 = vrcp.f32 %v5605_v7  ;;  %v5991_v7 = vmul.f32 %v5990_v60, %v5990_v60 }
0x488d   :  { %v8137_v3 = vpop.eup %8136 }
0x488e   :  { %v5609_v10 = vmul.f32 %v8137_v3, %v5518_v18  ;;  %v5919_v18 = vmul.f32 %v5917_v55, %v5917_v55 }
0x4890   :  { %v5920_v58 = vadd.f32 %v5919_v18, %v5918_v56  ;;  %v6345_v18 = vld [vmem:[%s9516_s18] sm:$0x1] }
0x48f1   :  { %v5612_v8 = vpop.permute.xlu0 %5611 }
0x48f2   :  { %v5614_v9 = vmul.f32 %v8137_v3, %v5612_v8  ;;  %v6048_v8 = vadd.f32 %v6045_v1, %v6044_v0  ;;  %v5941_v1 = vld [vmem:[%s9531_s21 + $0x10] sm:$0xff] }
0x48f4   :  { %5616 = vrot.lane.b32.xlu1 %v5614_v9, %s8247_s24 }
0x4966   :  { %v5617_v47 = vpop.permute.xlu1 %5616 }
0x4967   :  { %v5619_v13 = vadd.f32 %v5617_v47, %v5609_v10  ;;  %v6049_v10 = vadd.f32 %v6048_v8, %v6046_v5  ;;  %v5992_v47 = vsel %vm5970_vm4, %v5991_v7, 0.0  ;;  %v6012_v5 = vld [vmem:[%s9503_s5 + $0x8] sm:$0xff] }
0x4969   :  { %8138 = vtanh.f32 %v5619_v13 }
0x4973   :  { %v8139_v12 = vpop.eup %8138 }
0x4974   :  { %5622 = vrot.lane.b32.xlu0 %v8139_v12, %s8247_s24  ;;  %v6140_v12 = vld [vmem:[%s9508_s10] sm:$0xff] }
0x49e6   :  { %v5623_v15 = vpop.permute.xlu0 %5622 }
0x49e7   :  { %v5625_v16 = vmul.f32 %v8137_v3, %v5623_v15  ;;  %v6043_v3 = vld [vmem:[%s9504_s6 + $0x18] sm:$0xff]  ;;  %v6141_v15 = vld [vmem:[%s9508_s10 + $0x8] sm:$0xff] }
0x49e8   :  { %v6047_v9 = vmul.f32 %v6043_v3, %v6043_v3  ;;  %v5942_v3 = vld [vmem:[%s9531_s21 + $0x18] sm:$0xff] }
0x49e9   :  { %5628 = vrot.lane.b32.xlu1 %v5625_v16, %s8248_s26  ;;  %v6142_v16 = vld [vmem:[%s9508_s10 + $0x10] sm:$0xff] }
0x4a5b   :  { %v5629_v17 = vpop.permute.xlu1 %5628 }
0x4a5c   :  { %7467 = vmatmul.mubr.msk.f32.vlgmr.msra.gmra.mrb[60].mxu0 %vm697_vm3, %v5629_v17  ;;  %v6144_v17 = vmul.f32 %v6140_v12, %v6140_v12 }
0x4a5d   :  { %7488 = vmatprep.mubr.msk.f32.mxu0 %vm8245_vm0, %v8246_v4 }
0x4b2f   :  { %v5698_v22 = vpop.f32.mrb[60].mxu0 }
0x4b30   :  { %v5702_v23 = vadd.f32 %v5698_v22, %v5626_v19  ;;  %v7468_v24 = vpop.f32.mrb[61].mxu0  ;;  %v6145_v19 = vmul.f32 %v6141_v15, %v6141_v15  ;;  %v6050_v22 = vadd.f32 %v6049_v10, %v6047_v9  ;;  %v6016_v9 = vmul.f32 %v6012_v5, %v6012_v5  ;;  %v6013_v10 = vld [vmem:[%s9503_s5 + $0x10] sm:$0xff] }
0x4b31   :  { %v6017_v12 = vmul.f32 %v6013_v10, %v6013_v10 }
0x4b32   :  { %8140 = vtanh.f32 %v5702_v23  ;;  %v6494_v27 = vmul.f32 -1.442695, %v5702_v23  ;;  %v6146_v23 = vmul.f32 %v6142_v16, %v6142_v16  ;;  %v6014_v16 = vld [vmem:[%s9503_s5 + $0x18] sm:$0xff] }
0x4b34   :  { %8142 = vpow2.f32 %v6494_v27  ;;  %v6148_v27 = vadd.f32 %v6145_v19, %v6144_v17  ;;  %v6111_v17 = vld [vmem:[%s9507_s9] sm:$0xff]  ;;  %v6112_v19 = vld [vmem:[%s9507_s9 + $0x8] sm:$0xff] }
0x4b3c   :  { %v8141_v25 = vpop.eup %8140 }
0x4b3d   :  { %5712 = vrot.lane.b32.xlu0 %v8141_v25, %s8247_s24  ;;  %v6143_v25 = vld [vmem:[%s9508_s10 + $0x18] sm:$0xff] }
0x4b3e   :  { %v8143_v28 = vpop.eup %8142 }
0x4b3f   :  { %v5706_v11 = vadd.f32 1.0, %v8143_v28  ;;  %v6147_v28 = vmul.f32 %v6143_v25, %v6143_v25  ;;  %v6115_v25 = vmul.f32 %v6111_v17, %v6111_v17 }
0x4b41   :  { %8144 = vrcp.f32 %v5706_v11  ;;  %v6149_v11 = vadd.f32 %v6148_v27, %v6146_v23  ;;  %v6018_v23 = vmul.f32 %v6014_v16, %v6014_v16  ;;  %v6116_v27 = vmul.f32 %v6112_v19, %v6112_v19 }
0x4b4b   :  { %v8145_v29 = vpop.eup %8144 }
0x4b4c   :  { %v5710_v31 = vmul.f32 %v8145_v29, %v5619_v13  ;;  %v6090_v13 = vld [vmem:[%s9506_s8] sm:$0x1]  ;;  %s8249_s8 = smov [#allocation6]  }
0x4b4d   :  { %v6091_v24 = vmul.f32 %v6090_v13, %v6090_v13  ;;  %s6386_s28 = sshll.u32 %s8249_s8, 4  ;;  %s6387_s28 = int_to_ptr.vmem [resolvable:$true] %s6386_s28 }
0x4b4e   :  { %s8200_s14 = scalar_lea.vmem %s6387_s28, 32  ;;  %p8201_p1 = scmp.lt.s32.totalorder %s6387_s28, %s6387_s28 }
0x4baf   :  { %v5713_v30 = vpop.permute.xlu0 %5712 }
0x4bb0   :  { %v5715_v20 = vmul.f32 %v8145_v29, %v5713_v30  ;;  %v6190_v30 = vld [vmem:[%s9510_s12] sm:$0x1] }
0x4bb2   :  { %5717 = vrot.lane.b32.xlu1 %v5715_v20, %s8247_s24  ;;  %v6244_v20 = vmul.f32 %v9047_v42, %v9047_v42  ;;  %v6313_v42 = vld [vmem:[%s9515_s17 + $0x10] sm:$0xff] }
0x4c24   :  { %v5718_v4 = vpop.permute.xlu1 %5717 }
0x4c25   :  { %v5720_v14 = vadd.f32 %v5718_v4, %v5710_v31  ;;  %v6245_v31 = vmul.f32 %v9052_v26, %v9052_v26  ;;  %v6150_v4 = vadd.f32 %v6149_v11, %v6147_v28  ;;  %v6314_v26 = vld [vmem:[%s9515_s17 + $0x18] sm:$0xff]  ;;  %v6113_v28 = vld [vmem:[%s9507_s9 + $0x10] sm:$0xff]  ;;  %v6069_v11 = vld [vmem:[%s9505_s7] sm:$0x1]  ;;  %s8196_s7 = scalar_lea.vmem %s6387_s28, 16 }
0x4c26   :  { %v7855_v55 = vpack.c.bf16 %v6314_v26, %v6313_v42  ;;  %p8197_p0 = scmp.ne.s32.totalorder %s6387_s28, %s8196_s7  ;;  %p8202_p2 = scmp.lt.s32.totalorder %s8200_s14, %s8196_s7 }
0x4c27   :  { %8146 = vtanh.f32 %v5720_v14 }
0x4c28   :  { %p8203_p3 = por %p8202_p2, %p8201_p1 }
0x4c2a   :  { %p8204_p4 = pnand %p8203_p3, %p8197_p0 }
0x4c31   :  { %v8147_v54 = vpop.eup %8146 }
0x4c32   :  { %5723 = vrot.lane.b32.xlu0 %v8147_v54, %s8247_s24  ;;  %v6248_v54 = vadd.f32 %v6245_v31, %v6244_v20  ;;  %v6119_v20 = vadd.f32 %v6116_v27, %v6115_v25  ;;  %v6070_v31 = vmul.f32 %v6069_v11, %v6069_v11 }
0x4ca4   :  { %v5724_v33 = vpop.permute.xlu0 %5723 }
0x4ca5   :  { %v5726_v34 = vmul.f32 %v8145_v29, %v5724_v33  ;;  %v6092_v29 = vsel %vm5970_vm4, %v6091_v24, 0.0  ;;  %v6191_v33 = vmul.f32 %v6190_v30, %v6190_v30  ;;  %v6117_v30 = vmul.f32 %v6113_v28, %v6113_v28 }
0x4ca7   :  { %5729 = vrot.lane.b32.xlu1 %v5726_v34, %s8248_s26  ;;  %v6311_v34 = vld [vmem:[%s9515_s17] sm:$0xff] }
0x4d19   :  { %v5730_v35 = vpop.permute.xlu1 %5729 }
0x4d1a   :  { %7478 = vmatmul.mubr.msk.f32.vlgmr.msra.gmra.mrb[64].mxu1 %vm697_vm3, %v5730_v35  ;;  %v6312_v35 = vld [vmem:[%s9515_s17 + $0x8] sm:$0xff] }
0x4ded   :  { %v5799_v38 = vpop.f32.mrb[64].mxu1 }
0x4dee   :  { %v5803_v21 = vadd.f32 %v5799_v38, %v5727_v36  ;;  %v7479_v39 = vpop.f32.mrb[65].mxu1  ;;  %v6316_v36 = vmul.f32 %v6312_v35, %v6312_v35  ;;  %v6247_v38 = vmul.f32 %v9068_v44, %v9068_v44 }
0x4def   :  { %v6317_v39 = vmul.f32 %v6313_v42, %v6313_v42 }
0x4df0   :  { %8148 = vtanh.f32 %v5803_v21  ;;  %v6496_v41 = vmul.f32 -1.442695, %v5803_v21 }
0x4df2   :  { %8150 = vpow2.f32 %v6496_v41  ;;  %v6192_v41 = vsel %vm5970_vm4, %v6191_v33, 0.0  ;;  %v8192_v33 = vld [vmem:[%s9511_s13] sm:$0xff] }
0x4dfa   :  { %v8149_v40 = vpop.eup %8148 }
0x4dfb   :  { %5813 = vrot.lane.b32.xlu0 %v8149_v40, %s8247_s24  ;;  %v6318_v40 = vmul.f32 %v6314_v26, %v6314_v26  ;;  %v6071_v26 = vsel %vm5970_vm4, %v6070_v31, 0.0 }
0x4dfc   :  { %v8151_v45 = vpop.eup %8150 }
0x4dfd   :  { %v5807_v46 = vadd.f32 1.0, %v8151_v45 }
0x4dff   :  { %8152 = vrcp.f32 %v5807_v46  ;;  %v6321_v46 = vsel %vm6319_vm5, %v6316_v36, 0.0 }
0x4e09   :  { %v9194_v48 = vpop.eup %8152 }
0x4e0a   :  { %v5811_v50 = vmul.f32 %v9194_v48, %v5720_v14  ;;  %v6246_v14 = vmul.f32 %v9063_v43, %v9063_v43  ;;  %v6315_v43 = vmul.f32 %v6311_v34, %v6311_v34 }
0x4e0c   :  { %v6249_v21 = vadd.f32 %v6248_v54, %v6246_v14  ;;  %v6320_v45 = vsel %vm6319_vm5, %v6315_v43, 0.0  ;;  %v6120_v54 = vadd.f32 %v6119_v20, %v6117_v30  ;;  %v6169_v43 = vld [vmem:[%s9509_s11] sm:$0x1] }
0x4e0e   :  { %v6250_v44 = vadd.f32 %v6249_v21, %v6247_v38  ;;  %v8194_v38 = vld [vmem:[%s9511_s13 + $0x10] sm:$0xff] }
0x4e0f   :  { %v6217_v21 = vmul.f32 %v8194_v38, %v8194_v38 }
0x4e6d   :  { %v5814_v49 = vpop.permute.xlu0 %5813 }
0x4e6e   :  { %v5816_v32 = vmul.f32 %v9194_v48, %v5814_v49  ;;  %v6290_v49 = vld [vmem:[%s9514_s16] sm:$0x1] }
0x4e6f   :  { %v6291_v37 = vmul.f32 %v6290_v49, %v6290_v49 }
0x4e70   :  { %5818 = vrot.lane.b32.xlu1 %v5816_v32, %s8247_s24  ;;  %v6322_v32 = vadd.f32 %v6321_v46, %v6320_v45 }
0x4e71   :  { %v6292_v57 = vsel %vm5970_vm4, %v6291_v37, 0.0 }
0x4ee2   :  { %v5819_v51 = vpop.permute.xlu1 %5818 }
0x4ee3   :  { %v5821_v52 = vadd.f32 %v5819_v51, %v5811_v50  ;;  %v6323_v50 = vsel %vm6319_vm5, %v6317_v39, 0.0  ;;  %v6325_v51 = vsel %vm6319_vm5, %v6318_v40, 0.0  ;;  %v6170_v40 = vmul.f32 %v6169_v43, %v6169_v43 }
0x4ee5   :  { %8154 = vtanh.f32 %v5821_v52  ;;  %v7852_v52 = vpack.c.bf16 %v6312_v35, %v6311_v34  ;;  %v6215_v34 = vmul.f32 %v8192_v33, %v8192_v33  ;;  %v8193_v35 = vld [vmem:[%s9511_s13 + $0x8] sm:$0xff]  ;;  %v6171_v49 = vsel %vm5970_vm4, %v6170_v40, 0.0 }
0x4ee6   :  { %v6216_v42 = vmul.f32 %v8193_v35, %v8193_v35 }
0x4ee7   :  { %7853 = vmatpush3.bf16.msra.mxu0 %v7852_v52 }
0x4ee8   :  { %7854 = vmatprep.subr.bf16.mxu0 %v8244_v2  ;;  %v5940_v2 = vld [vmem:[%s9531_s21 + $0x8] sm:$0xff]  ;;  %v6219_v39 = vadd.f32 %v6216_v42, %v6215_v34 }
0x4ee9   :  { %v5944_v0 = vmul.f32 %v5940_v2, %v5940_v2 }
0x4eea   :  { %v6220_v46 = vadd.f32 %v6219_v39, %v6217_v21 }
0x4eeb   :  { %7856 = vmatpush3.bf16.msra.mxu0 %v7855_v55  ;;  %v5947_v7 = vadd.f32 %v5944_v0, %v5943_v63 }
0x4eef   :  { %v8155_v53 = vpop.eup %8154 }
0x4ef0   :  { %5824 = vrot.lane.b32.xlu0 %v8155_v53, %s8247_s24  ;;  %v6324_v53 = vadd.f32 %v6323_v50, %v6322_v32  ;;  %v6269_v32 = vld [vmem:[%s9513_s15] sm:$0x1] }
0x4ef2   :  { %v9273_v56 = vadd.f32 %v6325_v51, %v6324_v53  ;;  %v6270_v51 = vmul.f32 %v6269_v32, %v6269_v32 }
0x4ef4   :  { %v6271_v53 = vsel %vm5970_vm4, %v6270_v51, 0.0 }
0x4f0f   :  { %5921 = vadd.xlane.f32.xlu0 %v5920_v58  ;;  %v6346_v58 = vmul.f32 %v6345_v18, %v6345_v18 }
0x4f11   :  { %v6348_v59 = vsel %vm6347_vm6, %v6346_v58, 0.0 }
0x4f13   :  { %5972 = vadd.xlane.f32.xlu0 %v5971_v6  ;;  %v5945_v6 = vmul.f32 %v5941_v1, %v5941_v1 }
0x4f15   :  { %v5948_v13 = vadd.f32 %v5947_v7, %v5945_v6 }
0x4f17   :  { %5993 = vadd.xlane.f32.xlu0 %v5992_v47  ;;  %v5946_v47 = vmul.f32 %v5942_v3, %v5942_v3 }
0x4f1b   :  { %6051 = vadd.xlane.f32.xlu0 %v6050_v22  ;;  %v5949_v22 = vadd.f32 %v5948_v13, %v5946_v47 }
0x4f1f   :  { %6093 = vadd.xlane.f32.xlu0 %v6092_v29 }
0x4f23   :  { %6151 = vadd.xlane.f32.xlu0 %v6150_v4  ;;  %v6114_v4 = vld [vmem:[%s9507_s9 + $0x18] sm:$0xff] }
0x4f24   :  { %v6118_v14 = vmul.f32 %v6114_v4, %v6114_v4 }
0x4f26   :  { %v6121_v36 = vadd.f32 %v6120_v54, %v6118_v14 }
0x4f27   :  { %6193 = vadd.xlane.f32.xlu0 %v6192_v41  ;;  %v8195_v41 = vld [vmem:[%s9511_s13 + $0x18] sm:$0xff] }
0x4f28   :  { %v6218_v45 = vmul.f32 %v8195_v41, %v8195_v41 }
0x4f2a   :  { %v6221_v50 = vadd.f32 %v6220_v46, %v6218_v45 }
0x4f2b   :  { %6251 = vadd.xlane.f32.xlu0 %v6250_v44 }
0x4f2f   :  { %6293 = vadd.xlane.f32.xlu0 %v6292_v57 }
0x4f33   :  { %6349 = vadd.xlane.f32.xlu0 %v6348_v59 }
0x4f62   :  { %v5825_v60 = vpop.permute.xlu0 %5824 }
0x4f63   :  { %v5827_v61 = vmul.f32 %v9194_v48, %v5825_v60  ;;  %v6011_v48 = vld [vmem:[%s9503_s5] sm:$0xff] }
0x4f64   :  { %v6015_v8 = vmul.f32 %v6011_v48, %v6011_v48 }
0x4f65   :  { %5840 = vrot.lane.b32.xlu1 %v5827_v61, %s8248_s26 }
0x4f66   :  { %v6019_v15 = vadd.f32 %v6016_v9, %v6015_v8 }
0x4f68   :  { %v6020_v24 = vadd.f32 %v6019_v15, %v6017_v12 }
0x4f6a   :  { %v6021_v29 = vadd.f32 %v6020_v24, %v6018_v23 }
0x4f89   :  { %5950 = vadd.xlane.f32.xlu1 %v5949_v22 }
0x4f8d   :  { %6022 = vadd.xlane.f32.xlu1 %v6021_v29 }
0x4f91   :  { %6072 = vadd.xlane.f32.xlu1 %v6071_v26 }
0x4f95   :  { %6122 = vadd.xlane.f32.xlu1 %v6121_v36 }
0x4f99   :  { %6172 = vadd.xlane.f32.xlu1 %v6171_v49 }
0x4f9c   :  { %v5922_v52 = vpop.xlane.xlu0 %5921 }
0x4f9d   :  { %6222 = vadd.xlane.f32.xlu1 %v6221_v50  ;;  %v5923_v44 = vrot.slane %v5922_v52, 4 }
0x4f9f   :  { %v5924_v37 = vadd.f32 %v5923_v44, %v5922_v52 }
0x4fa0   :  { %v5973_v60 = vpop.xlane.xlu0 %5972 }
0x4fa1   :  { %6272 = vadd.xlane.f32.xlu1 %v6271_v53  ;;  %v5925_v55 = vrot.slane %v5924_v37, 2  ;;  %v5974_v63 = vrot.slane %v5973_v60, 4 }
0x4fa3   :  { %v5926_v18 = vadd.f32 %v5925_v55, %v5924_v37  ;;  %v5975_v48 = vadd.f32 %v5974_v63, %v5973_v60 }
0x4fa4   :  { %v5994_v61 = vpop.xlane.xlu0 %5993 }
0x4fa5   :  { %6327 = vadd.xlane.f32.xlu1 %v9273_v56  ;;  %v5927_v57 = vrot.slane %v5926_v18, 1  ;;  %v5995_v0 = vrot.slane %v5994_v61, 4  ;;  %v5976_v8 = vrot.slane %v5975_v48, 2 }
0x4fa7   :  { %v5928_v58 = vadd.f32 %v5927_v57, %v5926_v18  ;;  %v5996_v6 = vadd.f32 %v5995_v0, %v5994_v61  ;;  %v5977_v16 = vadd.f32 %v5976_v8, %v5975_v48 }
0x4fa8   :  { %v6052_v62 = vpop.xlane.xlu0 %6051 }
0x4fa9   :  { %7857 = vpush %v5928_v58  ;;  %v6053_v5 = vrot.slane %v6052_v62, 4  ;;  %v5997_v9 = vrot.slane %v5996_v6, 2  ;;  %v5978_v11 = vrot.slane %v5977_v16, 1 }
0x4fab   :  { %v6054_v56 = vadd.f32 %v6053_v5, %v6052_v62  ;;  %v5998_v19 = vadd.f32 %v5997_v9, %v5996_v6  ;;  %v5979_v43 = vadd.f32 %v5978_v11, %v5977_v16 }
0x4fac   :  { %v6094_v2 = vpop.xlane.xlu0 %6093 }
0x4fad   :  { %v6095_v7 = vrot.slane %v6094_v2, 4  ;;  %v6055_v15 = vrot.slane %v6054_v56, 2  ;;  %v5999_v4 = vrot.slane %v5998_v19, 1 }
0x4faf   :  { %v6096_v47 = vadd.f32 %v6095_v7, %v6094_v2  ;;  %v6056_v30 = vadd.f32 %v6055_v15, %v6054_v56  ;;  %v6000_v41 = vadd.f32 %v5999_v4, %v5998_v19 }
0x4fb0   :  { %v6152_v1 = vpop.xlane.xlu0 %6151 }
0x4fb1   :  { %v6153_v12 = vrot.slane %v6152_v1, 4  ;;  %v6097_v24 = vrot.slane %v6096_v47, 2  ;;  %v6057_v38 = vrot.slane %v6056_v30, 1 }
0x4fb3   :  { %v6154_v28 = vadd.f32 %v6153_v12, %v6152_v1  ;;  %v6098_v54 = vadd.f32 %v6097_v24, %v6096_v47  ;;  %v6058_v53 = vadd.f32 %v6057_v38, %v6056_v30 }
0x4fb4   :  { %v6194_v3 = vpop.xlane.xlu0 %6193 }
0x4fb5   :  { %v6195_v29 = vrot.slane %v6194_v3, 4  ;;  %v6155_v42 = vrot.slane %v6154_v28, 2  ;;  %v6099_v49 = vrot.slane %v6098_v54, 1 }
0x4fb7   :  { %v6196_v36 = vadd.f32 %v6195_v29, %v6194_v3  ;;  %v6156_v52 = vadd.f32 %v6155_v42, %v6154_v28  ;;  %v6100_v61 = vadd.f32 %v6099_v49, %v6098_v54 }
0x4fb8   :  { %v6252_v22 = vpop.xlane.xlu0 %6251 }
0x4fb9   :  { %v6253_v21 = vrot.slane %v6252_v22, 4  ;;  %v6197_v44 = vrot.slane %v6196_v36, 2  ;;  %v6157_v0 = vrot.slane %v6156_v52, 1 }
0x4fbb   :  { %v6254_v37 = vadd.f32 %v6253_v21, %v6252_v22  ;;  %v6198_v6 = vadd.f32 %v6197_v44, %v6196_v36 }
0x4fbc   :  { %v6294_v26 = vpop.xlane.xlu0 %6293 }
0x4fbd   :  { %v6295_v55 = vrot.slane %v6294_v26, 4  ;;  %v6255_v1 = vrot.slane %v6254_v37, 2  ;;  %v6199_v16 = vrot.slane %v6198_v6, 1 }
0x4fbf   :  { %v6296_v48 = vadd.f32 %v6295_v55, %v6294_v26  ;;  %v6200_v29 = vadd.f32 %v6199_v16, %v6198_v6 }
0x4fc1   :  { %v6297_v12 = vrot.slane %v6296_v48, 2 }
0x4fd7   :  { %v5841_v59 = vpop.permute.xlu1 %5840 }
0x4fd8   :  { %7489 = vmatmul.mubr.msk.f32.vlgmr.msra.gmra.mrb[62].mxu0 %vm697_vm3, %v5841_v59  ;;  %v6350_v59 = vpop.xlane.xlu0 %6349 }
0x4fd9   :  { %v6351_v5 = vrot.slane %v6350_v59, 4 }
0x4fda   :  { %s7858_s13 = spop %7857 }
0x4fdb   :  { %v6352_v15 = vadd.f32 %v6351_v5, %v6350_v59 }
0x4fdd   :  { %v6353_v11 = vrot.slane %v6352_v15, 2 }
0x4fdf   :  { %v6354_v42 = vadd.f32 %v6353_v11, %v6352_v15 }
0x5016   :  { %v5951_v10 = vpop.xlane.xlu1 %5950 }
0x5017   :  { %v5952_v13 = vrot.slane %v5951_v10, 4 }
0x5019   :  { %v5953_v17 = vadd.f32 %v5952_v13, %v5951_v10  ;;  %v6158_v13 = vadd.f32 %v6157_v0, %v6156_v52  ;;  %v5930_v52 = vstv %s7858_s13 }
0x501a   :  { %v6023_v23 = vpop.xlane.xlu1 %6022  ;;  %8156 = vrsqrt.f32 %v5930_v52  ;;  %vm5933_vm7 = vcmp.eq.f32.partialorder %v5930_v52, inf  ;;  %vm5935_vm8 = vcmp.eq.f32.partialorder %v5930_v52, 0.0 }
0x501b   :  { %v5954_v25 = vrot.slane %v5953_v17, 2  ;;  %v6024_v27 = vrot.slane %v6023_v23, 4 }
0x501d   :  { %v6025_v20 = vadd.f32 %v6024_v27, %v6023_v23  ;;  %v5955_v31 = vadd.f32 %v5954_v25, %v5953_v17  ;;  %v6256_v17 = vadd.f32 %v6255_v1, %v6254_v37 }
0x501e   :  { %v6073_v14 = vpop.xlane.xlu1 %6072 }
0x501f   :  { %v6026_v33 = vrot.slane %v6025_v20, 2  ;;  %v6074_v34 = vrot.slane %v6073_v14, 4  ;;  %v5956_v35 = vrot.slane %v5955_v31, 1  ;;  %v6257_v30 = vrot.slane %v6256_v17, 1 }
0x5021   :  { %v6075_v39 = vadd.f32 %v6074_v34, %v6073_v14  ;;  %v5957_v40 = vadd.f32 %v5956_v35, %v5955_v31  ;;  %v6027_v45 = vadd.f32 %v6026_v33, %v6025_v20  ;;  %v6298_v20 = vadd.f32 %v6297_v12, %v6296_v48 }
0x5022   :  { %v6123_v46 = vpop.xlane.xlu1 %6122  ;;  %v6258_v26 = vadd.f32 %v6257_v30, %v6256_v17 }
0x5023   :  { %v6076_v32 = vrot.slane %v6075_v39, 2  ;;  %7859 = vpush %v5957_v40  ;;  %v6124_v50 = vrot.slane %v6123_v46, 4  ;;  %v6028_v51 = vrot.slane %v6027_v45, 1 }
0x5024   :  { %7861 = vpush %v5979_v43  ;;  %v6299_v43 = vrot.slane %v6298_v20, 1  ;;  %v8157_v44 = vpop.eup %8156 }
0x5025   :  { %v6125_v18 = vadd.f32 %v6124_v50, %v6123_v46  ;;  %7863 = vpush %v6000_v41  ;;  %v6029_v57 = vadd.f32 %v6028_v51, %v6027_v45  ;;  %v6077_v58 = vadd.f32 %v6076_v32, %v6075_v39  ;;  %v6355_v45 = vrot.slane %v6354_v42, 1 }
0x5026   :  { %v6173_v60 = vpop.xlane.xlu1 %6172  ;;  %v6300_v41 = vadd.f32 %v6299_v43, %v6298_v20  ;;  %v5932_v37 = vmul.f32 %v8157_v44, %v5930_v52 }
0x5027   :  { %v6126_v62 = vrot.slane %v6125_v18, 2  ;;  %v6174_v2 = vrot.slane %v6173_v60, 4  ;;  %7865 = vpush %v6029_v57  ;;  %v6078_v63 = vrot.slane %v6077_v58, 1  ;;  %v6356_v50 = vadd.f32 %v6355_v45, %v6354_v42 }
0x5028   :  { %7867 = vpush %v6058_v53  ;;  %v5936_v57 = vand.u32 2147483648, %v5930_v52 }
0x5029   :  { %v6175_v7 = vadd.f32 %v6174_v2, %v6173_v60  ;;  %v6079_v3 = vadd.f32 %v6078_v63, %v6077_v58  ;;  %v6127_v8 = vadd.f32 %v6126_v62, %v6125_v18  ;;  %v5934_v58 = vsel %vm5933_vm7, %v5930_v52, %v5932_v37 }
0x502a   :  { %v6223_v56 = vpop.xlane.xlu1 %6222 }
0x502b   :  { %v6176_v9 = vrot.slane %v6175_v7, 2  ;;  %v6224_v10 = vrot.slane %v6223_v56, 4  ;;  %7869 = vpush %v6079_v3  ;;  %v6128_v47 = vrot.slane %v6127_v8, 1 }
0x502c   :  { %7871 = vpush %v6100_v61  ;;  %v5937_v61 = vsel %vm5935_vm8, %v5936_v57, %v5934_v58 }
0x502d   :  { %v6225_v19 = vadd.f32 %v6224_v10, %v6223_v56  ;;  %v6129_v22 = vadd.f32 %v6128_v47, %v6127_v8  ;;  %v6177_v23 = vadd.f32 %v6176_v9, %v6175_v7 }
0x502e   :  { %v6273_v24 = vpop.xlane.xlu1 %6272 }
0x502f   :  { %v6226_v25 = vrot.slane %v6225_v19, 2  ;;  %v6274_v27 = vrot.slane %v6273_v24, 4  ;;  %7873 = vpush %v6129_v22  ;;  %v6178_v28 = vrot.slane %v6177_v23, 1 }
0x5030   :  { %7875 = vpush %v6158_v13 }
0x5031   :  { %v6275_v31 = vadd.f32 %v6274_v27, %v6273_v24  ;;  %v6179_v4 = vadd.f32 %v6178_v28, %v6177_v23  ;;  %v6227_v14 = vadd.f32 %v6226_v25, %v6225_v19 }
0x5032   :  { %v6328_v54 = vpop.xlane.xlu1 %6327 }
0x5033   :  { %v6276_v33 = vrot.slane %v6275_v31, 2  ;;  %v6329_v34 = vrot.slane %v6328_v54, 4  ;;  %7877 = vpush %v6179_v4  ;;  %v6228_v35 = vrot.slane %v6227_v14, 1 }
0x5034   :  { %7879 = vpush %v6200_v29 }
0x5035   :  { %v6330_v36 = vadd.f32 %v6329_v34, %v6328_v54  ;;  %v6229_v38 = vadd.f32 %v6228_v35, %v6227_v14  ;;  %v6277_v21 = vadd.f32 %v6276_v33, %v6275_v31 }
0x5037   :  { %v6331_v39 = vrot.slane %v6330_v36, 2  ;;  %7881 = vpush %v6229_v38  ;;  %v6278_v40 = vrot.slane %v6277_v21, 1 }
0x5038   :  { %7883 = vpush %v6258_v26 }
0x5039   :  { %v6332_v46 = vadd.f32 %v6331_v39, %v6330_v36  ;;  %v6279_v49 = vadd.f32 %v6278_v40, %v6277_v21 }
0x503b   :  { %7885 = vpush %v6279_v49  ;;  %v6333_v32 = vrot.slane %v6332_v46, 1 }
0x503c   :  { %7887 = vpush %v6300_v41 }
0x503d   :  { %v6334_v51 = vadd.f32 %v6333_v32, %v6332_v46 }
0x503f   :  { %7889 = vpush %v6334_v51 }
0x5040   :  { %7891 = vpush %v6356_v50 }
0x5054   :  { %s7860_s15 = spop %7859 }
0x5055   :  { %v5959_v53 = vstv %s7860_s15  ;;  %s7862_s30 = spop %7861 }
0x5056   :  { %8158 = vrsqrt.f32 %v5959_v53  ;;  %s7864_s12 = spop %7863  ;;  %v5981_v55 = vstv %s7862_s30  ;;  %vm5962_vm9 = vcmp.eq.f32.partialorder %v5959_v53, inf  ;;  %vm5964_vm10 = vcmp.eq.f32.partialorder %v5959_v53, 0.0 }
0x5057   :  { %v9344_v18 = vstv %s7864_s12  ;;  %8160 = vrsqrt.f32 %v5981_v55  ;;  %v5965_v2 = vand.u32 2147483648, %v5959_v53  ;;  %vm5984_vm11 = vcmp.eq.f32.partialorder %v5981_v55, inf }
0x5058   :  { %s7866_s22 = spop %7865  ;;  %8162 = vrsqrt.f32 %v9344_v18  ;;  %vm5986_vm12 = vcmp.eq.f32.partialorder %v5981_v55, 0.0  ;;  %v5987_v63 = vand.u32 2147483648, %v5981_v55  ;;  %vm6005_vm13 = vcmp.eq.f32.partialorder %v9344_v18, inf }
0x5059   :  { %s7868_s29 = spop %7867  ;;  %v9347_v59 = vstv %s7866_s22  ;;  %vm6007_vm14 = vcmp.eq.f32.partialorder %v9344_v18, 0.0  ;;  %v6008_v48 = vand.u32 2147483648, %v9344_v18 }
0x505a   :  { %v9349_v60 = vstv %s7868_s29  ;;  %8164 = vrsqrt.f32 %v9347_v59  ;;  %vm6034_vm15 = vcmp.eq.f32.partialorder %v9347_v59, inf  ;;  %vm6036_vm0 = vcmp.eq.f32.partialorder %v9347_v59, 0.0 }
0x505b   :  { %8166 = vrsqrt.f32 %v9349_v60  ;;  %v6037_v3 = vand.u32 2147483648, %v9347_v59  ;;  %vm6063_vm1 = vcmp.eq.f32.partialorder %v9349_v60, inf  ;;  %vm6065_vm2 = vcmp.eq.f32.partialorder %v9349_v60, 0.0 }
0x505c   :  { %s7870_s0 = spop %7869  ;;  %v6066_v10 = vand.u32 2147483648, %v9349_v60 }
0x505d   :  { %v9353_v62 = vstv %s7870_s0  ;;  %s7872_s1 = spop %7871 }
0x505e   :  { %8168 = vrsqrt.f32 %v9353_v62  ;;  %v9356_v0 = vstv %s7872_s1  ;;  %vm6084_vm3 = vcmp.eq.f32.partialorder %v9353_v62, inf  ;;  %vm6086_vm4 = vcmp.eq.f32.partialorder %v9353_v62, 0.0 }
0x505f   :  { %8170 = vrsqrt.f32 %v9356_v0  ;;  %v6087_v19 = vand.u32 2147483648, %v9353_v62  ;;  %vm6105_vm5 = vcmp.eq.f32.partialorder %v9356_v0, inf  ;;  %vm6107_vm6 = vcmp.eq.f32.partialorder %v9356_v0, 0.0 }
0x5060   :  { %v8159_v1 = vpop.eup %8158  ;;  %s7874_s2 = spop %7873  ;;  %v6108_v31 = vand.u32 2147483648, %v9356_v0 }
0x5061   :  { %v5961_v5 = vmul.f32 %v8159_v1, %v5959_v53  ;;  %v9364_v6 = vstv %s7874_s2  ;;  %s7876_s21 = spop %7875  ;;  %v8161_v7 = vpop.eup %8160 }
0x5062   :  { %8172 = vrsqrt.f32 %v9364_v6  ;;  %v8163_v8 = vpop.eup %8162  ;;  %v5983_v9 = vmul.f32 %v8161_v7, %v5981_v55  ;;  %v9372_v47 = vstv %s7876_s21  ;;  %vm6134_vm7 = vcmp.eq.f32.partialorder %v9364_v6, inf }
0x5063   :  { %v5963_v56 = vsel %vm5962_vm9, %v5959_v53, %v5961_v5  ;;  %v6004_v12 = vmul.f32 %v8163_v8, %v9344_v18  ;;  %8174 = vrsqrt.f32 %v9372_v47  ;;  %vm6136_vm8 = vcmp.eq.f32.partialorder %v9364_v6, 0.0 }
0x5064   :  { %v5966_v13 = vsel %vm5964_vm10, %v5965_v2, %v5963_v56  ;;  %s7878_s17 = spop %7877  ;;  %v8165_v15 = vpop.eup %8164  ;;  %v5985_v17 = vsel %vm5984_vm11, %v5981_v55, %v5983_v9  ;;  %v6137_v40 = vand.u32 2147483648, %v9364_v6  ;;  %vm6163_vm9 = vcmp.eq.f32.partialorder %v9372_v47, inf }
0x5065   :  { %v5967_v16 = vadd.f32 %v5966_v13, %v5937_v61  ;;  %v8167_v22 = vpop.eup %8166  ;;  %v5988_v23 = vsel %vm5986_vm12, %v5987_v63, %v5985_v17  ;;  %v6006_v24 = vsel %vm6005_vm13, %v9344_v18, %v6004_v12  ;;  %v6033_v25 = vmul.f32 %v8165_v15, %v9347_v59  ;;  %s7880_s25 = spop %7879 }
0x5066   :  { %v9386_v27 = vstv %s7878_s17  ;;  %v6009_v11 = vsel %vm6007_vm14, %v6008_v48, %v6006_v24  ;;  %v6062_v29 = vmul.f32 %v8167_v22, %v9349_v60  ;;  %v9407_v42 = vstv %s7880_s25 }
0x5067   :  { %v5989_v28 = vadd.f32 %v5988_v23, %v5967_v16  ;;  %8176 = vrsqrt.f32 %v9386_v27  ;;  %v6035_v20 = vsel %vm6034_vm15, %v9347_v59, %v6033_v25  ;;  %vm6165_vm10 = vcmp.eq.f32.partialorder %v9372_v47, 0.0 }
0x5068   :  { %v8169_v30 = vpop.eup %8168  ;;  %s7882_s16 = spop %7881  ;;  %v6038_v14 = vsel %vm6036_vm0, %v6037_v3, %v6035_v20  ;;  %v6064_v54 = vsel %vm6063_vm1, %v9349_v60, %v6062_v29  ;;  %8178 = vrsqrt.f32 %v9407_v42  ;;  %v6166_v51 = vand.u32 2147483648, %v9372_v47 }
0x5069   :  { %v6010_v4 = vadd.f32 %v6009_v11, %v5989_v28  ;;  %v6083_v33 = vmul.f32 %v8169_v30, %v9353_v62  ;;  %s7884_s3 = spop %7883  ;;  %v8171_v34 = vpop.eup %8170  ;;  %v6067_v35 = vsel %vm6065_vm2, %v6066_v10, %v6064_v54  ;;  %v9409_v26 = vstv %s7882_s16 }
0x506a   :  { %v6104_v38 = vmul.f32 %v8171_v34, %v9356_v0  ;;  %v9420_v41 = vstv %s7884_s3  ;;  %8180 = vrsqrt.f32 %v9409_v26  ;;  %vm6184_vm11 = vcmp.eq.f32.partialorder %v9386_v27, inf }
0x506b   :  { %v6039_v43 = vadd.f32 %v6038_v14, %v6010_v4  ;;  %v6085_v36 = vsel %vm6084_vm3, %v9353_v62, %v6083_v33  ;;  %8182 = vrsqrt.f32 %v9420_v41  ;;  %v6187_v55 = vand.u32 2147483648, %v9386_v27 }
0x506c   :  { %v8173_v21 = vpop.eup %8172  ;;  %v6088_v39 = vsel %vm6086_vm4, %v6087_v19, %v6085_v36  ;;  %v6106_v46 = vsel %vm6105_vm5, %v9356_v0, %v6104_v38  ;;  %s7886_s5 = spop %7885  ;;  %vm6186_vm12 = vcmp.eq.f32.partialorder %v9386_v27, 0.0  ;;  %vm6205_vm13 = vcmp.eq.f32.partialorder %v9407_v42, inf }
0x506d   :  { %v6068_v45 = vadd.f32 %v6067_v35, %v6039_v43  ;;  %v6133_v49 = vmul.f32 %v8173_v21, %v9364_v6  ;;  %v8175_v32 = vpop.eup %8174  ;;  %v6109_v50 = vsel %vm6107_vm6, %v6108_v31, %v6106_v46  ;;  %s7888_s24 = spop %7887  ;;  %v6281_v59 = vstv %s7886_s5 }
0x506e   :  { %v6162_v53 = vmul.f32 %v8175_v32, %v9372_v47  ;;  %v9442_v60 = vstv %s7888_s24  ;;  %8184 = vrsqrt.f32 %v6281_v59  ;;  %v6208_v0 = vand.u32 2147483648, %v9407_v42 }
0x506f   :  { %v6089_v52 = vadd.f32 %v6088_v39, %v6068_v45  ;;  %v6135_v44 = vsel %vm6134_vm7, %v9364_v6, %v6133_v49  ;;  %8186 = vrsqrt.f32 %v9442_v60  ;;  %vm6207_vm14 = vcmp.eq.f32.partialorder %v9407_v42, 0.0 }
0x5070   :  { %v6138_v37 = vsel %vm6136_vm8, %v6137_v40, %v6135_v44  ;;  %v6164_v58 = vsel %vm6163_vm9, %v9372_v47, %v6162_v53  ;;  %s7890_s6 = spop %7889  ;;  %vm6234_vm15 = vcmp.eq.f32.partialorder %v9409_v26, inf  ;;  %v6237_v9 = vand.u32 2147483648, %v9409_v26 }
0x5071   :  { %v8177_v18 = vpop.eup %8176  ;;  %v6110_v57 = vadd.f32 %v6109_v50, %v6089_v52  ;;  %v6167_v61 = vsel %vm6165_vm10, %v6166_v51, %v6164_v58  ;;  %s7892_s27 = spop %7891  ;;  %v6336_v6 = vstv %s7890_s6  ;;  %vm6236_vm0 = vcmp.eq.f32.partialorder %v9409_v26, 0.0 }
0x5072   :  { %v6183_v62 = vmul.f32 %v8177_v18, %v9386_v27  ;;  %v8179_v1 = vpop.eup %8178  ;;  %v6358_v7 = vstv %s7892_s27  ;;  %8188 = vrsqrt.f32 %v6336_v6  ;;  %vm6263_vm1 = vcmp.eq.f32.partialorder %v9420_v41, inf }
0x5073   :  { %v6139_v2 = vadd.f32 %v6138_v37, %v6110_v57  ;;  %v6204_v3 = vmul.f32 %v8179_v1, %v9407_v42  ;;  %8190 = vrsqrt.f32 %v6358_v7  ;;  %v6266_v15 = vand.u32 2147483648, %v9420_v41 }
0x5074   :  { %v6185_v63 = vsel %vm6184_vm11, %v9386_v27, %v6183_v62  ;;  %v8181_v8 = vpop.eup %8180  ;;  %vm6265_vm2 = vcmp.eq.f32.partialorder %v9420_v41, 0.0  ;;  %vm6284_vm3 = vcmp.eq.f32.partialorder %v6281_v59, inf  ;;  %vm6286_vm4 = vcmp.eq.f32.partialorder %v6281_v59, 0.0 }
0x5075   :  { %v6168_v48 = vadd.f32 %v6167_v61, %v6139_v2  ;;  %v6188_v5 = vsel %vm6186_vm12, %v6187_v55, %v6185_v63  ;;  %v6206_v10 = vsel %vm6205_vm13, %v9407_v42, %v6204_v3  ;;  %v6233_v47 = vmul.f32 %v8181_v8, %v9409_v26  ;;  %v8183_v13 = vpop.eup %8182 }
0x5076   :  { %v6209_v12 = vsel %vm6207_vm14, %v6208_v0, %v6206_v10  ;;  %v6262_v19 = vmul.f32 %v8183_v13, %v9420_v41  ;;  %v6287_v27 = vand.u32 2147483648, %v6281_v59  ;;  %vm6305_vm5 = vcmp.eq.f32.partialorder %v9442_v60, inf }
0x5077   :  { %v6189_v56 = vadd.f32 %v6188_v5, %v6168_v48  ;;  %v6235_v17 = vsel %vm6234_vm15, %v9409_v26, %v6233_v47  ;;  %v6308_v30 = vand.u32 2147483648, %v9442_v60  ;;  %vm6307_vm6 = vcmp.eq.f32.partialorder %v9442_v60, 0.0 }
0x5078   :  { %v6238_v22 = vsel %vm6236_vm0, %v6237_v9, %v6235_v17  ;;  %v8185_v23 = vpop.eup %8184  ;;  %v6264_v25 = vsel %vm6263_vm1, %v9420_v41, %v6262_v19  ;;  %vm6339_vm7 = vcmp.eq.f32.partialorder %v6336_v6, inf  ;;  %v6342_v14 = vand.u32 2147483648, %v6336_v6 }
0x5079   :  { %v6210_v16 = vadd.f32 %v6209_v12, %v6189_v56  ;;  %v8187_v28 = vpop.eup %8186  ;;  %v6267_v11 = vsel %vm6265_vm2, %v6266_v15, %v6264_v25  ;;  %v6283_v29 = vmul.f32 %v8185_v23, %v6281_v59  ;;  %vm6361_vm8 = vcmp.eq.f32.partialorder %v6358_v7, inf }
0x507a   :  { %v6304_v20 = vmul.f32 %v8187_v28, %v9442_v60  ;;  %v6364_v34 = vand.u32 2147483648, %v6358_v7  ;;  %vm6341_vm9 = vcmp.eq.f32.partialorder %v6336_v6, 0.0  ;;  %vm6363_vm10 = vcmp.eq.f32.partialorder %v6358_v7, 0.0 }
0x507b   :  { %v6239_v24 = vadd.f32 %v6238_v22, %v6210_v16  ;;  %v6285_v4 = vsel %vm6284_vm3, %v6281_v59, %v6283_v29  ;;  %vm6368_vm11 = vcmask 0  }
0x507c   :  { %v8189_v54 = vpop.eup %8188  ;;  %v6306_v33 = vsel %vm6305_vm5, %v9442_v60, %v6304_v20  ;;  %v6288_v35 = vsel %vm6286_vm4, %v6287_v27, %v6285_v4 }
0x507d   :  { %v6268_v31 = vadd.f32 %v6267_v11, %v6239_v24  ;;  %v8191_v42 = vpop.eup %8190  ;;  %v6338_v26 = vmul.f32 %v8189_v54, %v6336_v6  ;;  %v6309_v36 = vsel %vm6307_vm6, %v6308_v30, %v6306_v33 }
0x507e   :  { %v6360_v38 = vmul.f32 %v8191_v42, %v6358_v7 }
0x507f   :  { %v6289_v43 = vadd.f32 %v6288_v35, %v6268_v31  ;;  %v6340_v39 = vsel %vm6339_vm7, %v6336_v6, %v6338_v26 }
0x5080   :  { %v6343_v40 = vsel %vm6341_vm9, %v6342_v14, %v6340_v39  ;;  %v6362_v41 = vsel %vm6361_vm8, %v6358_v7, %v6360_v38 }
0x5081   :  { %v6310_v21 = vadd.f32 %v6309_v36, %v6289_v43  ;;  %v6365_v46 = vsel %vm6363_vm10, %v6364_v34, %v6362_v41 }
0x5083   :  { %v6344_v45 = vadd.f32 %v6343_v40, %v6310_v21 }
0x5085   :  { %v6366_v49 = vadd.f32 %v6365_v46, %v6344_v45 }
0x5087   :  { %v6367_v32 = vmul.f32 0.01, %v6366_v49 }
0x5089   :  { %6369 = vst.msk [vmem:[#allocation6] sm:$0x1] %vm6368_vm11, %v6367_v32 }
0x508a   :  { %8207 = shalt.err (!%p8204_p4)
}
0x508b   :  { %s8208_s26 = scalar_lea.hbm %s9518_s20, 16 }
0x508c   :  { %p8209_p5 = scmp.ne.s32.totalorder %s9518_s20, %s8208_s26  ;;  %p8212_p6 = scmp.lt.u32.totalorder %s8208_s26, %s9518_s20 }
0x508e   :  { %p8214_p7 = pnand %p8212_p6, %p8209_p5 }
0x5090   :  { %8217 = shalt.err (!%p8214_p7)
}
0x5091   :  { %6389 = dma.vmem_to_hbm [thread:$0]  %s6387_s28, 16, %s9518_s20, [#allocation7]   ;;  %v6497_v50 = vld [vmem:[%s9516_s18] ss:$0 sm:$0xff]  ;;  %vm5914_vm12 = vcmask 74752  }
0x5092   :  { %s8250_s29 = smov [#allocation4]  }
0x5093   :  { %s6376_s0 = sshll.u32 %s8250_s29, 4  ;;  %s6377_s0 = int_to_ptr.vmem [resolvable:$true] %s6376_s0 }
0x5094   :  { %s8218_s1 = scalar_lea.vmem %s6377_s0, 32  ;;  %p8223_p9 = scmp.lt.s32.totalorder %s6377_s0, %s6377_s0 }
0x5095   :  { %p8219_p8 = scmp.ne.s32.totalorder %s6377_s0, %s8218_s1  ;;  %p8224_p10 = scmp.lt.s32.totalorder %s8218_s1, %s8218_s1 }
0x5097   :  { %p8225_p11 = por %p8224_p10, %p8223_p9 }
0x5099   :  { %p8226_p12 = pnand %p8225_p11, %p8219_p8 }
0x50ab   :  { %v5910_v51 = vpop.f32.mrb[62].mxu0 }
0x50ac   :  { %v5911_v52 = vadd.f32 %v6497_v50, %v5910_v51  ;;  %v7490_v44 = vpop.f32.mrb[63].mxu0 }
0x50ae   :  { %5915 = vst.msk [vmem:[#allocation4] sm:$0x3] %vm5914_vm12, %v5911_v52 }
0x50af   :  { %8229 = shalt.err (!%p8226_p12)
}
0x50b0   :  { %s8230_s21 = scalar_lea.hbm %s9517_s19, 32 }
0x50b1   :  { %p8231_p13 = scmp.ne.s32.totalorder %s9517_s19, %s8230_s21  ;;  %p8234_p0 = scmp.lt.u32.totalorder %s8230_s21, %s9517_s19 }
0x50b3   :  { %p8236_p1 = pnand %p8234_p0, %p8231_p13 }
0x50b5   :  { %8239 = shalt.err (!%p8236_p1)
}
0x50b6   :  { %6379 = dma.vmem_to_hbm [thread:$0]  %s6377_s0, 32, %s9517_s19, [#allocation5]  }
0x50b7   :  { %8240 = dma.done.wait [#allocation5], 32  }
0x50b8   :  { %8241 = vsyncadd [#allocation5], 4294967264 }
0x50b9   :  { %8242 = dma.done.wait [#allocation7], 16  }
0x50ba   :  { %8243 = vsyncadd [#allocation7], 4294967280 }
0x50bb   :  { %6396 = vsyncpa [#allocation5], 1 }
0x50bc   :  { %6397 = vsyncpa [#allocation7], 1 }

</bundles_post_ra>
